<compile_context>
chip_gen: v5e
topology: v5e:2x2
jax: 0.10.0
libtpu: 0.0.40
codegen_flags: <defaults>
</compile_context>

<pallas_src>
import functools

import jax
import jax.numpy as jnp
from jax import lax
from jax.experimental import pallas as pl
from jax.experimental.pallas import tpu as pltpu

BN_EPS = 1e-5
CPAD = 128            # lane-dense padded output-channel width
NEG_FLOOR = -1e30     # "no relu" floor for fused-shortcut lanes


def _round_up(x, m):
    return (x + m - 1) // m * m


# --------------------------------------------------------------------------
# Pallas kernel: out = max(A @ W + shift [+ residual], floor) cast to out dtype
# --------------------------------------------------------------------------
def _fused_kernel(has_residual, *refs):
    if has_residual:
        a_ref, w_ref, shift_ref, floor_ref, res_ref, o_ref = refs
    else:
        a_ref, w_ref, shift_ref, floor_ref, o_ref = refs
        res_ref = None

    # bf16 x bf16 on the MXU, f32 accumulate; f32 epilogue (shift + residual
    # + per-lane relu floor), cast only at the store.
    acc = jnp.dot(a_ref[...], w_ref[...], preferred_element_type=jnp.float32)
    acc = acc + shift_ref[...]
    if has_residual:
        acc = acc + res_ref[...].astype(jnp.float32)
    acc = jnp.maximum(acc, floor_ref[...])
    o_ref[...] = acc.astype(o_ref.dtype)


def _pick_tm(M):
    """Biggest M-tile that keeps grid >= 2 (pipelining / megacore) if possible."""
    for tm in (1024, 512, 256):
        if M >= 2 * tm and M % tm == 0:
            return tm
    return M


def pallas_fused_matmul(a, w, shift, floor, residual=None,
                        out_dtype=jnp.bfloat16):
    """Fused GEMM + BN-shift (+ residual) + per-lane-ReLU, M-tiled & pipelined."""
    M, K = a.shape
    Kw, N = w.shape
    assert K == Kw and K % 128 == 0 and N % 128 == 0, (a.shape, w.shape)

    tm = _pick_tm(M)
    grid = (M // tm,)

    a = a.astype(jnp.bfloat16)
    w = w.astype(jnp.bfloat16)
    shift = shift.reshape(1, N).astype(jnp.float32)
    floor = floor.reshape(1, N).astype(jnp.float32)

    inputs = [a, w, shift, floor]
    in_specs = [
        pl.BlockSpec((tm, K), lambda i: (i, 0)),
        pl.BlockSpec((K, N), lambda i: (0, 0)),
        pl.BlockSpec((1, N), lambda i: (0, 0)),
        pl.BlockSpec((1, N), lambda i: (0, 0)),
    ]
    if residual is not None:
        assert residual.shape == (M, N), (residual.shape, (M, N))
        inputs.append(residual.astype(jnp.bfloat16))
        in_specs.append(pl.BlockSpec((tm, N), lambda i: (i, 0)))

    kernel = functools.partial(_fused_kernel, residual is not None)
    return pl.pallas_call(
        kernel,
        out_shape=jax.ShapeDtypeStruct((M, N), out_dtype),
        grid_spec=pltpu.PrefetchScalarGridSpec(
            num_scalar_prefetch=0,
            grid=grid,
            in_specs=in_specs,
            out_specs=pl.BlockSpec((tm, N), lambda i: (i, 0)),
        ),
        compiler_params=pltpu.CompilerParams(
            dimension_semantics=("parallel",)),
    )(*inputs)


# --------------------------------------------------------------------------
# Model glue (im2col, blocks, forward) — thin JAX around the kernel
# --------------------------------------------------------------------------
def im2col3x3(x, stride, kpad):
    """x: (N,H,W,C) -> (N*Ho*Wo, kpad) patches for a 3x3 / pad=1 conv."""
    N, H, W, C = x.shape
    Ho, Wo = H // stride, W // stride
    xp = jnp.pad(x, ((0, 0), (1, 1), (1, 1), (0, 0)))
    cols = []
    for dy in range(3):
        for dx in range(3):
            sl = xp[:, dy:dy + (Ho - 1) * stride + 1:stride,
                    dx:dx + (Wo - 1) * stride + 1:stride, :]
            cols.append(sl)
    patches = jnp.stack(cols, axis=3).reshape(N * Ho * Wo, 9 * C)
    if kpad > 9 * C:                               # lane-dense K for the MXU
        patches = jnp.pad(patches, ((0, 0), (0, kpad - 9 * C)))
    return patches


def conv_call(x, cw, stride, fused, residual=None):
    N, H, W, Cx = x.shape
    cin = cw['cin']
    Ho, Wo = H // stride, W // stride
    xr = x[..., :cin] if Cx > cin else x           # drop zero channel padding
    patches = im2col3x3(xr, stride, cw['kpad'])
    res = None if residual is None else residual.reshape(N * Ho * Wo, CPAD)
    out = fused(patches, cw['w'], cw['shift'], cw['floor'], residual=res)
    return out.reshape(N, Ho, Wo, out.shape[-1])


def basic_block(x, bp, fused):
    stride = bp['stride']
    if bp['fused_shortcut']:
        # One 256-lane GEMM: lanes 0..127 = relu(bn1(conv1)), lanes 128..255 =
        # bn_sc(shortcut 1x1) computed from the patch center tap (no relu).
        comb = conv_call(x, bp['conv1'], stride, fused)       # (N,Ho,Wo,256)
        out1, shortcut = comb[..., :CPAD], comb[..., CPAD:]
    else:
        out1 = conv_call(x, bp['conv1'], stride, fused)
        shortcut = x                                          # identity path
    return conv_call(out1, bp['conv2'], 1, fused, residual=shortcut)


def forward(x_nchw, params, fused):
    x = jnp.transpose(x_nchw, (0, 2, 3, 1)).astype(jnp.bfloat16)   # NCHW->NHWC
    x = conv_call(x, params['conv1'], 1, fused)                    # stem
    for blocks in params['layers']:                                # layer1..3
        for bp in blocks:
            x = basic_block(x, bp, fused)
    # F.avg_pool2d(out, 4): tiny reshape-mean (no pool matrix, no extra kernel)
    N, H, W, _ = x.shape
    pooled = x.astype(jnp.float32).reshape(
        N, H // 4, 4, W // 4, 4, CPAD).mean(axis=(2, 4))            # (N,Hp,Wp,128)
    c = params['c_out']
    feat = jnp.transpose(pooled[..., :c], (0, 3, 1, 2)).reshape(N, -1)  # .view()
    # Final Linear is ~65 kFLOP at batch 2: plain jnp, no pallas_call dispatch.
    return feat @ params['linear']['w'].T + params['linear']['b']


# --------------------------------------------------------------------------
# Parameter prep: fold BN scale into weights, pad K to 128-multiple, pad
# out-channels to 128 lanes, optionally fuse the 1x1 shortcut as lanes 128-255.
# --------------------------------------------------------------------------
def _fold_bn(bn):
    scale = bn['gamma'] / jnp.sqrt(bn['var'] + BN_EPS)
    shift = bn['beta'] - bn['mean'] * scale
    return scale, shift


def _prep_conv3x3(w, bn, sc=None):
    cout, cin = int(w.shape[0]), int(w.shape[1])
    kpad = _round_up(9 * cin, 128)
    scale, shift = _fold_bn(bn)
    # K index layout matches im2col: (dy*3+dx)*cin + c
    wmat = jnp.transpose(w, (2, 3, 1, 0)).reshape(9 * cin, cout) * scale[None, :]
    wmat = jnp.pad(wmat, ((0, kpad - 9 * cin), (0, CPAD - cout)))
    shift_v = jnp.pad(shift, (0, CPAD - cout)).astype(jnp.float32)
    floor_v = jnp.zeros((CPAD,), jnp.float32)          # relu on conv lanes
    if sc is not None:
        sc_w, sc_bn = sc
        sc_cout, sc_cin = int(sc_w.shape[0]), int(sc_w.shape[1])
        assert sc_cin == cin
        s2, sh2 = _fold_bn(sc_bn)
        scmat = sc_w.reshape(sc_cout, sc_cin).T * s2[None, :]        # (cin, cout)
        # 1x1 shortcut == center tap (dy=1,dx=1 -> patch index 4) of the 3x3 patch.
        wsc = (jnp.zeros((kpad, CPAD), jnp.float32)
               .at[4 * cin:5 * cin, :sc_cout].set(scmat))
        wmat = jnp.concatenate([wmat, wsc], axis=1)                  # (kpad, 256)
        shift_v = jnp.concatenate(
            [shift_v, jnp.pad(sh2, (0, CPAD - sc_cout)).astype(jnp.float32)])
        floor_v = jnp.concatenate(
            [floor_v, jnp.full((CPAD,), NEG_FLOOR, jnp.float32)])    # no relu
    return dict(w=wmat.astype(jnp.bfloat16),
                shift=shift_v, floor=floor_v, cin=cin, kpad=kpad)


def prepare_params(raw, num_classes):
    p = dict(conv1=_prep_conv3x3(raw['conv1_w'], raw['bn1']),
             layers=[], num_classes=num_classes)
    for blocks in raw['layers']:
        pblocks = []
        for bp in blocks:
            sc = (bp['sc_w'], bp['sc_bn']) if 'sc_w' in bp else None
            pblocks.append(dict(
                stride=bp['stride'],
                conv1=_prep_conv3x3(bp['conv1_w'], bp['bn1'], sc=sc),
                conv2=_prep_conv3x3(bp['conv2_w'], bp['bn2']),
                fused_shortcut=sc is not None))
        p['layers'].append(pblocks)
    p['c_out'] = int(raw['layers'][-1][-1]['conv2_w'].shape[0])
    p['linear'] = dict(w=raw['linear_w'].astype(jnp.float32),
                       b=raw['linear_b'].astype(jnp.float32))
    return p


# --------------------------------------------------------------------------
# Independent pure-JAX f32 reference (lax.conv) — catches layout/padding bugs
# --------------------------------------------------------------------------
def ref_forward(x_nchw, raw):
    def conv_bn(x, w, bn, stride, pad, relu):
        y = lax.conv_general_dilated(
            x, w, (stride, stride), [(pad, pad), (pad, pad)],
            dimension_numbers=('NCHW', 'OIHW', 'NCHW'))
        scale, shift = _fold_bn(bn)
        y = y * scale[None, :, None, None] + shift[None, :, None, None]
        return jnp.maximum(y, 0.0) if relu else y

    x = x_nchw.astype(jnp.float32)
    out = conv_bn(x, raw['conv1_w'], raw['bn1'], 1, 1, True)
    for blocks in raw['layers']:
        for bp in blocks:
            s = bp['stride']
            o1 = conv_bn(out, bp['conv1_w'], bp['bn1'], s, 1, True)
            o2 = conv_bn(o1, bp['conv2_w'], bp['bn2'], 1, 1, False)
            if 'sc_w' in bp:
                sc = conv_bn(out, bp['sc_w'], bp['sc_bn'], s, 0, False)
            else:
                sc = out
            out = jnp.maximum(o2 + sc, 0.0)
    N, C, H, W = out.shape
    pooled = out.reshape(N, C, H // 4, 4, W // 4, 4).mean(axis=(3, 5))
    feat = pooled.reshape(N, -1)
    return feat @ raw['linear_w'].T + raw['linear_b']


# --------------------------------------------------------------------------
# Deterministic torch-layout parameter init (shapes follow the torch __init__)
# --------------------------------------------------------------------------
def init_raw_params(key, power_in_planes=3, num_blocks=(1, 1, 1, 0),
                    num_classes=10):
    c1 = 2 ** power_in_planes
    keys = iter(jax.random.split(key, 128))

    def nrm(shape, s=0.1):
        return (s * jax.random.normal(next(keys), shape)).astype(jnp.float32)

    def bn(c):
        return dict(gamma=(1.0 + nrm((c,))), beta=nrm((c,)),
                    mean=nrm((c,)), var=(1.0 + jnp.abs(nrm((c,)))))

    params = dict(conv1_w=nrm((c1, 3, 3, 3)), bn1=bn(c1))
    layers = []
    in_planes = c1
    plan = [(c1, num_blocks[0], 1),
            (2 * c1, num_blocks[1], 2),
            (4 * c1, num_blocks[2], 2)]           # layer4 unused by forward()
    for planes, nb, stride in plan:
        blocks = []
        for s in [stride] + [1] * (nb - 1):
            bp = dict(conv1_w=nrm((planes, in_planes, 3, 3)), bn1=bn(planes),
                      conv2_w=nrm((planes, planes, 3, 3)), bn2=bn(planes),
                      stride=s)
            if s != 1 or in_planes != planes:
                bp['sc_w'] = nrm((planes, in_planes, 1, 1))
                bp['sc_bn'] = bn(planes)
            blocks.append(bp)
            in_planes = planes
        layers.append(blocks)
    params['layers'] = layers
    feat = 2 ** (power_in_planes + 4)             # * block.expansion (=1)
    params['linear_w'] = nrm((num_classes, feat))
    params['linear_b'] = nrm((num_classes,))
    return params


# --------------------------------------------------------------------------
if __name__ == "__main__":
    key = jax.random.PRNGKey(0)
    pkey, xkey = jax.random.split(key)

    # ResNet(BasicBlock, num_blocks=[1,1,1,0], num_classes=10, power_in_planes=3)
    raw = init_raw_params(pkey, power_in_planes=3, num_blocks=(1, 1, 1, 0),
                          num_classes=10)
    params = prepare_params(raw, num_classes=10)

    # CIFAR-style input (NCHW): 32x32 is required by the Linear layer dims.
    x = jax.random.normal(xkey, (2, 3, 32, 32), dtype=jnp.float32)

    pallas_fwd = jax.jit(lambda xx: forward(xx, params, pallas_fused_matmul))
    out = jax.block_until_ready(pallas_fwd(x))

    ref = jax.block_until_ready(ref_forward(x, raw))
    assert out.shape == (2, 10), out.shape
    # Tolerance covers bf16 activation/weight quantization vs. the f32 reference.
    assert jnp.allclose(out, ref.astype(out.dtype), rtol=5e-2, atol=5e-2), (out, ref)

    # TODO(synk): training / validation / test loops, pruning, checkpoint IO and
    # tensorboard logging of the torch module are host-side utilities with no
    # kernel equivalent.
    print("KERNEL_OK")
</pallas_src>

<mosaic_0001>
module attributes {stable_mosaic.version = 11 : i64} {
  func.func @_fused_kernel(%arg0: i32, %arg1: memref<1024x128xbf16, #tpu.memory_space<vmem>>, %arg2: memref<128x128xbf16, #tpu.memory_space<vmem>>, %arg3: memref<1x128xf32, #tpu.memory_space<vmem>>, %arg4: memref<1x128xf32, #tpu.memory_space<vmem>>, %arg5: memref<1024x128xbf16, #tpu.memory_space<vmem>>) attributes {dimension_semantics = [#tpu.dimension_semantics<parallel>], iteration_bounds = array<i64: 2>, scalar_prefetch = 0 : i64, scratch_operands = 0 : i64, tpu.core_type = #tpu.core_type<tc>, window_params = [{transform_indices = @transform_0, window_bounds = array<i64: 1024, 128>}, {pipeline_mode = #tpu.pipeline_mode<synchronous>, transform_indices = @transform_1, window_bounds = array<i64: 128, 128>}, {pipeline_mode = #tpu.pipeline_mode<synchronous>, transform_indices = @transform_2, window_bounds = array<i64: 1, 128>}, {pipeline_mode = #tpu.pipeline_mode<synchronous>, transform_indices = @transform_3, window_bounds = array<i64: 1, 128>}, {transform_indices = @transform_4, window_bounds = array<i64: 1024, 128>}]} {
    %c0 = arith.constant 0 : index
    %c0_0 = arith.constant 0 : index
    %0 = vector.load %arg1[%c0, %c0_0] : memref<1024x128xbf16, #tpu.memory_space<vmem>>, vector<1024x128xbf16>
    %c0_1 = arith.constant 0 : index
    %c0_2 = arith.constant 0 : index
    %1 = vector.load %arg2[%c0_1, %c0_2] : memref<128x128xbf16, #tpu.memory_space<vmem>>, vector<128x128xbf16>
    %cst = arith.constant dense<0.000000e+00> : vector<1024x128xf32>
    %2 = tpu.matmul %0, %1, %cst {dimension_numbers = #tpu.dot_dimension_numbers<[1], [0], [0], [1], [0, 0, 1, 1], [], []>} : vector<1024x128xbf16>, vector<128x128xbf16>, vector<1024x128xf32> -> vector<1024x128xf32>
    %c0_3 = arith.constant 0 : index
    %c0_4 = arith.constant 0 : index
    %3 = vector.load %arg3[%c0_3, %c0_4] : memref<1x128xf32, #tpu.memory_space<vmem>>, vector<1x128xf32>
    %4 = vector.broadcast %3 : vector<1x128xf32> to vector<1024x128xf32>
    %5 = arith.addf %2, %4 : vector<1024x128xf32>
    %c0_5 = arith.constant 0 : index
    %c0_6 = arith.constant 0 : index
    %6 = vector.load %arg4[%c0_5, %c0_6] : memref<1x128xf32, #tpu.memory_space<vmem>>, vector<1x128xf32>
    %7 = vector.broadcast %6 : vector<1x128xf32> to vector<1024x128xf32>
    %8 = arith.maximumf %5, %7 : vector<1024x128xf32>
    %9 = arith.truncf %8 : vector<1024x128xf32> to vector<1024x128xbf16>
    %c0_7 = arith.constant 0 : index
    %c0_8 = arith.constant 0 : index
    %10 = vector.load %arg5[%c0_7, %c0_8] : memref<1024x128xbf16, #tpu.memory_space<vmem>>, vector<1024x128xbf16>
    tpu.vector_store %arg5[%c0_7, %c0_8], %9 {strides = array<i32>} : memref<1024x128xbf16, #tpu.memory_space<vmem>>, vector<1024x128xbf16>,
    return
  }
  func.func @transform_0(%arg0: i32) -> (i32, i32) {
    %c0_i32 = arith.constant 0 : i32
    %c0_i32_0 = arith.constant 0 : i32
    return %arg0, %c0_i32 : i32, i32
  }
  func.func @transform_1(%arg0: i32) -> (i32, i32) {
    %c0_i32 = arith.constant 0 : i32
    %c0_i32_0 = arith.constant 0 : i32
    %c0_i32_1 = arith.constant 0 : i32
    return %c0_i32, %c0_i32_0 : i32, i32
  }
  func.func @transform_2(%arg0: i32) -> (i32, i32) {
    %c0_i32 = arith.constant 0 : i32
    %c0_i32_0 = arith.constant 0 : i32
    %c0_i32_1 = arith.constant 0 : i32
    return %c0_i32, %c0_i32_0 : i32, i32
  }
  func.func @transform_3(%arg0: i32) -> (i32, i32) {
    %c0_i32 = arith.constant 0 : i32
    %c0_i32_0 = arith.constant 0 : i32
    %c0_i32_1 = arith.constant 0 : i32
    return %c0_i32, %c0_i32_0 : i32, i32
  }
  func.func @transform_4(%arg0: i32) -> (i32, i32) {
    %c0_i32 = arith.constant 0 : i32
    %c0_i32_0 = arith.constant 0 : i32
    return %arg0, %c0_i32 : i32, i32
  }
}

module attributes {stable_mosaic.version = 11 : i64} {
  func.func @_fused_kernel(%arg0: i32, %arg1: memref<1024x128xbf16, #tpu.memory_space<vmem>>, %arg2: memref<128x128xbf16, #tpu.memory_space<vmem>>, %arg3: memref<1x128xf32, #tpu.memory_space<vmem>>, %arg4: memref<1x128xf32, #tpu.memory_space<vmem>>, %arg5: memref<1024x128xbf16, #tpu.memory_space<vmem>>, %arg6: memref<1024x128xbf16, #tpu.memory_space<vmem>>) attributes {dimension_semantics = [#tpu.dimension_semantics<parallel>], iteration_bounds = array<i64: 2>, scalar_prefetch = 0 : i64, scratch_operands = 0 : i64, tpu.core_type = #tpu.core_type<tc>, window_params = [{transform_indices = @transform_0, window_bounds = array<i64: 1024, 128>}, {pipeline_mode = #tpu.pipeline_mode<synchronous>, transform_indices = @transform_1, window_bounds = array<i64: 128, 128>}, {pipeline_mode = #tpu.pipeline_mode<synchronous>, transform_indices = @transform_2, window_bounds = array<i64: 1, 128>}, {pipeline_mode = #tpu.pipeline_mode<synchronous>, transform_indices = @transform_3, window_bounds = array<i64: 1, 128>}, {transform_indices = @transform_4, window_bounds = array<i64: 1024, 128>}, {transform_indices = @transform_5, window_bounds = array<i64: 1024, 128>}]} {
    %c0 = arith.constant 0 : index
    %c0_0 = arith.constant 0 : index
    %0 = vector.load %arg1[%c0, %c0_0] : memref<1024x128xbf16, #tpu.memory_space<vmem>>, vector<1024x128xbf16>
    %c0_1 = arith.constant 0 : index
    %c0_2 = arith.constant 0 : index
    %1 = vector.load %arg2[%c0_1, %c0_2] : memref<128x128xbf16, #tpu.memory_space<vmem>>, vector<128x128xbf16>
    %cst = arith.constant dense<0.000000e+00> : vector<1024x128xf32>
    %2 = tpu.matmul %0, %1, %cst {dimension_numbers = #tpu.dot_dimension_numbers<[1], [0], [0], [1], [0, 0, 1, 1], [], []>} : vector<1024x128xbf16>, vector<128x128xbf16>, vector<1024x128xf32> -> vector<1024x128xf32>
    %c0_3 = arith.constant 0 : index
    %c0_4 = arith.constant 0 : index
    %3 = vector.load %arg3[%c0_3, %c0_4] : memref<1x128xf32, #tpu.memory_space<vmem>>, vector<1x128xf32>
    %4 = vector.broadcast %3 : vector<1x128xf32> to vector<1024x128xf32>
    %5 = arith.addf %2, %4 : vector<1024x128xf32>
    %c0_5 = arith.constant 0 : index
    %c0_6 = arith.constant 0 : index
    %6 = vector.load %arg5[%c0_5, %c0_6] : memref<1024x128xbf16, #tpu.memory_space<vmem>>, vector<1024x128xbf16>
    %7 = arith.extf %6 : vector<1024x128xbf16> to vector<1024x128xf32>
    %8 = arith.addf %5, %7 : vector<1024x128xf32>
    %c0_7 = arith.constant 0 : index
    %c0_8 = arith.constant 0 : index
    %9 = vector.load %arg4[%c0_7, %c0_8] : memref<1x128xf32, #tpu.memory_space<vmem>>, vector<1x128xf32>
    %10 = vector.broadcast %9 : vector<1x128xf32> to vector<1024x128xf32>
    %11 = arith.maximumf %8, %10 : vector<1024x128xf32>
    %12 = arith.truncf %11 : vector<1024x128xf32> to vector<1024x128xbf16>
    %c0_9 = arith.constant 0 : index
    %c0_10 = arith.constant 0 : index
    %13 = vector.load %arg6[%c0_9, %c0_10] : memref<1024x128xbf16, #tpu.memory_space<vmem>>, vector<1024x128xbf16>
    tpu.vector_store %arg6[%c0_9, %c0_10], %12 {strides = array<i32>} : memref<1024x128xbf16, #tpu.memory_space<vmem>>, vector<1024x128xbf16>,
    return
  }
  func.func @transform_0(%arg0: i32) -> (i32, i32) {
    %c0_i32 = arith.constant 0 : i32
    %c0_i32_0 = arith.constant 0 : i32
    return %arg0, %c0_i32 : i32, i32
  }
  func.func @transform_1(%arg0: i32) -> (i32, i32) {
    %c0_i32 = arith.constant 0 : i32
    %c0_i32_0 = arith.constant 0 : i32
    %c0_i32_1 = arith.constant 0 : i32
    return %c0_i32, %c0_i32_0 : i32, i32
  }
  func.func @transform_2(%arg0: i32) -> (i32, i32) {
    %c0_i32 = arith.constant 0 : i32
    %c0_i32_0 = arith.constant 0 : i32
    %c0_i32_1 = arith.constant 0 : i32
    return %c0_i32, %c0_i32_0 : i32, i32
  }
  func.func @transform_3(%arg0: i32) -> (i32, i32) {
    %c0_i32 = arith.constant 0 : i32
    %c0_i32_0 = arith.constant 0 : i32
    %c0_i32_1 = arith.constant 0 : i32
    return %c0_i32, %c0_i32_0 : i32, i32
  }
  func.func @transform_4(%arg0: i32) -> (i32, i32) {
    %c0_i32 = arith.constant 0 : i32
    %c0_i32_0 = arith.constant 0 : i32
    return %arg0, %c0_i32 : i32, i32
  }
  func.func @transform_5(%arg0: i32) -> (i32, i32) {
    %c0_i32 = arith.constant 0 : i32
    %c0_i32_0 = arith.constant 0 : i32
    return %arg0, %c0_i32 : i32, i32
  }
}

module attributes {stable_mosaic.version = 11 : i64} {
  func.func @_fused_kernel(%arg0: i32, %arg1: memref<256x128xbf16, #tpu.memory_space<vmem>>, %arg2: memref<128x256xbf16, #tpu.memory_space<vmem>>, %arg3: memref<1x256xf32, #tpu.memory_space<vmem>>, %arg4: memref<1x256xf32, #tpu.memory_space<vmem>>, %arg5: memref<256x256xbf16, #tpu.memory_space<vmem>>) attributes {dimension_semantics = [#tpu.dimension_semantics<parallel>], iteration_bounds = array<i64: 2>, scalar_prefetch = 0 : i64, scratch_operands = 0 : i64, tpu.core_type = #tpu.core_type<tc>, window_params = [{transform_indices = @transform_0, window_bounds = array<i64: 256, 128>}, {pipeline_mode = #tpu.pipeline_mode<synchronous>, transform_indices = @transform_1, window_bounds = array<i64: 128, 256>}, {pipeline_mode = #tpu.pipeline_mode<synchronous>, transform_indices = @transform_2, window_bounds = array<i64: 1, 256>}, {pipeline_mode = #tpu.pipeline_mode<synchronous>, transform_indices = @transform_3, window_bounds = array<i64: 1, 256>}, {transform_indices = @transform_4, window_bounds = array<i64: 256, 256>}]} {
    %c0 = arith.constant 0 : index
    %c0_0 = arith.constant 0 : index
    %0 = vector.load %arg1[%c0, %c0_0] : memref<256x128xbf16, #tpu.memory_space<vmem>>, vector<256x128xbf16>
    %c0_1 = arith.constant 0 : index
    %c0_2 = arith.constant 0 : index
    %1 = vector.load %arg2[%c0_1, %c0_2] : memref<128x256xbf16, #tpu.memory_space<vmem>>, vector<128x256xbf16>
    %cst = arith.constant dense<0.000000e+00> : vector<256x256xf32>
    %2 = tpu.matmul %0, %1, %cst {dimension_numbers = #tpu.dot_dimension_numbers<[1], [0], [0], [1], [0, 0, 1, 1], [], []>} : vector<256x128xbf16>, vector<128x256xbf16>, vector<256x256xf32> -> vector<256x256xf32>
    %c0_3 = arith.constant 0 : index
    %c0_4 = arith.constant 0 : index
    %3 = vector.load %arg3[%c0_3, %c0_4] : memref<1x256xf32, #tpu.memory_space<vmem>>, vector<1x256xf32>
    %4 = vector.broadcast %3 : vector<1x256xf32> to vector<256x256xf32>
    %5 = arith.addf %2, %4 : vector<256x256xf32>
    %c0_5 = arith.constant 0 : index
    %c0_6 = arith.constant 0 : index
    %6 = vector.load %arg4[%c0_5, %c0_6] : memref<1x256xf32, #tpu.memory_space<vmem>>, vector<1x256xf32>
    %7 = vector.broadcast %6 : vector<1x256xf32> to vector<256x256xf32>
    %8 = arith.maximumf %5, %7 : vector<256x256xf32>
    %9 = arith.truncf %8 : vector<256x256xf32> to vector<256x256xbf16>
    %c0_7 = arith.constant 0 : index
    %c0_8 = arith.constant 0 : index
    %10 = vector.load %arg5[%c0_7, %c0_8] : memref<256x256xbf16, #tpu.memory_space<vmem>>, vector<256x256xbf16>
    tpu.vector_store %arg5[%c0_7, %c0_8], %9 {strides = array<i32>} : memref<256x256xbf16, #tpu.memory_space<vmem>>, vector<256x256xbf16>,
    return
  }
  func.func @transform_0(%arg0: i32) -> (i32, i32) {
    %c0_i32 = arith.constant 0 : i32
    %c0_i32_0 = arith.constant 0 : i32
    return %arg0, %c0_i32 : i32, i32
  }
  func.func @transform_1(%arg0: i32) -> (i32, i32) {
    %c0_i32 = arith.constant 0 : i32
    %c0_i32_0 = arith.constant 0 : i32
    %c0_i32_1 = arith.constant 0 : i32
    return %c0_i32, %c0_i32_0 : i32, i32
  }
  func.func @transform_2(%arg0: i32) -> (i32, i32) {
    %c0_i32 = arith.constant 0 : i32
    %c0_i32_0 = arith.constant 0 : i32
    %c0_i32_1 = arith.constant 0 : i32
    return %c0_i32, %c0_i32_0 : i32, i32
  }
  func.func @transform_3(%arg0: i32) -> (i32, i32) {
    %c0_i32 = arith.constant 0 : i32
    %c0_i32_0 = arith.constant 0 : i32
    %c0_i32_1 = arith.constant 0 : i32
    return %c0_i32, %c0_i32_0 : i32, i32
  }
  func.func @transform_4(%arg0: i32) -> (i32, i32) {
    %c0_i32 = arith.constant 0 : i32
    %c0_i32_0 = arith.constant 0 : i32
    return %arg0, %c0_i32 : i32, i32
  }
}

module attributes {stable_mosaic.version = 11 : i64} {
  func.func @_fused_kernel(%arg0: i32, %arg1: memref<256x256xbf16, #tpu.memory_space<vmem>>, %arg2: memref<256x128xbf16, #tpu.memory_space<vmem>>, %arg3: memref<1x128xf32, #tpu.memory_space<vmem>>, %arg4: memref<1x128xf32, #tpu.memory_space<vmem>>, %arg5: memref<256x128xbf16, #tpu.memory_space<vmem>>, %arg6: memref<256x128xbf16, #tpu.memory_space<vmem>>) attributes {dimension_semantics = [#tpu.dimension_semantics<parallel>], iteration_bounds = array<i64: 2>, scalar_prefetch = 0 : i64, scratch_operands = 0 : i64, tpu.core_type = #tpu.core_type<tc>, window_params = [{transform_indices = @transform_0, window_bounds = array<i64: 256, 256>}, {pipeline_mode = #tpu.pipeline_mode<synchronous>, transform_indices = @transform_1, window_bounds = array<i64: 256, 128>}, {pipeline_mode = #tpu.pipeline_mode<synchronous>, transform_indices = @transform_2, window_bounds = array<i64: 1, 128>}, {pipeline_mode = #tpu.pipeline_mode<synchronous>, transform_indices = @transform_3, window_bounds = array<i64: 1, 128>}, {transform_indices = @transform_4, window_bounds = array<i64: 256, 128>}, {transform_indices = @transform_5, window_bounds = array<i64: 256, 128>}]} {
    %c0 = arith.constant 0 : index
    %c0_0 = arith.constant 0 : index
    %0 = vector.load %arg1[%c0, %c0_0] : memref<256x256xbf16, #tpu.memory_space<vmem>>, vector<256x256xbf16>
    %c0_1 = arith.constant 0 : index
    %c0_2 = arith.constant 0 : index
    %1 = vector.load %arg2[%c0_1, %c0_2] : memref<256x128xbf16, #tpu.memory_space<vmem>>, vector<256x128xbf16>
    %cst = arith.constant dense<0.000000e+00> : vector<256x128xf32>
    %2 = tpu.matmul %0, %1, %cst {dimension_numbers = #tpu.dot_dimension_numbers<[1], [0], [0], [1], [0, 0, 1, 1], [], []>} : vector<256x256xbf16>, vector<256x128xbf16>, vector<256x128xf32> -> vector<256x128xf32>
    %c0_3 = arith.constant 0 : index
    %c0_4 = arith.constant 0 : index
    %3 = vector.load %arg3[%c0_3, %c0_4] : memref<1x128xf32, #tpu.memory_space<vmem>>, vector<1x128xf32>
    %4 = vector.broadcast %3 : vector<1x128xf32> to vector<256x128xf32>
    %5 = arith.addf %2, %4 : vector<256x128xf32>
    %c0_5 = arith.constant 0 : index
    %c0_6 = arith.constant 0 : index
    %6 = vector.load %arg5[%c0_5, %c0_6] : memref<256x128xbf16, #tpu.memory_space<vmem>>, vector<256x128xbf16>
    %7 = arith.extf %6 : vector<256x128xbf16> to vector<256x128xf32>
    %8 = arith.addf %5, %7 : vector<256x128xf32>
    %c0_7 = arith.constant 0 : index
    %c0_8 = arith.constant 0 : index
    %9 = vector.load %arg4[%c0_7, %c0_8] : memref<1x128xf32, #tpu.memory_space<vmem>>, vector<1x128xf32>
    %10 = vector.broadcast %9 : vector<1x128xf32> to vector<256x128xf32>
    %11 = arith.maximumf %8, %10 : vector<256x128xf32>
    %12 = arith.truncf %11 : vector<256x128xf32> to vector<256x128xbf16>
    %c0_9 = arith.constant 0 : index
    %c0_10 = arith.constant 0 : index
    %13 = vector.load %arg6[%c0_9, %c0_10] : memref<256x128xbf16, #tpu.memory_space<vmem>>, vector<256x128xbf16>
    tpu.vector_store %arg6[%c0_9, %c0_10], %12 {strides = array<i32>} : memref<256x128xbf16, #tpu.memory_space<vmem>>, vector<256x128xbf16>,
    return
  }
  func.func @transform_0(%arg0: i32) -> (i32, i32) {
    %c0_i32 = arith.constant 0 : i32
    %c0_i32_0 = arith.constant 0 : i32
    return %arg0, %c0_i32 : i32, i32
  }
  func.func @transform_1(%arg0: i32) -> (i32, i32) {
    %c0_i32 = arith.constant 0 : i32
    %c0_i32_0 = arith.constant 0 : i32
    %c0_i32_1 = arith.constant 0 : i32
    return %c0_i32, %c0_i32_0 : i32, i32
  }
  func.func @transform_2(%arg0: i32) -> (i32, i32) {
    %c0_i32 = arith.constant 0 : i32
    %c0_i32_0 = arith.constant 0 : i32
    %c0_i32_1 = arith.constant 0 : i32
    return %c0_i32, %c0_i32_0 : i32, i32
  }
  func.func @transform_3(%arg0: i32) -> (i32, i32) {
    %c0_i32 = arith.constant 0 : i32
    %c0_i32_0 = arith.constant 0 : i32
    %c0_i32_1 = arith.constant 0 : i32
    return %c0_i32, %c0_i32_0 : i32, i32
  }
  func.func @transform_4(%arg0: i32) -> (i32, i32) {
    %c0_i32 = arith.constant 0 : i32
    %c0_i32_0 = arith.constant 0 : i32
    return %arg0, %c0_i32 : i32, i32
  }
  func.func @transform_5(%arg0: i32) -> (i32, i32) {
    %c0_i32 = arith.constant 0 : i32
    %c0_i32_0 = arith.constant 0 : i32
    return %arg0, %c0_i32 : i32, i32
  }
}

module attributes {stable_mosaic.version = 11 : i64} {
  func.func @_fused_kernel(%arg0: i32, %arg1: memref<128x256xbf16, #tpu.memory_space<vmem>>, %arg2: memref<256x256xbf16, #tpu.memory_space<vmem>>, %arg3: memref<1x256xf32, #tpu.memory_space<vmem>>, %arg4: memref<1x256xf32, #tpu.memory_space<vmem>>, %arg5: memref<128x256xbf16, #tpu.memory_space<vmem>>) attributes {dimension_semantics = [#tpu.dimension_semantics<parallel>], iteration_bounds = array<i64: 1>, scalar_prefetch = 0 : i64, scratch_operands = 0 : i64, tpu.core_type = #tpu.core_type<tc>, window_params = [{transform_indices = @transform_0, window_bounds = array<i64: 128, 256>}, {pipeline_mode = #tpu.pipeline_mode<synchronous>, transform_indices = @transform_1, window_bounds = array<i64: 256, 256>}, {pipeline_mode = #tpu.pipeline_mode<synchronous>, transform_indices = @transform_2, window_bounds = array<i64: 1, 256>}, {pipeline_mode = #tpu.pipeline_mode<synchronous>, transform_indices = @transform_3, window_bounds = array<i64: 1, 256>}, {transform_indices = @transform_4, window_bounds = array<i64: 128, 256>}]} {
    %c0 = arith.constant 0 : index
    %c0_0 = arith.constant 0 : index
    %0 = vector.load %arg1[%c0, %c0_0] : memref<128x256xbf16, #tpu.memory_space<vmem>>, vector<128x256xbf16>
    %c0_1 = arith.constant 0 : index
    %c0_2 = arith.constant 0 : index
    %1 = vector.load %arg2[%c0_1, %c0_2] : memref<256x256xbf16, #tpu.memory_space<vmem>>, vector<256x256xbf16>
    %cst = arith.constant dense<0.000000e+00> : vector<128x256xf32>
    %2 = tpu.matmul %0, %1, %cst {dimension_numbers = #tpu.dot_dimension_numbers<[1], [0], [0], [1], [0, 0, 1, 1], [], []>} : vector<128x256xbf16>, vector<256x256xbf16>, vector<128x256xf32> -> vector<128x256xf32>
    %c0_3 = arith.constant 0 : index
    %c0_4 = arith.constant 0 : index
    %3 = vector.load %arg3[%c0_3, %c0_4] : memref<1x256xf32, #tpu.memory_space<vmem>>, vector<1x256xf32>
    %4 = vector.broadcast %3 : vector<1x256xf32> to vector<128x256xf32>
    %5 = arith.addf %2, %4 : vector<128x256xf32>
    %c0_5 = arith.constant 0 : index
    %c0_6 = arith.constant 0 : index
    %6 = vector.load %arg4[%c0_5, %c0_6] : memref<1x256xf32, #tpu.memory_space<vmem>>, vector<1x256xf32>
    %7 = vector.broadcast %6 : vector<1x256xf32> to vector<128x256xf32>
    %8 = arith.maximumf %5, %7 : vector<128x256xf32>
    %9 = arith.truncf %8 : vector<128x256xf32> to vector<128x256xbf16>
    %c0_7 = arith.constant 0 : index
    %c0_8 = arith.constant 0 : index
    %10 = vector.load %arg5[%c0_7, %c0_8] : memref<128x256xbf16, #tpu.memory_space<vmem>>, vector<128x256xbf16>
    tpu.vector_store %arg5[%c0_7, %c0_8], %9 {strides = array<i32>} : memref<128x256xbf16, #tpu.memory_space<vmem>>, vector<128x256xbf16>,
    return
  }
  func.func @transform_0(%arg0: i32) -> (i32, i32) {
    %c0_i32 = arith.constant 0 : i32
    %c0_i32_0 = arith.constant 0 : i32
    return %arg0, %c0_i32 : i32, i32
  }
  func.func @transform_1(%arg0: i32) -> (i32, i32) {
    %c0_i32 = arith.constant 0 : i32
    %c0_i32_0 = arith.constant 0 : i32
    %c0_i32_1 = arith.constant 0 : i32
    return %c0_i32, %c0_i32_0 : i32, i32
  }
  func.func @transform_2(%arg0: i32) -> (i32, i32) {
    %c0_i32 = arith.constant 0 : i32
    %c0_i32_0 = arith.constant 0 : i32
    %c0_i32_1 = arith.constant 0 : i32
    return %c0_i32, %c0_i32_0 : i32, i32
  }
  func.func @transform_3(%arg0: i32) -> (i32, i32) {
    %c0_i32 = arith.constant 0 : i32
    %c0_i32_0 = arith.constant 0 : i32
    %c0_i32_1 = arith.constant 0 : i32
    return %c0_i32, %c0_i32_0 : i32, i32
  }
  func.func @transform_4(%arg0: i32) -> (i32, i32) {
    %c0_i32 = arith.constant 0 : i32
    %c0_i32_0 = arith.constant 0 : i32
    return %arg0, %c0_i32 : i32, i32
  }
}

module attributes {stable_mosaic.version = 11 : i64} {
  func.func @_fused_kernel(%arg0: i32, %arg1: memref<128x384xbf16, #tpu.memory_space<vmem>>, %arg2: memref<384x128xbf16, #tpu.memory_space<vmem>>, %arg3: memref<1x128xf32, #tpu.memory_space<vmem>>, %arg4: memref<1x128xf32, #tpu.memory_space<vmem>>, %arg5: memref<128x128xbf16, #tpu.memory_space<vmem>>, %arg6: memref<128x128xbf16, #tpu.memory_space<vmem>>) attributes {dimension_semantics = [#tpu.dimension_semantics<parallel>], iteration_bounds = array<i64: 1>, scalar_prefetch = 0 : i64, scratch_operands = 0 : i64, tpu.core_type = #tpu.core_type<tc>, window_params = [{transform_indices = @transform_0, window_bounds = array<i64: 128, 384>}, {pipeline_mode = #tpu.pipeline_mode<synchronous>, transform_indices = @transform_1, window_bounds = array<i64: 384, 128>}, {pipeline_mode = #tpu.pipeline_mode<synchronous>, transform_indices = @transform_2, window_bounds = array<i64: 1, 128>}, {pipeline_mode = #tpu.pipeline_mode<synchronous>, transform_indices = @transform_3, window_bounds = array<i64: 1, 128>}, {transform_indices = @transform_4, window_bounds = array<i64: 128, 128>}, {transform_indices = @transform_5, window_bounds = array<i64: 128, 128>}]} {
    %c0 = arith.constant 0 : index
    %c0_0 = arith.constant 0 : index
    %0 = vector.load %arg1[%c0, %c0_0] : memref<128x384xbf16, #tpu.memory_space<vmem>>, vector<128x384xbf16>
    %c0_1 = arith.constant 0 : index
    %c0_2 = arith.constant 0 : index
    %1 = vector.load %arg2[%c0_1, %c0_2] : memref<384x128xbf16, #tpu.memory_space<vmem>>, vector<384x128xbf16>
    %cst = arith.constant dense<0.000000e+00> : vector<128x128xf32>
    %2 = tpu.matmul %0, %1, %cst {dimension_numbers = #tpu.dot_dimension_numbers<[1], [0], [0], [1], [0, 0, 1, 1], [], []>} : vector<128x384xbf16>, vector<384x128xbf16>, vector<128x128xf32> -> vector<128x128xf32>
    %c0_3 = arith.constant 0 : index
    %c0_4 = arith.constant 0 : index
    %3 = vector.load %arg3[%c0_3, %c0_4] : memref<1x128xf32, #tpu.memory_space<vmem>>, vector<1x128xf32>
    %4 = vector.broadcast %3 : vector<1x128xf32> to vector<128x128xf32>
    %5 = arith.addf %2, %4 : vector<128x128xf32>
    %c0_5 = arith.constant 0 : index
    %c0_6 = arith.constant 0 : index
    %6 = vector.load %arg5[%c0_5, %c0_6] : memref<128x128xbf16, #tpu.memory_space<vmem>>, vector<128x128xbf16>
    %7 = arith.extf %6 : vector<128x128xbf16> to vector<128x128xf32>
    %8 = arith.addf %5, %7 : vector<128x128xf32>
    %c0_7 = arith.constant 0 : index
    %c0_8 = arith.constant 0 : index
    %9 = vector.load %arg4[%c0_7, %c0_8] : memref<1x128xf32, #tpu.memory_space<vmem>>, vector<1x128xf32>
    %10 = vector.broadcast %9 : vector<1x128xf32> to vector<128x128xf32>
    %11 = arith.maximumf %8, %10 : vector<128x128xf32>
    %12 = arith.truncf %11 : vector<128x128xf32> to vector<128x128xbf16>
    %c0_9 = arith.constant 0 : index
    %c0_10 = arith.constant 0 : index
    %13 = vector.load %arg6[%c0_9, %c0_10] : memref<128x128xbf16, #tpu.memory_space<vmem>>, vector<128x128xbf16>
    tpu.vector_store %arg6[%c0_9, %c0_10], %12 {strides = array<i32>} : memref<128x128xbf16, #tpu.memory_space<vmem>>, vector<128x128xbf16>,
    return
  }
  func.func @transform_0(%arg0: i32) -> (i32, i32) {
    %c0_i32 = arith.constant 0 : i32
    %c0_i32_0 = arith.constant 0 : i32
    return %arg0, %c0_i32 : i32, i32
  }
  func.func @transform_1(%arg0: i32) -> (i32, i32) {
    %c0_i32 = arith.constant 0 : i32
    %c0_i32_0 = arith.constant 0 : i32
    %c0_i32_1 = arith.constant 0 : i32
    return %c0_i32, %c0_i32_0 : i32, i32
  }
  func.func @transform_2(%arg0: i32) -> (i32, i32) {
    %c0_i32 = arith.constant 0 : i32
    %c0_i32_0 = arith.constant 0 : i32
    %c0_i32_1 = arith.constant 0 : i32
    return %c0_i32, %c0_i32_0 : i32, i32
  }
  func.func @transform_3(%arg0: i32) -> (i32, i32) {
    %c0_i32 = arith.constant 0 : i32
    %c0_i32_0 = arith.constant 0 : i32
    %c0_i32_1 = arith.constant 0 : i32
    return %c0_i32, %c0_i32_0 : i32, i32
  }
  func.func @transform_4(%arg0: i32) -> (i32, i32) {
    %c0_i32 = arith.constant 0 : i32
    %c0_i32_0 = arith.constant 0 : i32
    return %arg0, %c0_i32 : i32, i32
  }
  func.func @transform_5(%arg0: i32) -> (i32, i32) {
    %c0_i32 = arith.constant 0 : i32
    %c0_i32_0 = arith.constant 0 : i32
    return %arg0, %c0_i32 : i32, i32
  }
}

</mosaic_0001>

<bundles_post_ra>
// kernel: _lambda_.7
= control target key start
LH: loop header
LB: loop body
LE: loop exit
PB: predicated region body
PF: predicated region fallthrough
CT: control target
= control target key end

     0   :  { %s2377_s15 = smov 0   ;;  %s2798_s0 = inlined_call_operand.vmem [shape: bf16[2048,128], index: 0, kind: input, shape index: {}]   ;;  %s2799_s1 = inlined_call_operand.vmem [shape: bf16[128,128], index: 1, kind: input, shape index: {}]   ;;  %s2800_s2 = inlined_call_operand.vmem [shape: f32[1,128], index: 2, kind: input, shape index: {}]   ;;  %s2801_s3 = inlined_call_operand.vmem [shape: f32[1,128], index: 3, kind: input, shape index: {}]   ;;  %s2802_s4 = inlined_call_operand.vmem [shape: bf16[2048,128], index: 4, kind: output, shape index: {}]  }
   0x1 LB: > { %s1554_s16 = sadd.s32 4294967295, %s2350_s15   ;;  %p1558_p0 = scmp.ge.s32.totalorder %s2350_s15, 1  ;;  %s2350_s15 = sphi %s2377_s15, %s14_s15  }
   0x2   : > { %p163_p1 = scmp.lt.s32.totalorder %s2350_s15, 3 }
   0x4   : > { %p164_p2 = pnand %p1558_p0, %p163_p1 }
   0x5   : > { %s1559_s25 = sshll.u32 (!%p164_p2), %s1554_s16, 7 }
   0x6   : > { %167 = sbr.rel (%p164_p2) target bundleno = 432 (0x1b0), region = 36  ;;  %p190_p3 = scmp.lt.s32.totalorder (!%p164_p2), %s1559_s25, 255 }
   0xb   : > { %v1924_v0 = vld [vmem:[%s2799_s1 + $0x38] sm:$0xff]  ;;  %v1923_v1 = vld [vmem:[%s2799_s1 + $0x30] sm:$0xff]  ;;  %v1922_v2 = vld [vmem:[%s2799_s1 + $0x28] sm:$0xff]  ;;  %s2804_s25 = smov (!%p190_p3, %s1559_s25), 255 }
   0xc   : > { %781 = vmatpush.bf16.msra.mxu0 %v1924_v0  ;;  %2308 = vmatpush.bf16.msra.mxu1 %v1924_v0  ;;  %v1921_v3 = vld [vmem:[%s2799_s1 + $0x20] sm:$0xff]  ;;  %v1920_v4 = vld [vmem:[%s2799_s1 + $0x18] sm:$0xff]  ;;  %v1919_v5 = vld [vmem:[%s2799_s1 + $0x10] sm:$0xff]  ;;  %s1560_s6 = sshll.u32 %s2804_s25, 2 }
   0xd   : > { %2309 = vmatpush.bf16.msra.mxu2 %v1924_v0  ;;  %2310 = vmatpush.bf16.msra.mxu3 %v1924_v0  ;;  %v1918_v6 = vld [vmem:[%s2799_s1 + $0x8] sm:$0xff]  ;;  %v1917_v7 = vld [vmem:[%s2799_s1] sm:$0xff]  ;;  %s2417_s11 = scalar_lea.vmem %s2798_s0, %s1560_s6  ;;  %s2478_s19 = scalar_lea.vmem %s2802_s4, %s1560_s6 }
   0xe   : > { %v1853_v8 = vld [vmem:[%s2417_s11] sm:$0xff]  ;;  %v1854_v12 = vld [vmem:[%s2417_s11 + $0x8] sm:$0xff]  ;;  %v1855_v16 = vld [vmem:[%s2417_s11 + $0x10] sm:$0xff] }
   0xf   : > { %v1869_v9 = vld [vmem:[%s2417_s11 + $0x80] sm:$0xff]  ;;  %v1870_v13 = vld [vmem:[%s2417_s11 + $0x88] sm:$0xff]  ;;  %v1871_v17 = vld [vmem:[%s2417_s11 + $0x90] sm:$0xff] }
  0x10   : > { %782 = vmatpush.bf16.msra.mxu0 %v1923_v1  ;;  %2311 = vmatpush.bf16.msra.mxu1 %v1923_v1  ;;  %v1885_v10 = vld [vmem:[%s2417_s11 + $0x100] sm:$0xff]  ;;  %v1886_v14 = vld [vmem:[%s2417_s11 + $0x108] sm:$0xff]  ;;  %v1887_v18 = vld [vmem:[%s2417_s11 + $0x110] sm:$0xff] }
  0x11   : > { %2312 = vmatpush.bf16.msra.mxu2 %v1923_v1  ;;  %2313 = vmatpush.bf16.msra.mxu3 %v1923_v1  ;;  %v1901_v11 = vld [vmem:[%s2417_s11 + $0x180] sm:$0xff]  ;;  %v1902_v15 = vld [vmem:[%s2417_s11 + $0x188] sm:$0xff]  ;;  %v1903_v19 = vld [vmem:[%s2417_s11 + $0x190] sm:$0xff] }
  0x12   : > { %v1856_v20 = vld [vmem:[%s2417_s11 + $0x18] sm:$0xff]  ;;  %v1857_v24 = vld [vmem:[%s2417_s11 + $0x20] sm:$0xff]  ;;  %v1858_v28 = vld [vmem:[%s2417_s11 + $0x28] sm:$0xff] }
  0x13   : > { %v1872_v21 = vld [vmem:[%s2417_s11 + $0x98] sm:$0xff]  ;;  %v1873_v25 = vld [vmem:[%s2417_s11 + $0xa0] sm:$0xff]  ;;  %v1874_v29 = vld [vmem:[%s2417_s11 + $0xa8] sm:$0xff] }
  0x14   : > { %783 = vmatpush.bf16.msra.mxu0 %v1922_v2  ;;  %2314 = vmatpush.bf16.msra.mxu1 %v1922_v2  ;;  %v1888_v22 = vld [vmem:[%s2417_s11 + $0x118] sm:$0xff]  ;;  %v1889_v26 = vld [vmem:[%s2417_s11 + $0x120] sm:$0xff]  ;;  %v1890_v30 = vld [vmem:[%s2417_s11 + $0x128] sm:$0xff] }
  0x15   : > { %2315 = vmatpush.bf16.msra.mxu2 %v1922_v2  ;;  %2316 = vmatpush.bf16.msra.mxu3 %v1922_v2  ;;  %v1904_v23 = vld [vmem:[%s2417_s11 + $0x198] sm:$0xff]  ;;  %v1905_v27 = vld [vmem:[%s2417_s11 + $0x1a0] sm:$0xff]  ;;  %v1906_v31 = vld [vmem:[%s2417_s11 + $0x1a8] sm:$0xff] }
  0x16   : > { %v1859_v32 = vld [vmem:[%s2417_s11 + $0x30] sm:$0xff]  ;;  %v1860_v36 = vld [vmem:[%s2417_s11 + $0x38] sm:$0xff]  ;;  %v1861_v40 = vld [vmem:[%s2417_s11 + $0x40] sm:$0xff] }
  0x17   : > { %v1875_v33 = vld [vmem:[%s2417_s11 + $0xb0] sm:$0xff]  ;;  %v1876_v37 = vld [vmem:[%s2417_s11 + $0xb8] sm:$0xff]  ;;  %v1877_v41 = vld [vmem:[%s2417_s11 + $0xc0] sm:$0xff] }
  0x18   : > { %784 = vmatpush.bf16.msra.mxu0 %v1921_v3  ;;  %2317 = vmatpush.bf16.msra.mxu1 %v1921_v3  ;;  %v1891_v34 = vld [vmem:[%s2417_s11 + $0x130] sm:$0xff]  ;;  %v1892_v38 = vld [vmem:[%s2417_s11 + $0x138] sm:$0xff]  ;;  %v1893_v44 = vld [vmem:[%s2417_s11 + $0x140] sm:$0xff] }
  0x19   : > { %2318 = vmatpush.bf16.msra.mxu2 %v1921_v3  ;;  %2319 = vmatpush.bf16.msra.mxu3 %v1921_v3  ;;  %v1907_v35 = vld [vmem:[%s2417_s11 + $0x1b0] sm:$0xff]  ;;  %v1908_v39 = vld [vmem:[%s2417_s11 + $0x1b8] sm:$0xff]  ;;  %v1909_v45 = vld [vmem:[%s2417_s11 + $0x1c0] sm:$0xff] }
  0x1a   : > { %v2458_v46 = vld [vmem:[%s2800_s2] ss:$0 sm:$0xff]  ;;  %v1862_v2 = vld [vmem:[%s2417_s11 + $0x48] sm:$0xff] }
  0x1b   : > { %v2464_v48 = vld [vmem:[%s2801_s3] ss:$0 sm:$0xff]  ;;  %v1878_v3 = vld [vmem:[%s2417_s11 + $0xc8] sm:$0xff] }
  0x1c   : > { %785 = vmatpush.bf16.msra.mxu0 %v1920_v4  ;;  %2320 = vmatpush.bf16.msra.mxu1 %v1920_v4 }
  0x1d   : > { %2321 = vmatpush.bf16.msra.mxu2 %v1920_v4  ;;  %2322 = vmatpush.bf16.msra.mxu3 %v1920_v4 }
  0x20   : > { %786 = vmatpush.bf16.msra.mxu0 %v1919_v5  ;;  %2323 = vmatpush.bf16.msra.mxu1 %v1919_v5 }
  0x21   : > { %2324 = vmatpush.bf16.msra.mxu2 %v1919_v5  ;;  %2325 = vmatpush.bf16.msra.mxu3 %v1919_v5 }
  0x24   : > { %787 = vmatpush.bf16.msra.mxu0 %v1918_v6  ;;  %2326 = vmatpush.bf16.msra.mxu1 %v1918_v6 }
  0x25   : > { %2327 = vmatpush.bf16.msra.mxu2 %v1918_v6  ;;  %2328 = vmatpush.bf16.msra.mxu3 %v1918_v6 }
  0x28   : > { %788 = vmatpush.bf16.msra.mxu0 %v1917_v7  ;;  %2329 = vmatpush.bf16.msra.mxu1 %v1917_v7 }
  0x29   : > { %2330 = vmatpush.bf16.msra.mxu2 %v1917_v7  ;;  %2331 = vmatpush.bf16.msra.mxu3 %v1917_v7 }
  0x2b   : > { %789 = vmatmul.bf16.vlgmr.msra.gmra.mxu0 %v1853_v8  ;;  %869 = vmatmul.bf16.vlgmr.msra.gmra.mxu1 %v1869_v9  ;;  %v1894_v8 = vld [vmem:[%s2417_s11 + $0x148] sm:$0xff] }
  0x2c   : > { %949 = vmatmul.bf16.vlgmr.msra.gmra.mxu2 %v1885_v10  ;;  %1029 = vmatmul.bf16.vlgmr.msra.gmra.mxu3 %v1901_v11  ;;  %v1910_v9 = vld [vmem:[%s2417_s11 + $0x1c8] sm:$0xff] }
  0x3b   : > { %794 = vmatmul.bf16.gmra.mxu0 %v1854_v12  ;;  %874 = vmatmul.bf16.gmra.mxu1 %v1870_v13 }
  0x3c   : > { %954 = vmatmul.bf16.gmra.mxu2 %v1886_v14  ;;  %1034 = vmatmul.bf16.gmra.mxu3 %v1902_v15 }
  0x4b   : > { %799 = vmatmul.bf16.gmra.mxu0 %v1855_v16  ;;  %879 = vmatmul.bf16.gmra.mxu1 %v1871_v17 }
  0x4c   : > { %959 = vmatmul.bf16.gmra.mxu2 %v1887_v18  ;;  %1039 = vmatmul.bf16.gmra.mxu3 %v1903_v19 }
  0x5b   : > { %804 = vmatmul.bf16.gmra.mxu0 %v1856_v20  ;;  %884 = vmatmul.bf16.gmra.mxu1 %v1872_v21 }
  0x5c   : > { %964 = vmatmul.bf16.gmra.mxu2 %v1888_v22  ;;  %1044 = vmatmul.bf16.gmra.mxu3 %v1904_v23 }
  0x6b   : > { %809 = vmatmul.bf16.gmra.mxu0 %v1857_v24  ;;  %889 = vmatmul.bf16.gmra.mxu1 %v1873_v25 }
  0x6c   : > { %969 = vmatmul.bf16.gmra.mxu2 %v1889_v26  ;;  %1049 = vmatmul.bf16.gmra.mxu3 %v1905_v27 }
  0x7b   : > { %814 = vmatmul.bf16.gmra.mxu0 %v1858_v28  ;;  %894 = vmatmul.bf16.gmra.mxu1 %v1874_v29 }
  0x7c   : > { %974 = vmatmul.bf16.gmra.mxu2 %v1890_v30  ;;  %1054 = vmatmul.bf16.gmra.mxu3 %v1906_v31 }
  0x8b   : > { %819 = vmatmul.bf16.gmra.mxu0 %v1859_v32  ;;  %899 = vmatmul.bf16.gmra.mxu1 %v1875_v33 }
  0x8c   : > { %979 = vmatmul.bf16.gmra.mxu2 %v1891_v34  ;;  %1059 = vmatmul.bf16.gmra.mxu3 %v1907_v35  ;;  %v1863_v34 = vld [vmem:[%s2417_s11 + $0x50] sm:$0xff] }
  0x8d   : > { %v1879_v35 = vld [vmem:[%s2417_s11 + $0xd0] sm:$0xff] }
  0x9b   : > { %824 = vmatmul.bf16.gmra.mxu0 %v1860_v36  ;;  %904 = vmatmul.bf16.gmra.mxu1 %v1876_v37 }
  0x9c   : > { %984 = vmatmul.bf16.gmra.mxu2 %v1892_v38  ;;  %1064 = vmatmul.bf16.gmra.mxu3 %v1908_v39 }
  0xa8   : > { %v790_v42 = vpop.f32.mrf.mxu0  ;;  %v870_v43 = vpop.f32.mrf.mxu1 }
  0xa9   : > { %v791_v47 = vadd.f32 %v2458_v46, %v790_v42  ;;  %v871_v49 = vadd.f32 %v2458_v46, %v870_v43 }
  0xab   : > { %829 = vmatmul.bf16.gmra.mxu0 %v1861_v40  ;;  %909 = vmatmul.bf16.gmra.mxu1 %v1877_v41  ;;  %v1114_v56 = vmax.f32 %v791_v47, %v2464_v48  ;;  %v1146_v57 = vmax.f32 %v871_v49, %v2464_v48  ;;  %v1895_v40 = vld [vmem:[%s2417_s11 + $0x150] sm:$0xff] }
  0xac   : > { %989 = vmatmul.bf16.gmra.mxu2 %v1893_v44  ;;  %1069 = vmatmul.bf16.gmra.mxu3 %v1909_v45  ;;  %v1911_v41 = vld [vmem:[%s2417_s11 + $0x1d0] sm:$0xff] }
  0xaf   : > { %v950_v50 = vpop.f32.mrf.mxu2  ;;  %v1030_v51 = vpop.f32.mrf.mxu3 }
  0xb0   : > { %v792_v52 = vpop.f32.mrf.mxu0  ;;  %v872_v53 = vpop.f32.mrf.mxu1  ;;  %v951_v62 = vadd.f32 %v2458_v46, %v950_v50  ;;  %v1031_v63 = vadd.f32 %v2458_v46, %v1030_v51 }
  0xb1   : > { %v793_v54 = vadd.f32 %v2458_v46, %v792_v52  ;;  %v873_v55 = vadd.f32 %v2458_v46, %v872_v53 }
  0xb2   : > { %v1178_v10 = vmax.f32 %v951_v62, %v2464_v48  ;;  %v1210_v11 = vmax.f32 %v1031_v63, %v2464_v48 }
  0xb3   : > { %v1115_v58 = vmax.f32 %v793_v54, %v2464_v48  ;;  %v1147_v59 = vmax.f32 %v873_v55, %v2464_v48 }
  0xb5   : > { %v1928_v60 = vpack.c.bf16 %v1115_v58, %v1114_v56  ;;  %v2008_v61 = vpack.c.bf16 %v1147_v59, %v1146_v57 }
  0xb7   : > { %1929 = vst [vmem:[%s2478_s19] sm:$0xff] %v1928_v60   ;;  %v952_v0 = vpop.f32.mrf.mxu2  ;;  %v1032_v1 = vpop.f32.mrf.mxu3 }
  0xb8   : > { %2260 = vst [vmem:[%s2478_s19 + $0x80] sm:$0xff] %v2008_v61   ;;  %v953_v4 = vadd.f32 %v2458_v46, %v952_v0  ;;  %v1033_v5 = vadd.f32 %v2458_v46, %v1032_v1  ;;  %v795_v6 = vpop.f32.mrf.mxu0  ;;  %v875_v7 = vpop.f32.mrf.mxu1 }
  0xb9   : > { %v796_v16 = vadd.f32 %v2458_v46, %v795_v6  ;;  %v876_v17 = vadd.f32 %v2458_v46, %v875_v7 }
  0xba   : > { %v1179_v12 = vmax.f32 %v953_v4, %v2464_v48  ;;  %v1211_v13 = vmax.f32 %v1033_v5, %v2464_v48  ;;  %v1864_v4 = vld [vmem:[%s2417_s11 + $0x58] sm:$0xff] }
  0xbb   : > { %834 = vmatmul.bf16.gmra.mxu0 %v1862_v2  ;;  %914 = vmatmul.bf16.gmra.mxu1 %v1878_v3  ;;  %v1116_v24 = vmax.f32 %v796_v16, %v2464_v48  ;;  %v1148_v25 = vmax.f32 %v876_v17, %v2464_v48  ;;  %v1880_v5 = vld [vmem:[%s2417_s11 + $0xd8] sm:$0xff] }
  0xbc   : > { %v2088_v14 = vpack.c.bf16 %v1179_v12, %v1178_v10  ;;  %v2168_v15 = vpack.c.bf16 %v1211_v13, %v1210_v11  ;;  %994 = vmatmul.bf16.gmra.mxu2 %v1894_v8  ;;  %1074 = vmatmul.bf16.gmra.mxu3 %v1910_v9  ;;  %v1896_v10 = vld [vmem:[%s2417_s11 + $0x158] sm:$0xff] }
  0xbd   : > { %v1912_v11 = vld [vmem:[%s2417_s11 + $0x1d8] sm:$0xff] }
  0xbe   : > { %2276 = vst [vmem:[%s2478_s19 + $0x100] sm:$0xff] %v2088_v14  }
  0xbf   : > { %2292 = vst [vmem:[%s2478_s19 + $0x180] sm:$0xff] %v2168_v15   ;;  %v955_v18 = vpop.f32.mrf.mxu2  ;;  %v1035_v19 = vpop.f32.mrf.mxu3 }
  0xc0   : > { %v797_v20 = vpop.f32.mrf.mxu0  ;;  %v877_v21 = vpop.f32.mrf.mxu1  ;;  %v956_v30 = vadd.f32 %v2458_v46, %v955_v18  ;;  %v1036_v31 = vadd.f32 %v2458_v46, %v1035_v19 }
  0xc1   : > { %v798_v22 = vadd.f32 %v2458_v46, %v797_v20  ;;  %v878_v23 = vadd.f32 %v2458_v46, %v877_v21 }
  0xc2   : > { %v1180_v42 = vmax.f32 %v956_v30, %v2464_v48  ;;  %v1212_v43 = vmax.f32 %v1036_v31, %v2464_v48 }
  0xc3   : > { %v1117_v26 = vmax.f32 %v798_v22, %v2464_v48  ;;  %v1149_v27 = vmax.f32 %v878_v23, %v2464_v48 }
  0xc5   : > { %v1933_v28 = vpack.c.bf16 %v1117_v26, %v1116_v24  ;;  %v2013_v29 = vpack.c.bf16 %v1149_v27, %v1148_v25 }
  0xc7   : > { %2245 = vst [vmem:[%s2478_s19 + $0x8] sm:$0xff] %v1933_v28   ;;  %v957_v32 = vpop.f32.mrf.mxu2  ;;  %v1037_v33 = vpop.f32.mrf.mxu3 }
  0xc8   : > { %2261 = vst [vmem:[%s2478_s19 + $0x88] sm:$0xff] %v2013_v29   ;;  %v958_v36 = vadd.f32 %v2458_v46, %v957_v32  ;;  %v1038_v37 = vadd.f32 %v2458_v46, %v1037_v33  ;;  %v800_v38 = vpop.f32.mrf.mxu0  ;;  %v880_v39 = vpop.f32.mrf.mxu1 }
  0xc9   : > { %v801_v50 = vadd.f32 %v2458_v46, %v800_v38  ;;  %v881_v51 = vadd.f32 %v2458_v46, %v880_v39 }
  0xca   : > { %v1181_v44 = vmax.f32 %v958_v36, %v2464_v48  ;;  %v1213_v45 = vmax.f32 %v1038_v37, %v2464_v48  ;;  %v1865_v36 = vld [vmem:[%s2417_s11 + $0x60] sm:$0xff] }
  0xcb   : > { %839 = vmatmul.bf16.gmra.mxu0 %v1863_v34  ;;  %919 = vmatmul.bf16.gmra.mxu1 %v1879_v35  ;;  %v1118_v58 = vmax.f32 %v801_v50, %v2464_v48  ;;  %v1150_v59 = vmax.f32 %v881_v51, %v2464_v48  ;;  %v1881_v37 = vld [vmem:[%s2417_s11 + $0xe0] sm:$0xff] }
  0xcc   : > { %v2093_v47 = vpack.c.bf16 %v1181_v44, %v1180_v42  ;;  %v2173_v49 = vpack.c.bf16 %v1213_v45, %v1212_v43  ;;  %999 = vmatmul.bf16.gmra.mxu2 %v1895_v40  ;;  %1079 = vmatmul.bf16.gmra.mxu3 %v1911_v41  ;;  %v1897_v42 = vld [vmem:[%s2417_s11 + $0x160] sm:$0xff] }
  0xcd   : > { %v1913_v43 = vld [vmem:[%s2417_s11 + $0x1e0] sm:$0xff] }
  0xce   : > { %2277 = vst [vmem:[%s2478_s19 + $0x108] sm:$0xff] %v2093_v47  }
  0xcf   : > { %2293 = vst [vmem:[%s2478_s19 + $0x188] sm:$0xff] %v2173_v49   ;;  %v960_v52 = vpop.f32.mrf.mxu2  ;;  %v1040_v53 = vpop.f32.mrf.mxu3 }
  0xd0   : > { %v802_v54 = vpop.f32.mrf.mxu0  ;;  %v882_v55 = vpop.f32.mrf.mxu1  ;;  %v961_v0 = vadd.f32 %v2458_v46, %v960_v52  ;;  %v1041_v1 = vadd.f32 %v2458_v46, %v1040_v53 }
  0xd1   : > { %v803_v56 = vadd.f32 %v2458_v46, %v802_v54  ;;  %v883_v57 = vadd.f32 %v2458_v46, %v882_v55 }
  0xd2   : > { %v1182_v12 = vmax.f32 %v961_v0, %v2464_v48  ;;  %v1214_v13 = vmax.f32 %v1041_v1, %v2464_v48 }
  0xd3   : > { %v1119_v60 = vmax.f32 %v803_v56, %v2464_v48  ;;  %v1151_v61 = vmax.f32 %v883_v57, %v2464_v48 }
  0xd5   : > { %v1938_v62 = vpack.c.bf16 %v1119_v60, %v1118_v58  ;;  %v2018_v63 = vpack.c.bf16 %v1151_v61, %v1150_v59 }
  0xd7   : > { %2246 = vst [vmem:[%s2478_s19 + $0x10] sm:$0xff] %v1938_v62   ;;  %v962_v2 = vpop.f32.mrf.mxu2  ;;  %v1042_v3 = vpop.f32.mrf.mxu3 }
  0xd8   : > { %2262 = vst [vmem:[%s2478_s19 + $0x90] sm:$0xff] %v2018_v63   ;;  %v963_v6 = vadd.f32 %v2458_v46, %v962_v2  ;;  %v1043_v7 = vadd.f32 %v2458_v46, %v1042_v3  ;;  %v805_v8 = vpop.f32.mrf.mxu0  ;;  %v885_v9 = vpop.f32.mrf.mxu1 }
  0xd9   : > { %v806_v18 = vadd.f32 %v2458_v46, %v805_v8  ;;  %v886_v19 = vadd.f32 %v2458_v46, %v885_v9 }
  0xda   : > { %v1183_v14 = vmax.f32 %v963_v6, %v2464_v48  ;;  %v1215_v15 = vmax.f32 %v1043_v7, %v2464_v48  ;;  %v1866_v6 = vld [vmem:[%s2417_s11 + $0x68] sm:$0xff] }
  0xdb   : > { %844 = vmatmul.bf16.gmra.mxu0 %v1864_v4  ;;  %924 = vmatmul.bf16.gmra.mxu1 %v1880_v5  ;;  %v1120_v26 = vmax.f32 %v806_v18, %v2464_v48  ;;  %v1152_v27 = vmax.f32 %v886_v19, %v2464_v48  ;;  %v1882_v7 = vld [vmem:[%s2417_s11 + $0xe8] sm:$0xff] }
  0xdc   : > { %v2098_v16 = vpack.c.bf16 %v1183_v14, %v1182_v12  ;;  %v2178_v17 = vpack.c.bf16 %v1215_v15, %v1214_v13  ;;  %1004 = vmatmul.bf16.gmra.mxu2 %v1896_v10  ;;  %1084 = vmatmul.bf16.gmra.mxu3 %v1912_v11  ;;  %v1898_v12 = vld [vmem:[%s2417_s11 + $0x168] sm:$0xff] }
  0xdd   : > { %v1914_v13 = vld [vmem:[%s2417_s11 + $0x1e8] sm:$0xff] }
  0xde   : > { %2278 = vst [vmem:[%s2478_s19 + $0x110] sm:$0xff] %v2098_v16  }
  0xdf   : > { %2294 = vst [vmem:[%s2478_s19 + $0x190] sm:$0xff] %v2178_v17   ;;  %v965_v20 = vpop.f32.mrf.mxu2  ;;  %v1045_v21 = vpop.f32.mrf.mxu3 }
  0xe0   : > { %v807_v22 = vpop.f32.mrf.mxu0  ;;  %v887_v23 = vpop.f32.mrf.mxu1  ;;  %v966_v32 = vadd.f32 %v2458_v46, %v965_v20  ;;  %v1046_v33 = vadd.f32 %v2458_v46, %v1045_v21 }
  0xe1   : > { %v808_v24 = vadd.f32 %v2458_v46, %v807_v22  ;;  %v888_v25 = vadd.f32 %v2458_v46, %v887_v23 }
  0xe2   : > { %v1184_v44 = vmax.f32 %v966_v32, %v2464_v48  ;;  %v1216_v45 = vmax.f32 %v1046_v33, %v2464_v48 }
  0xe3   : > { %v1121_v28 = vmax.f32 %v808_v24, %v2464_v48  ;;  %v1153_v29 = vmax.f32 %v888_v25, %v2464_v48 }
  0xe5   : > { %v1943_v30 = vpack.c.bf16 %v1121_v28, %v1120_v26  ;;  %v2023_v31 = vpack.c.bf16 %v1153_v29, %v1152_v27 }
  0xe7   : > { %2247 = vst [vmem:[%s2478_s19 + $0x18] sm:$0xff] %v1943_v30   ;;  %v967_v34 = vpop.f32.mrf.mxu2  ;;  %v1047_v35 = vpop.f32.mrf.mxu3 }
  0xe8   : > { %2263 = vst [vmem:[%s2478_s19 + $0x98] sm:$0xff] %v2023_v31   ;;  %v968_v38 = vadd.f32 %v2458_v46, %v967_v34  ;;  %v1048_v39 = vadd.f32 %v2458_v46, %v1047_v35  ;;  %v810_v40 = vpop.f32.mrf.mxu0  ;;  %v890_v41 = vpop.f32.mrf.mxu1 }
  0xe9   : > { %v811_v52 = vadd.f32 %v2458_v46, %v810_v40  ;;  %v891_v53 = vadd.f32 %v2458_v46, %v890_v41 }
  0xea   : > { %v1185_v47 = vmax.f32 %v968_v38, %v2464_v48  ;;  %v1217_v49 = vmax.f32 %v1048_v39, %v2464_v48  ;;  %v1867_v38 = vld [vmem:[%s2417_s11 + $0x70] sm:$0xff] }
  0xeb   : > { %849 = vmatmul.bf16.gmra.mxu0 %v1865_v36  ;;  %929 = vmatmul.bf16.gmra.mxu1 %v1881_v37  ;;  %v1122_v60 = vmax.f32 %v811_v52, %v2464_v48  ;;  %v1154_v61 = vmax.f32 %v891_v53, %v2464_v48  ;;  %v1883_v39 = vld [vmem:[%s2417_s11 + $0xf0] sm:$0xff] }
  0xec   : > { %v2103_v50 = vpack.c.bf16 %v1185_v47, %v1184_v44  ;;  %v2183_v51 = vpack.c.bf16 %v1217_v49, %v1216_v45  ;;  %1009 = vmatmul.bf16.gmra.mxu2 %v1897_v42  ;;  %1089 = vmatmul.bf16.gmra.mxu3 %v1913_v43  ;;  %v1899_v44 = vld [vmem:[%s2417_s11 + $0x170] sm:$0xff] }
  0xed   : > { %v1915_v45 = vld [vmem:[%s2417_s11 + $0x1f0] sm:$0xff] }
  0xee   : > { %2279 = vst [vmem:[%s2478_s19 + $0x118] sm:$0xff] %v2103_v50  }
  0xef   : > { %2295 = vst [vmem:[%s2478_s19 + $0x198] sm:$0xff] %v2183_v51   ;;  %v970_v54 = vpop.f32.mrf.mxu2  ;;  %v1050_v55 = vpop.f32.mrf.mxu3 }
  0xf0   : > { %v812_v56 = vpop.f32.mrf.mxu0  ;;  %v892_v57 = vpop.f32.mrf.mxu1  ;;  %v971_v2 = vadd.f32 %v2458_v46, %v970_v54  ;;  %v1051_v3 = vadd.f32 %v2458_v46, %v1050_v55 }
  0xf1   : > { %v813_v58 = vadd.f32 %v2458_v46, %v812_v56  ;;  %v893_v59 = vadd.f32 %v2458_v46, %v892_v57 }
  0xf2   : > { %v1186_v14 = vmax.f32 %v971_v2, %v2464_v48  ;;  %v1218_v15 = vmax.f32 %v1051_v3, %v2464_v48 }
  0xf3   : > { %v1123_v62 = vmax.f32 %v813_v58, %v2464_v48  ;;  %v1155_v63 = vmax.f32 %v893_v59, %v2464_v48 }
  0xf5   : > { %v1948_v0 = vpack.c.bf16 %v1123_v62, %v1122_v60  ;;  %v2028_v1 = vpack.c.bf16 %v1155_v63, %v1154_v61 }
  0xf7   : > { %2248 = vst [vmem:[%s2478_s19 + $0x20] sm:$0xff] %v1948_v0   ;;  %v972_v4 = vpop.f32.mrf.mxu2  ;;  %v1052_v5 = vpop.f32.mrf.mxu3 }
  0xf8   : > { %2264 = vst [vmem:[%s2478_s19 + $0xa0] sm:$0xff] %v2028_v1   ;;  %v973_v8 = vadd.f32 %v2458_v46, %v972_v4  ;;  %v1053_v9 = vadd.f32 %v2458_v46, %v1052_v5  ;;  %v815_v10 = vpop.f32.mrf.mxu0  ;;  %v895_v11 = vpop.f32.mrf.mxu1 }
  0xf9   : > { %v816_v20 = vadd.f32 %v2458_v46, %v815_v10  ;;  %v896_v21 = vadd.f32 %v2458_v46, %v895_v11 }
  0xfa   : > { %v1187_v16 = vmax.f32 %v973_v8, %v2464_v48  ;;  %v1219_v17 = vmax.f32 %v1053_v9, %v2464_v48  ;;  %v1868_v8 = vld [vmem:[%s2417_s11 + $0x78] sm:$0xff] }
  0xfb   : > { %854 = vmatmul.bf16.gmra.mxu0 %v1866_v6  ;;  %934 = vmatmul.bf16.gmra.mxu1 %v1882_v7  ;;  %v1124_v28 = vmax.f32 %v816_v20, %v2464_v48  ;;  %v1156_v29 = vmax.f32 %v896_v21, %v2464_v48  ;;  %v1884_v9 = vld [vmem:[%s2417_s11 + $0xf8] sm:$0xff] }
  0xfc   : > { %v2108_v18 = vpack.c.bf16 %v1187_v16, %v1186_v14  ;;  %v2188_v19 = vpack.c.bf16 %v1219_v17, %v1218_v15  ;;  %1014 = vmatmul.bf16.gmra.mxu2 %v1898_v12  ;;  %1094 = vmatmul.bf16.gmra.mxu3 %v1914_v13  ;;  %v1900_v14 = vld [vmem:[%s2417_s11 + $0x178] sm:$0xff] }
  0xfd   : > { %v1916_v15 = vld [vmem:[%s2417_s11 + $0x1f8] sm:$0xff] }
  0xfe   : > { %2280 = vst [vmem:[%s2478_s19 + $0x120] sm:$0xff] %v2108_v18  }
  0xff   : > { %2296 = vst [vmem:[%s2478_s19 + $0x1a0] sm:$0xff] %v2188_v19   ;;  %v975_v22 = vpop.f32.mrf.mxu2  ;;  %v1055_v23 = vpop.f32.mrf.mxu3 }
 0x100   : > { %v817_v24 = vpop.f32.mrf.mxu0  ;;  %v897_v25 = vpop.f32.mrf.mxu1  ;;  %v976_v34 = vadd.f32 %v2458_v46, %v975_v22  ;;  %v1056_v35 = vadd.f32 %v2458_v46, %v1055_v23 }
 0x101   : > { %v818_v26 = vadd.f32 %v2458_v46, %v817_v24  ;;  %v898_v27 = vadd.f32 %v2458_v46, %v897_v25 }
 0x102   : > { %v1188_v47 = vmax.f32 %v976_v34, %v2464_v48  ;;  %v1220_v49 = vmax.f32 %v1056_v35, %v2464_v48 }
 0x103   : > { %v1125_v30 = vmax.f32 %v818_v26, %v2464_v48  ;;  %v1157_v31 = vmax.f32 %v898_v27, %v2464_v48 }
 0x105   : > { %v1953_v32 = vpack.c.bf16 %v1125_v30, %v1124_v28  ;;  %v2033_v33 = vpack.c.bf16 %v1157_v31, %v1156_v29 }
 0x107   : > { %2249 = vst [vmem:[%s2478_s19 + $0x28] sm:$0xff] %v1953_v32   ;;  %v977_v36 = vpop.f32.mrf.mxu2  ;;  %v1057_v37 = vpop.f32.mrf.mxu3 }
 0x108   : > { %2265 = vst [vmem:[%s2478_s19 + $0xa8] sm:$0xff] %v2033_v33   ;;  %v978_v40 = vadd.f32 %v2458_v46, %v977_v36  ;;  %v1058_v41 = vadd.f32 %v2458_v46, %v1057_v37  ;;  %v820_v42 = vpop.f32.mrf.mxu0  ;;  %v900_v43 = vpop.f32.mrf.mxu1 }
 0x109   : > { %v821_v54 = vadd.f32 %v2458_v46, %v820_v42  ;;  %v901_v55 = vadd.f32 %v2458_v46, %v900_v43 }
 0x10a   : > { %v1189_v50 = vmax.f32 %v978_v40, %v2464_v48  ;;  %v1221_v51 = vmax.f32 %v1058_v41, %v2464_v48 }
 0x10b   : > { %859 = vmatmul.bf16.gmra.mxu0 %v1867_v38  ;;  %939 = vmatmul.bf16.gmra.mxu1 %v1883_v39  ;;  %v1126_v62 = vmax.f32 %v821_v54, %v2464_v48  ;;  %v1158_v63 = vmax.f32 %v901_v55, %v2464_v48 }
 0x10c   : > { %v2113_v52 = vpack.c.bf16 %v1189_v50, %v1188_v47  ;;  %v2193_v53 = vpack.c.bf16 %v1221_v51, %v1220_v49  ;;  %1019 = vmatmul.bf16.gmra.mxu2 %v1899_v44  ;;  %1099 = vmatmul.bf16.gmra.mxu3 %v1915_v45 }
 0x10e   : > { %2281 = vst [vmem:[%s2478_s19 + $0x128] sm:$0xff] %v2113_v52  }
 0x10f   : > { %2297 = vst [vmem:[%s2478_s19 + $0x1a8] sm:$0xff] %v2193_v53   ;;  %v980_v56 = vpop.f32.mrf.mxu2  ;;  %v1060_v57 = vpop.f32.mrf.mxu3 }
 0x110   : > { %v822_v58 = vpop.f32.mrf.mxu0  ;;  %v902_v59 = vpop.f32.mrf.mxu1  ;;  %v981_v4 = vadd.f32 %v2458_v46, %v980_v56  ;;  %v1061_v5 = vadd.f32 %v2458_v46, %v1060_v57 }
 0x111   : > { %v823_v60 = vadd.f32 %v2458_v46, %v822_v58  ;;  %v903_v61 = vadd.f32 %v2458_v46, %v902_v59 }
 0x112   : > { %v1190_v16 = vmax.f32 %v981_v4, %v2464_v48  ;;  %v1222_v17 = vmax.f32 %v1061_v5, %v2464_v48 }
 0x113   : > { %v1127_v0 = vmax.f32 %v823_v60, %v2464_v48  ;;  %v1159_v1 = vmax.f32 %v903_v61, %v2464_v48 }
 0x115   : > { %v1958_v2 = vpack.c.bf16 %v1127_v0, %v1126_v62  ;;  %v2038_v3 = vpack.c.bf16 %v1159_v1, %v1158_v63 }
 0x117   : > { %2250 = vst [vmem:[%s2478_s19 + $0x30] sm:$0xff] %v1958_v2   ;;  %v982_v6 = vpop.f32.mrf.mxu2  ;;  %v1062_v7 = vpop.f32.mrf.mxu3 }
 0x118   : > { %2266 = vst [vmem:[%s2478_s19 + $0xb0] sm:$0xff] %v2038_v3   ;;  %v983_v10 = vadd.f32 %v2458_v46, %v982_v6  ;;  %v1063_v11 = vadd.f32 %v2458_v46, %v1062_v7  ;;  %v825_v12 = vpop.f32.mrf.mxu0  ;;  %v905_v13 = vpop.f32.mrf.mxu1 }
 0x119   : > { %v826_v22 = vadd.f32 %v2458_v46, %v825_v12  ;;  %v906_v23 = vadd.f32 %v2458_v46, %v905_v13 }
 0x11a   : > { %v1191_v18 = vmax.f32 %v983_v10, %v2464_v48  ;;  %v1223_v19 = vmax.f32 %v1063_v11, %v2464_v48 }
 0x11b   : > { %864 = vmatmul.bf16.gmra.mxu0 %v1868_v8  ;;  %944 = vmatmul.bf16.gmra.mxu1 %v1884_v9  ;;  %v1128_v30 = vmax.f32 %v826_v22, %v2464_v48  ;;  %v1160_v31 = vmax.f32 %v906_v23, %v2464_v48 }
 0x11c   : > { %v2118_v20 = vpack.c.bf16 %v1191_v18, %v1190_v16  ;;  %v2198_v21 = vpack.c.bf16 %v1223_v19, %v1222_v17  ;;  %1024 = vmatmul.bf16.gmra.mxu2 %v1900_v14  ;;  %1104 = vmatmul.bf16.gmra.mxu3 %v1916_v15 }
 0x11e   : > { %2282 = vst [vmem:[%s2478_s19 + $0x130] sm:$0xff] %v2118_v20  }
 0x11f   : > { %2298 = vst [vmem:[%s2478_s19 + $0x1b0] sm:$0xff] %v2198_v21   ;;  %v985_v24 = vpop.f32.mrf.mxu2  ;;  %v1065_v25 = vpop.f32.mrf.mxu3 }
 0x120   : > { %v827_v26 = vpop.f32.mrf.mxu0  ;;  %v907_v27 = vpop.f32.mrf.mxu1  ;;  %v986_v36 = vadd.f32 %v2458_v46, %v985_v24  ;;  %v1066_v37 = vadd.f32 %v2458_v46, %v1065_v25 }
 0x121   : > { %v828_v28 = vadd.f32 %v2458_v46, %v827_v26  ;;  %v908_v29 = vadd.f32 %v2458_v46, %v907_v27 }
 0x122   : > { %v1192_v44 = vmax.f32 %v986_v36, %v2464_v48  ;;  %v1224_v45 = vmax.f32 %v1066_v37, %v2464_v48 }
 0x123   : > { %v1129_v32 = vmax.f32 %v828_v28, %v2464_v48  ;;  %v1161_v33 = vmax.f32 %v908_v29, %v2464_v48 }
 0x125   : > { %v1963_v34 = vpack.c.bf16 %v1129_v32, %v1128_v30  ;;  %v2043_v35 = vpack.c.bf16 %v1161_v33, %v1160_v31 }
 0x127   : > { %2251 = vst [vmem:[%s2478_s19 + $0x38] sm:$0xff] %v1963_v34   ;;  %v987_v38 = vpop.f32.mrf.mxu2  ;;  %v1067_v39 = vpop.f32.mrf.mxu3 }
 0x128   : > { %2267 = vst [vmem:[%s2478_s19 + $0xb8] sm:$0xff] %v2043_v35   ;;  %v988_v40 = vadd.f32 %v2458_v46, %v987_v38  ;;  %v1068_v41 = vadd.f32 %v2458_v46, %v1067_v39  ;;  %v830_v42 = vpop.f32.mrf.mxu0  ;;  %v910_v43 = vpop.f32.mrf.mxu1 }
 0x129   : > { %v831_v52 = vadd.f32 %v2458_v46, %v830_v42  ;;  %v911_v53 = vadd.f32 %v2458_v46, %v910_v43 }
 0x12a   : > { %v1193_v47 = vmax.f32 %v988_v40, %v2464_v48  ;;  %v1225_v49 = vmax.f32 %v1068_v41, %v2464_v48 }
 0x12b   : > { %v1130_v60 = vmax.f32 %v831_v52, %v2464_v48  ;;  %v1162_v61 = vmax.f32 %v911_v53, %v2464_v48 }
 0x12c   : > { %v2123_v50 = vpack.c.bf16 %v1193_v47, %v1192_v44  ;;  %v2203_v51 = vpack.c.bf16 %v1225_v49, %v1224_v45 }
 0x12e   : > { %2283 = vst [vmem:[%s2478_s19 + $0x138] sm:$0xff] %v2123_v50  }
 0x12f   : > { %2299 = vst [vmem:[%s2478_s19 + $0x1b8] sm:$0xff] %v2203_v51   ;;  %v990_v54 = vpop.f32.mrf.mxu2  ;;  %v1070_v55 = vpop.f32.mrf.mxu3 }
 0x130   : > { %v832_v56 = vpop.f32.mrf.mxu0  ;;  %v912_v57 = vpop.f32.mrf.mxu1  ;;  %v991_v2 = vadd.f32 %v2458_v46, %v990_v54  ;;  %v1071_v3 = vadd.f32 %v2458_v46, %v1070_v55 }
 0x131   : > { %v833_v58 = vadd.f32 %v2458_v46, %v832_v56  ;;  %v913_v59 = vadd.f32 %v2458_v46, %v912_v57 }
 0x132   : > { %v1194_v10 = vmax.f32 %v991_v2, %v2464_v48  ;;  %v1226_v11 = vmax.f32 %v1071_v3, %v2464_v48 }
 0x133   : > { %v1131_v62 = vmax.f32 %v833_v58, %v2464_v48  ;;  %v1163_v63 = vmax.f32 %v913_v59, %v2464_v48 }
 0x135   : > { %v1968_v0 = vpack.c.bf16 %v1131_v62, %v1130_v60  ;;  %v2048_v1 = vpack.c.bf16 %v1163_v63, %v1162_v61 }
 0x137   : > { %2252 = vst [vmem:[%s2478_s19 + $0x40] sm:$0xff] %v1968_v0   ;;  %v992_v4 = vpop.f32.mrf.mxu2  ;;  %v1072_v5 = vpop.f32.mrf.mxu3 }
 0x138   : > { %2268 = vst [vmem:[%s2478_s19 + $0xc0] sm:$0xff] %v2048_v1   ;;  %v993_v6 = vadd.f32 %v2458_v46, %v992_v4  ;;  %v1073_v7 = vadd.f32 %v2458_v46, %v1072_v5  ;;  %v835_v8 = vpop.f32.mrf.mxu0  ;;  %v915_v9 = vpop.f32.mrf.mxu1 }
 0x139   : > { %v836_v16 = vadd.f32 %v2458_v46, %v835_v8  ;;  %v916_v17 = vadd.f32 %v2458_v46, %v915_v9 }
 0x13a   : > { %v1195_v12 = vmax.f32 %v993_v6, %v2464_v48  ;;  %v1227_v13 = vmax.f32 %v1073_v7, %v2464_v48 }
 0x13b   : > { %v1132_v24 = vmax.f32 %v836_v16, %v2464_v48  ;;  %v1164_v25 = vmax.f32 %v916_v17, %v2464_v48 }
 0x13c   : > { %v2128_v14 = vpack.c.bf16 %v1195_v12, %v1194_v10  ;;  %v2208_v15 = vpack.c.bf16 %v1227_v13, %v1226_v11 }
 0x13e   : > { %2284 = vst [vmem:[%s2478_s19 + $0x140] sm:$0xff] %v2128_v14  }
 0x13f   : > { %2300 = vst [vmem:[%s2478_s19 + $0x1c0] sm:$0xff] %v2208_v15   ;;  %v995_v18 = vpop.f32.mrf.mxu2  ;;  %v1075_v19 = vpop.f32.mrf.mxu3 }
 0x140   : > { %v837_v20 = vpop.f32.mrf.mxu0  ;;  %v917_v21 = vpop.f32.mrf.mxu1  ;;  %v996_v30 = vadd.f32 %v2458_v46, %v995_v18  ;;  %v1076_v31 = vadd.f32 %v2458_v46, %v1075_v19 }
 0x141   : > { %v838_v22 = vadd.f32 %v2458_v46, %v837_v20  ;;  %v918_v23 = vadd.f32 %v2458_v46, %v917_v21 }
 0x142   : > { %v1196_v38 = vmax.f32 %v996_v30, %v2464_v48  ;;  %v1228_v39 = vmax.f32 %v1076_v31, %v2464_v48 }
 0x143   : > { %v1133_v26 = vmax.f32 %v838_v22, %v2464_v48  ;;  %v1165_v27 = vmax.f32 %v918_v23, %v2464_v48 }
 0x145   : > { %v1973_v28 = vpack.c.bf16 %v1133_v26, %v1132_v24  ;;  %v2053_v29 = vpack.c.bf16 %v1165_v27, %v1164_v25 }
 0x147   : > { %2253 = vst [vmem:[%s2478_s19 + $0x48] sm:$0xff] %v1973_v28   ;;  %v997_v32 = vpop.f32.mrf.mxu2  ;;  %v1077_v33 = vpop.f32.mrf.mxu3 }
 0x148   : > { %2269 = vst [vmem:[%s2478_s19 + $0xc8] sm:$0xff] %v2053_v29   ;;  %v998_v34 = vadd.f32 %v2458_v46, %v997_v32  ;;  %v1078_v35 = vadd.f32 %v2458_v46, %v1077_v33  ;;  %v840_v36 = vpop.f32.mrf.mxu0  ;;  %v920_v37 = vpop.f32.mrf.mxu1 }
 0x149   : > { %v841_v44 = vadd.f32 %v2458_v46, %v840_v36  ;;  %v921_v45 = vadd.f32 %v2458_v46, %v920_v37 }
 0x14a   : > { %v1197_v40 = vmax.f32 %v998_v34, %v2464_v48  ;;  %v1229_v41 = vmax.f32 %v1078_v35, %v2464_v48 }
 0x14b   : > { %v1134_v54 = vmax.f32 %v841_v44, %v2464_v48  ;;  %v1166_v55 = vmax.f32 %v921_v45, %v2464_v48 }
 0x14c   : > { %v2133_v42 = vpack.c.bf16 %v1197_v40, %v1196_v38  ;;  %v2213_v43 = vpack.c.bf16 %v1229_v41, %v1228_v39 }
 0x14e   : > { %2285 = vst [vmem:[%s2478_s19 + $0x148] sm:$0xff] %v2133_v42  }
 0x14f   : > { %2301 = vst [vmem:[%s2478_s19 + $0x1c8] sm:$0xff] %v2213_v43   ;;  %v1000_v47 = vpop.f32.mrf.mxu2  ;;  %v1080_v49 = vpop.f32.mrf.mxu3 }
 0x150   : > { %v842_v50 = vpop.f32.mrf.mxu0  ;;  %v922_v51 = vpop.f32.mrf.mxu1  ;;  %v1001_v60 = vadd.f32 %v2458_v46, %v1000_v47  ;;  %v1081_v61 = vadd.f32 %v2458_v46, %v1080_v49 }
 0x151   : > { %v843_v52 = vadd.f32 %v2458_v46, %v842_v50  ;;  %v923_v53 = vadd.f32 %v2458_v46, %v922_v51 }
 0x152   : > { %v1198_v4 = vmax.f32 %v1001_v60, %v2464_v48  ;;  %v1230_v5 = vmax.f32 %v1081_v61, %v2464_v48 }
 0x153   : > { %v1135_v56 = vmax.f32 %v843_v52, %v2464_v48  ;;  %v1167_v57 = vmax.f32 %v923_v53, %v2464_v48 }
 0x155   : > { %v1978_v58 = vpack.c.bf16 %v1135_v56, %v1134_v54  ;;  %v2058_v59 = vpack.c.bf16 %v1167_v57, %v1166_v55 }
 0x157   : > { %2254 = vst [vmem:[%s2478_s19 + $0x50] sm:$0xff] %v1978_v58   ;;  %v1002_v62 = vpop.f32.mrf.mxu2  ;;  %v1082_v63 = vpop.f32.mrf.mxu3 }
 0x158   : > { %2270 = vst [vmem:[%s2478_s19 + $0xd0] sm:$0xff] %v2058_v59   ;;  %v1003_v0 = vadd.f32 %v2458_v46, %v1002_v62  ;;  %v1083_v1 = vadd.f32 %v2458_v46, %v1082_v63  ;;  %v845_v2 = vpop.f32.mrf.mxu0  ;;  %v925_v3 = vpop.f32.mrf.mxu1 }
 0x159   : > { %v846_v10 = vadd.f32 %v2458_v46, %v845_v2  ;;  %v926_v11 = vadd.f32 %v2458_v46, %v925_v3 }
 0x15a   : > { %v1199_v6 = vmax.f32 %v1003_v0, %v2464_v48  ;;  %v1231_v7 = vmax.f32 %v1083_v1, %v2464_v48 }
 0x15b   : > { %v1136_v18 = vmax.f32 %v846_v10, %v2464_v48  ;;  %v1168_v19 = vmax.f32 %v926_v11, %v2464_v48 }
 0x15c   : > { %v2138_v8 = vpack.c.bf16 %v1199_v6, %v1198_v4  ;;  %v2218_v9 = vpack.c.bf16 %v1231_v7, %v1230_v5 }
 0x15e   : > { %2286 = vst [vmem:[%s2478_s19 + $0x150] sm:$0xff] %v2138_v8  }
 0x15f   : > { %2302 = vst [vmem:[%s2478_s19 + $0x1d0] sm:$0xff] %v2218_v9   ;;  %v1005_v12 = vpop.f32.mrf.mxu2  ;;  %v1085_v13 = vpop.f32.mrf.mxu3 }
 0x160   : > { %v847_v14 = vpop.f32.mrf.mxu0  ;;  %v927_v15 = vpop.f32.mrf.mxu1  ;;  %v1006_v24 = vadd.f32 %v2458_v46, %v1005_v12  ;;  %v1086_v25 = vadd.f32 %v2458_v46, %v1085_v13 }
 0x161   : > { %v848_v16 = vadd.f32 %v2458_v46, %v847_v14  ;;  %v928_v17 = vadd.f32 %v2458_v46, %v927_v15 }
 0x162   : > { %v1200_v32 = vmax.f32 %v1006_v24, %v2464_v48  ;;  %v1232_v33 = vmax.f32 %v1086_v25, %v2464_v48 }
 0x163   : > { %v1137_v20 = vmax.f32 %v848_v16, %v2464_v48  ;;  %v1169_v21 = vmax.f32 %v928_v17, %v2464_v48 }
 0x165   : > { %v1983_v22 = vpack.c.bf16 %v1137_v20, %v1136_v18  ;;  %v2063_v23 = vpack.c.bf16 %v1169_v21, %v1168_v19 }
 0x167   : > { %2255 = vst [vmem:[%s2478_s19 + $0x58] sm:$0xff] %v1983_v22   ;;  %v1007_v26 = vpop.f32.mrf.mxu2  ;;  %v1087_v27 = vpop.f32.mrf.mxu3 }
 0x168   : > { %2271 = vst [vmem:[%s2478_s19 + $0xd8] sm:$0xff] %v2063_v23   ;;  %v1008_v28 = vadd.f32 %v2458_v46, %v1007_v26  ;;  %v1088_v29 = vadd.f32 %v2458_v46, %v1087_v27  ;;  %v850_v30 = vpop.f32.mrf.mxu0  ;;  %v930_v31 = vpop.f32.mrf.mxu1 }
 0x169   : > { %v851_v38 = vadd.f32 %v2458_v46, %v850_v30  ;;  %v931_v39 = vadd.f32 %v2458_v46, %v930_v31 }
 0x16a   : > { %v1201_v34 = vmax.f32 %v1008_v28, %v2464_v48  ;;  %v1233_v35 = vmax.f32 %v1088_v29, %v2464_v48 }
 0x16b   : > { %v1138_v47 = vmax.f32 %v851_v38, %v2464_v48  ;;  %v1170_v49 = vmax.f32 %v931_v39, %v2464_v48 }
 0x16c   : > { %v2143_v36 = vpack.c.bf16 %v1201_v34, %v1200_v32  ;;  %v2223_v37 = vpack.c.bf16 %v1233_v35, %v1232_v33  ;;  %v2342_v33 = vld [vmem:[%s2800_s2] ss:$0 sm:$0xff] }
 0x16e   : > { %2287 = vst [vmem:[%s2478_s19 + $0x158] sm:$0xff] %v2143_v36  }
 0x16f   : > { %2303 = vst [vmem:[%s2478_s19 + $0x1d8] sm:$0xff] %v2223_v37   ;;  %v1010_v40 = vpop.f32.mrf.mxu2  ;;  %v1090_v41 = vpop.f32.mrf.mxu3 }
 0x170   : > { %v852_v42 = vpop.f32.mrf.mxu0  ;;  %v932_v43 = vpop.f32.mrf.mxu1  ;;  %v1011_v54 = vadd.f32 %v2458_v46, %v1010_v40  ;;  %v1091_v55 = vadd.f32 %v2458_v46, %v1090_v41 }
 0x171   : > { %v853_v44 = vadd.f32 %v2458_v46, %v852_v42  ;;  %v933_v45 = vadd.f32 %v2458_v46, %v932_v43 }
 0x172   : > { %v1202_v62 = vmax.f32 %v1011_v54, %v2464_v48  ;;  %v1234_v63 = vmax.f32 %v1091_v55, %v2464_v48 }
 0x173   : > { %v1139_v50 = vmax.f32 %v853_v44, %v2464_v48  ;;  %v1171_v51 = vmax.f32 %v933_v45, %v2464_v48 }
 0x175   : > { %v1988_v52 = vpack.c.bf16 %v1139_v50, %v1138_v47  ;;  %v2068_v53 = vpack.c.bf16 %v1171_v51, %v1170_v49 }
 0x177   : > { %2256 = vst [vmem:[%s2478_s19 + $0x60] sm:$0xff] %v1988_v52   ;;  %v1012_v56 = vpop.f32.mrf.mxu2  ;;  %v1092_v57 = vpop.f32.mrf.mxu3 }
 0x178   : > { %2272 = vst [vmem:[%s2478_s19 + $0xe0] sm:$0xff] %v2068_v53   ;;  %v1013_v58 = vadd.f32 %v2458_v46, %v1012_v56  ;;  %v1093_v59 = vadd.f32 %v2458_v46, %v1092_v57  ;;  %v855_v60 = vpop.f32.mrf.mxu0  ;;  %v935_v61 = vpop.f32.mrf.mxu1 }
 0x179   : > { %v856_v4 = vadd.f32 %v2458_v46, %v855_v60  ;;  %v936_v5 = vadd.f32 %v2458_v46, %v935_v61 }
 0x17a   : > { %v1203_v0 = vmax.f32 %v1013_v58, %v2464_v48  ;;  %v1235_v1 = vmax.f32 %v1093_v59, %v2464_v48 }
 0x17b   : > { %v1140_v12 = vmax.f32 %v856_v4, %v2464_v48  ;;  %v1172_v13 = vmax.f32 %v936_v5, %v2464_v48 }
 0x17c   : > { %v2148_v2 = vpack.c.bf16 %v1203_v0, %v1202_v62  ;;  %v2228_v3 = vpack.c.bf16 %v1235_v1, %v1234_v63 }
 0x17e   : > { %2288 = vst [vmem:[%s2478_s19 + $0x160] sm:$0xff] %v2148_v2  }
 0x17f   : > { %2304 = vst [vmem:[%s2478_s19 + $0x1e0] sm:$0xff] %v2228_v3   ;;  %v1015_v6 = vpop.f32.mrf.mxu2  ;;  %v1095_v7 = vpop.f32.mrf.mxu3 }
 0x180   : > { %v857_v8 = vpop.f32.mrf.mxu0  ;;  %v937_v9 = vpop.f32.mrf.mxu1  ;;  %v1016_v18 = vadd.f32 %v2458_v46, %v1015_v6  ;;  %v1096_v19 = vadd.f32 %v2458_v46, %v1095_v7 }
 0x181   : > { %v858_v10 = vadd.f32 %v2458_v46, %v857_v8  ;;  %v938_v11 = vadd.f32 %v2458_v46, %v937_v9 }
 0x182   : > { %v1204_v26 = vmax.f32 %v1016_v18, %v2464_v48  ;;  %v1236_v27 = vmax.f32 %v1096_v19, %v2464_v48 }
 0x183   : > { %v1141_v14 = vmax.f32 %v858_v10, %v2464_v48  ;;  %v1173_v15 = vmax.f32 %v938_v11, %v2464_v48 }
 0x185   : > { %v1993_v16 = vpack.c.bf16 %v1141_v14, %v1140_v12  ;;  %v2073_v17 = vpack.c.bf16 %v1173_v15, %v1172_v13 }
 0x187   : > { %2257 = vst [vmem:[%s2478_s19 + $0x68] sm:$0xff] %v1993_v16   ;;  %v1017_v20 = vpop.f32.mrf.mxu2  ;;  %v1097_v21 = vpop.f32.mrf.mxu3 }
 0x188   : > { %2273 = vst [vmem:[%s2478_s19 + $0xe8] sm:$0xff] %v2073_v17   ;;  %v1018_v22 = vadd.f32 %v2458_v46, %v1017_v20  ;;  %v1098_v23 = vadd.f32 %v2458_v46, %v1097_v21  ;;  %v860_v24 = vpop.f32.mrf.mxu0  ;;  %v940_v25 = vpop.f32.mrf.mxu1 }
 0x189   : > { %v861_v32 = vadd.f32 %v2458_v46, %v860_v24  ;;  %v941_v34 = vadd.f32 %v2342_v33, %v940_v25 }
 0x18a   : > { %v1205_v28 = vmax.f32 %v1018_v22, %v2464_v48  ;;  %v1237_v29 = vmax.f32 %v1098_v23, %v2464_v48  ;;  %v2343_v48 = vld [vmem:[%s2801_s3] ss:$0 sm:$0xff] }
 0x18b   : > { %v1142_v41 = vmax.f32 %v861_v32, %v2343_v48  ;;  %v1174_v42 = vmax.f32 %v941_v34, %v2343_v48 }
 0x18c   : > { %v2153_v30 = vpack.c.bf16 %v1205_v28, %v1204_v26  ;;  %v2233_v31 = vpack.c.bf16 %v1237_v29, %v1236_v27 }
 0x18e   : > { %2289 = vst [vmem:[%s2478_s19 + $0x168] sm:$0xff] %v2153_v30  }
 0x18f   : > { %2305 = vst [vmem:[%s2478_s19 + $0x1e8] sm:$0xff] %v2233_v31   ;;  %v1020_v35 = vpop.f32.mrf.mxu2  ;;  %v1100_v36 = vpop.f32.mrf.mxu3 }
 0x190   : > { %v862_v37 = vpop.f32.mrf.mxu0  ;;  %v942_v38 = vpop.f32.mrf.mxu1  ;;  %v1021_v47 = vadd.f32 %v2342_v33, %v1020_v35  ;;  %v1101_v49 = vadd.f32 %v2342_v33, %v1100_v36 }
 0x191   : > { %v863_v39 = vadd.f32 %v2342_v33, %v862_v37  ;;  %v943_v40 = vadd.f32 %v2342_v33, %v942_v38 }
 0x192   : > { %v1206_v56 = vmax.f32 %v1021_v47, %v2343_v48  ;;  %v1238_v57 = vmax.f32 %v1101_v49, %v2343_v48 }
 0x193   : > { %v1143_v46 = vmax.f32 %v863_v39, %v2343_v48  ;;  %v1175_v43 = vmax.f32 %v943_v40, %v2343_v48 }
 0x195   : > { %v1998_v44 = vpack.c.bf16 %v1143_v46, %v1142_v41  ;;  %v2078_v45 = vpack.c.bf16 %v1175_v43, %v1174_v42 }
 0x197   : > { %2258 = vst [vmem:[%s2478_s19 + $0x70] sm:$0xff] %v1998_v44   ;;  %v1022_v50 = vpop.f32.mrf.mxu2  ;;  %v1102_v51 = vpop.f32.mrf.mxu3 }
 0x198   : > { %2274 = vst [vmem:[%s2478_s19 + $0xf0] sm:$0xff] %v2078_v45   ;;  %v1023_v52 = vadd.f32 %v2342_v33, %v1022_v50  ;;  %v1103_v53 = vadd.f32 %v2342_v33, %v1102_v51  ;;  %v865_v54 = vpop.f32.mrf.mxu0  ;;  %v945_v55 = vpop.f32.mrf.mxu1 }
 0x199   : > { %v866_v62 = vadd.f32 %v2342_v33, %v865_v54  ;;  %v946_v63 = vadd.f32 %v2342_v33, %v945_v55 }
 0x19a   : > { %v1207_v58 = vmax.f32 %v1023_v52, %v2343_v48  ;;  %v1239_v59 = vmax.f32 %v1103_v53, %v2343_v48 }
 0x19b   : > { %v1144_v6 = vmax.f32 %v866_v62, %v2343_v48  ;;  %v1176_v7 = vmax.f32 %v946_v63, %v2343_v48 }
 0x19c   : > { %v2158_v60 = vpack.c.bf16 %v1207_v58, %v1206_v56  ;;  %v2238_v61 = vpack.c.bf16 %v1239_v59, %v1238_v57 }
 0x19e   : > { %2290 = vst [vmem:[%s2478_s19 + $0x170] sm:$0xff] %v2158_v60  }
 0x19f   : > { %2306 = vst [vmem:[%s2478_s19 + $0x1f0] sm:$0xff] %v2238_v61   ;;  %v1025_v0 = vpop.f32.mrf.mxu2  ;;  %v1105_v1 = vpop.f32.mrf.mxu3 }
 0x1a0   : > { %v867_v2 = vpop.f32.mrf.mxu0  ;;  %v947_v3 = vpop.f32.mrf.mxu1  ;;  %v1026_v12 = vadd.f32 %v2342_v33, %v1025_v0  ;;  %v1106_v13 = vadd.f32 %v2342_v33, %v1105_v1 }
 0x1a1   : > { %v868_v4 = vadd.f32 %v2342_v33, %v867_v2  ;;  %v948_v5 = vadd.f32 %v2342_v33, %v947_v3 }
 0x1a2   : > { %v1208_v18 = vmax.f32 %v1026_v12, %v2343_v48  ;;  %v1240_v19 = vmax.f32 %v1106_v13, %v2343_v48 }
 0x1a3   : > { %v1145_v8 = vmax.f32 %v868_v4, %v2343_v48  ;;  %v1177_v9 = vmax.f32 %v948_v5, %v2343_v48 }
 0x1a5   : > { %v2003_v10 = vpack.c.bf16 %v1145_v8, %v1144_v6  ;;  %v2083_v11 = vpack.c.bf16 %v1177_v9, %v1176_v7 }
 0x1a7   : > { %2259 = vst [vmem:[%s2478_s19 + $0x78] sm:$0xff] %v2003_v10   ;;  %v1027_v14 = vpop.f32.mrf.mxu2  ;;  %v1107_v15 = vpop.f32.mrf.mxu3 }
 0x1a8   : > { %2275 = vst [vmem:[%s2478_s19 + $0xf8] sm:$0xff] %v2083_v11   ;;  %v1028_v16 = vadd.f32 %v2342_v33, %v1027_v14  ;;  %v1108_v17 = vadd.f32 %v2342_v33, %v1107_v15 }
 0x1aa   : > { %v1209_v20 = vmax.f32 %v1028_v16, %v2343_v48  ;;  %v1241_v21 = vmax.f32 %v1108_v17, %v2343_v48 }
 0x1ac   : > { %v2163_v22 = vpack.c.bf16 %v1209_v20, %v1208_v18  ;;  %v2243_v23 = vpack.c.bf16 %v1241_v21, %v1240_v19 }
 0x1ae   : > { %2291 = vst [vmem:[%s2478_s19 + $0x178] sm:$0xff] %v2163_v22  }
 0x1af   : > { %2307 = vst [vmem:[%s2478_s19 + $0x1f8] sm:$0xff] %v2243_v23  }
 0x1b0 PF: > { %s14_s15 = sadd.s32 1, %s2350_s15  }
 0x1b1   : > { %p11_p4 = scmp.ge.s32.totalorder %s14_s15, 4  }
 0x1b3   :  { %13 = sbr.rel (!%p11_p4) target bundleno = 1 (0x1), region = 66 }

// kernel: _lambda_.9
= control target key start
LH: loop header
LB: loop body
LE: loop exit
PB: predicated region body
PF: predicated region fallthrough
CT: control target
= control target key end

     0   :  { %s3148_s18 = smov 0   ;;  %s3671_s0 = inlined_call_operand.vmem [shape: bf16[2048,128], index: 0, kind: input, shape index: {}]   ;;  %s3672_s1 = inlined_call_operand.vmem [shape: bf16[128,128], index: 1, kind: input, shape index: {}]   ;;  %s3673_s2 = inlined_call_operand.vmem [shape: f32[1,128], index: 2, kind: input, shape index: {}]   ;;  %s3674_s3 = inlined_call_operand.vmem [shape: f32[1,128], index: 3, kind: input, shape index: {}]   ;;  %s3675_s4 = inlined_call_operand.vmem [shape: bf16[2048,128], index: 4, kind: input, shape index: {}]   ;;  %s3676_s5 = inlined_call_operand.vmem [shape: bf16[2048,128], index: 5, kind: output, shape index: {}]  }
   0x1 LB: > { %s1999_s19 = sadd.s32 4294967295, %s3116_s18   ;;  %p2003_p0 = scmp.ge.s32.totalorder %s3116_s18, 1  ;;  %s3116_s18 = sphi %s3148_s18, %s15_s18  }
   0x2   : > { %p199_p1 = scmp.lt.s32.totalorder %s3116_s18, 3 }
   0x4   : > { %p200_p2 = pnand %p2003_p0, %p199_p1 }
   0x5   : > { %s2004_s28 = sshll.u32 (!%p200_p2), %s1999_s19, 7 }
   0x6   : > { %203 = sbr.rel (%p200_p2) target bundleno = 434 (0x1b2), region = 40  ;;  %p233_p3 = scmp.lt.s32.totalorder (!%p200_p2), %s2004_s28, 255 }
   0xb   : > { %v2371_v0 = vld [vmem:[%s3672_s1 + $0x38] sm:$0xff]  ;;  %v2370_v1 = vld [vmem:[%s3672_s1 + $0x30] sm:$0xff]  ;;  %v2369_v2 = vld [vmem:[%s3672_s1 + $0x28] sm:$0xff]  ;;  %s3678_s28 = smov (!%p233_p3, %s2004_s28), 255 }
   0xc   : > { %830 = vmatpush.bf16.msra.mxu0 %v2371_v0  ;;  %3074 = vmatpush.bf16.msra.mxu1 %v2371_v0  ;;  %v2368_v3 = vld [vmem:[%s3672_s1 + $0x20] sm:$0xff]  ;;  %v2367_v4 = vld [vmem:[%s3672_s1 + $0x18] sm:$0xff]  ;;  %v2366_v5 = vld [vmem:[%s3672_s1 + $0x10] sm:$0xff]  ;;  %s3177_s10 = sshll.u32 %s3678_s28, 2 }
   0xd   : > { %3075 = vmatpush.bf16.msra.mxu2 %v2371_v0  ;;  %3076 = vmatpush.bf16.msra.mxu3 %v2371_v0  ;;  %v2365_v6 = vld [vmem:[%s3672_s1 + $0x8] sm:$0xff]  ;;  %v2364_v7 = vld [vmem:[%s3672_s1] sm:$0xff]  ;;  %s3186_s15 = scalar_lea.vmem %s3671_s0, %s3177_s10  ;;  %s3224_s19 = scalar_lea.vmem %s3675_s4, %s3177_s10 }
   0xe   : > { %v2300_v8 = vld [vmem:[%s3186_s15] sm:$0xff]  ;;  %v2301_v12 = vld [vmem:[%s3186_s15 + $0x8] sm:$0xff]  ;;  %v2302_v16 = vld [vmem:[%s3186_s15 + $0x10] sm:$0xff]  ;;  %s3258_s26 = scalar_lea.vmem %s3676_s5, %s3177_s10 }
   0xf   : > { %v2316_v9 = vld [vmem:[%s3186_s15 + $0x80] sm:$0xff]  ;;  %v2317_v13 = vld [vmem:[%s3186_s15 + $0x88] sm:$0xff]  ;;  %v2318_v17 = vld [vmem:[%s3186_s15 + $0x90] sm:$0xff] }
  0x10   : > { %831 = vmatpush.bf16.msra.mxu0 %v2370_v1  ;;  %3077 = vmatpush.bf16.msra.mxu1 %v2370_v1  ;;  %v2332_v10 = vld [vmem:[%s3186_s15 + $0x100] sm:$0xff]  ;;  %v2333_v14 = vld [vmem:[%s3186_s15 + $0x108] sm:$0xff]  ;;  %v2334_v18 = vld [vmem:[%s3186_s15 + $0x110] sm:$0xff] }
  0x11   : > { %3078 = vmatpush.bf16.msra.mxu2 %v2370_v1  ;;  %3079 = vmatpush.bf16.msra.mxu3 %v2370_v1  ;;  %v2348_v11 = vld [vmem:[%s3186_s15 + $0x180] sm:$0xff]  ;;  %v2349_v15 = vld [vmem:[%s3186_s15 + $0x188] sm:$0xff]  ;;  %v2350_v19 = vld [vmem:[%s3186_s15 + $0x190] sm:$0xff] }
  0x12   : > { %v2303_v20 = vld [vmem:[%s3186_s15 + $0x18] sm:$0xff]  ;;  %v2304_v24 = vld [vmem:[%s3186_s15 + $0x20] sm:$0xff]  ;;  %v2305_v28 = vld [vmem:[%s3186_s15 + $0x28] sm:$0xff] }
  0x13   : > { %v2319_v21 = vld [vmem:[%s3186_s15 + $0x98] sm:$0xff]  ;;  %v2320_v25 = vld [vmem:[%s3186_s15 + $0xa0] sm:$0xff]  ;;  %v2321_v29 = vld [vmem:[%s3186_s15 + $0xa8] sm:$0xff] }
  0x14   : > { %832 = vmatpush.bf16.msra.mxu0 %v2369_v2  ;;  %3080 = vmatpush.bf16.msra.mxu1 %v2369_v2  ;;  %v2335_v22 = vld [vmem:[%s3186_s15 + $0x118] sm:$0xff]  ;;  %v2336_v26 = vld [vmem:[%s3186_s15 + $0x120] sm:$0xff]  ;;  %v2337_v30 = vld [vmem:[%s3186_s15 + $0x128] sm:$0xff] }
  0x15   : > { %3081 = vmatpush.bf16.msra.mxu2 %v2369_v2  ;;  %3082 = vmatpush.bf16.msra.mxu3 %v2369_v2  ;;  %v2351_v23 = vld [vmem:[%s3186_s15 + $0x198] sm:$0xff]  ;;  %v2352_v27 = vld [vmem:[%s3186_s15 + $0x1a0] sm:$0xff]  ;;  %v2353_v31 = vld [vmem:[%s3186_s15 + $0x1a8] sm:$0xff] }
  0x16   : > { %v2306_v32 = vld [vmem:[%s3186_s15 + $0x30] sm:$0xff]  ;;  %v2307_v36 = vld [vmem:[%s3186_s15 + $0x38] sm:$0xff]  ;;  %v2308_v40 = vld [vmem:[%s3186_s15 + $0x40] sm:$0xff] }
  0x17   : > { %v2322_v33 = vld [vmem:[%s3186_s15 + $0xb0] sm:$0xff]  ;;  %v2323_v37 = vld [vmem:[%s3186_s15 + $0xb8] sm:$0xff]  ;;  %v2324_v41 = vld [vmem:[%s3186_s15 + $0xc0] sm:$0xff] }
  0x18   : > { %833 = vmatpush.bf16.msra.mxu0 %v2368_v3  ;;  %3083 = vmatpush.bf16.msra.mxu1 %v2368_v3  ;;  %v2338_v34 = vld [vmem:[%s3186_s15 + $0x130] sm:$0xff]  ;;  %v2339_v38 = vld [vmem:[%s3186_s15 + $0x138] sm:$0xff]  ;;  %v2340_v44 = vld [vmem:[%s3186_s15 + $0x140] sm:$0xff] }
  0x19   : > { %3084 = vmatpush.bf16.msra.mxu2 %v2368_v3  ;;  %3085 = vmatpush.bf16.msra.mxu3 %v2368_v3  ;;  %v2354_v35 = vld [vmem:[%s3186_s15 + $0x1b0] sm:$0xff]  ;;  %v2355_v39 = vld [vmem:[%s3186_s15 + $0x1b8] sm:$0xff]  ;;  %v2356_v45 = vld [vmem:[%s3186_s15 + $0x1c0] sm:$0xff] }
  0x1a   : > { %v3233_v46 = vld [vmem:[%s3673_s2] ss:$0 sm:$0xff] }
  0x1b   : > { %v2373_v47 = vld [vmem:[%s3224_s19] sm:$0xff]  }
  0x1c   : > { %834 = vmatpush.bf16.msra.mxu0 %v2367_v4  ;;  %3086 = vmatpush.bf16.msra.mxu1 %v2367_v4  ;;  %v2963_v48 = vld [vmem:[%s3224_s19 + $0x80] sm:$0xff]   ;;  %v2374_v50 = vunpack.c.l.bf16 %v2373_v47  ;;  %v2375_v55 = vunpack.c.h.bf16 %v2373_v47  ;;  %v2980_v47 = vld [vmem:[%s3224_s19 + $0x108] sm:$0xff]  }
  0x1d   : > { %3087 = vmatpush.bf16.msra.mxu2 %v2367_v4  ;;  %3088 = vmatpush.bf16.msra.mxu3 %v2367_v4  ;;  %v2438_v52 = vunpack.c.l.bf16 %v2963_v48  ;;  %v2439_v56 = vunpack.c.h.bf16 %v2963_v48  ;;  %v2979_v57 = vld [vmem:[%s3224_s19 + $0x100] sm:$0xff]  }
  0x1e   : > { %v3243_v61 = vld [vmem:[%s3674_s3] ss:$0 sm:$0xff]  ;;  %v2502_v3 = vunpack.c.l.bf16 %v2979_v57 }
  0x1f   : > { %v2995_v63 = vld [vmem:[%s3224_s19 + $0x180] sm:$0xff]  }
  0x20   : > { %835 = vmatpush.bf16.msra.mxu0 %v2366_v5  ;;  %3089 = vmatpush.bf16.msra.mxu1 %v2366_v5 }
  0x21   : > { %3090 = vmatpush.bf16.msra.mxu2 %v2366_v5  ;;  %3091 = vmatpush.bf16.msra.mxu3 %v2366_v5 }
  0x24   : > { %836 = vmatpush.bf16.msra.mxu0 %v2365_v6  ;;  %3092 = vmatpush.bf16.msra.mxu1 %v2365_v6 }
  0x25   : > { %3093 = vmatpush.bf16.msra.mxu2 %v2365_v6  ;;  %3094 = vmatpush.bf16.msra.mxu3 %v2365_v6 }
  0x28   : > { %837 = vmatpush.bf16.msra.mxu0 %v2364_v7  ;;  %3095 = vmatpush.bf16.msra.mxu1 %v2364_v7 }
  0x29   : > { %3096 = vmatpush.bf16.msra.mxu2 %v2364_v7  ;;  %3097 = vmatpush.bf16.msra.mxu3 %v2364_v7  ;;  %v2566_v7 = vunpack.c.l.bf16 %v2995_v63 }
  0x2b   : > { %838 = vmatmul.bf16.vlgmr.msra.gmra.mxu0 %v2300_v8  ;;  %918 = vmatmul.bf16.vlgmr.msra.gmra.mxu1 %v2316_v9 }
  0x2c   : > { %998 = vmatmul.bf16.vlgmr.msra.gmra.mxu2 %v2332_v10  ;;  %1078 = vmatmul.bf16.vlgmr.msra.gmra.mxu3 %v2348_v11 }
  0x3b   : > { %843 = vmatmul.bf16.gmra.mxu0 %v2301_v12  ;;  %923 = vmatmul.bf16.gmra.mxu1 %v2317_v13  ;;  %v2503_v12 = vunpack.c.h.bf16 %v2979_v57  ;;  %v2567_v13 = vunpack.c.h.bf16 %v2995_v63 }
  0x3c   : > { %1003 = vmatmul.bf16.gmra.mxu2 %v2333_v14  ;;  %1083 = vmatmul.bf16.gmra.mxu3 %v2349_v15 }
  0x4b   : > { %848 = vmatmul.bf16.gmra.mxu0 %v2302_v16  ;;  %928 = vmatmul.bf16.gmra.mxu1 %v2318_v17 }
  0x4c   : > { %1008 = vmatmul.bf16.gmra.mxu2 %v2334_v18  ;;  %1088 = vmatmul.bf16.gmra.mxu3 %v2350_v19  ;;  %v2309_v19 = vld [vmem:[%s3186_s15 + $0x48] sm:$0xff] }
  0x5b   : > { %853 = vmatmul.bf16.gmra.mxu0 %v2303_v20  ;;  %933 = vmatmul.bf16.gmra.mxu1 %v2319_v21  ;;  %v2325_v20 = vld [vmem:[%s3186_s15 + $0xc8] sm:$0xff] }
  0x5c   : > { %1013 = vmatmul.bf16.gmra.mxu2 %v2335_v22  ;;  %1093 = vmatmul.bf16.gmra.mxu3 %v2351_v23 }
  0x6b   : > { %858 = vmatmul.bf16.gmra.mxu0 %v2304_v24  ;;  %938 = vmatmul.bf16.gmra.mxu1 %v2320_v25 }
  0x6c   : > { %1018 = vmatmul.bf16.gmra.mxu2 %v2336_v26  ;;  %1098 = vmatmul.bf16.gmra.mxu3 %v2352_v27  ;;  %v2341_v26 = vld [vmem:[%s3186_s15 + $0x148] sm:$0xff] }
  0x6d   : > { %v2357_v27 = vld [vmem:[%s3186_s15 + $0x1c8] sm:$0xff] }
  0x7b   : > { %863 = vmatmul.bf16.gmra.mxu0 %v2305_v28  ;;  %943 = vmatmul.bf16.gmra.mxu1 %v2321_v29 }
  0x7c   : > { %1023 = vmatmul.bf16.gmra.mxu2 %v2337_v30  ;;  %1103 = vmatmul.bf16.gmra.mxu3 %v2353_v31  ;;  %v2948_v30 = vld [vmem:[%s3224_s19 + $0x8] sm:$0xff]  }
  0x7d   : > { %v2964_v31 = vld [vmem:[%s3224_s19 + $0x88] sm:$0xff]  }
  0x8b   : > { %868 = vmatmul.bf16.gmra.mxu0 %v2306_v32  ;;  %948 = vmatmul.bf16.gmra.mxu1 %v2322_v33 }
  0x8c   : > { %1028 = vmatmul.bf16.gmra.mxu2 %v2338_v34  ;;  %1108 = vmatmul.bf16.gmra.mxu3 %v2354_v35 }
  0x9b   : > { %873 = vmatmul.bf16.gmra.mxu0 %v2307_v36  ;;  %953 = vmatmul.bf16.gmra.mxu1 %v2323_v37  ;;  %v2378_v37 = vunpack.c.l.bf16 %v2948_v30 }
  0x9c   : > { %1033 = vmatmul.bf16.gmra.mxu2 %v2339_v38  ;;  %1113 = vmatmul.bf16.gmra.mxu3 %v2355_v39  ;;  %v2442_v39 = vunpack.c.l.bf16 %v2964_v31 }
  0xa8   : > { %v839_v42 = vpop.f32.mrf.mxu0  ;;  %v919_v43 = vpop.f32.mrf.mxu1 }
  0xa9   : > { %v840_v49 = vadd.f32 %v3233_v46, %v839_v42  ;;  %v920_v51 = vadd.f32 %v3233_v46, %v919_v43 }
  0xab   : > { %878 = vmatmul.bf16.gmra.mxu0 %v2308_v40  ;;  %958 = vmatmul.bf16.gmra.mxu1 %v2324_v41  ;;  %v1415_v60 = vadd.f32 %v2374_v50, %v840_v49  ;;  %v1447_v62 = vadd.f32 %v2438_v52, %v920_v51  ;;  %v2996_v52 = vld [vmem:[%s3224_s19 + $0x188] sm:$0xff]  }
  0xac   : > { %1038 = vmatmul.bf16.gmra.mxu2 %v2340_v44  ;;  %1118 = vmatmul.bf16.gmra.mxu3 %v2356_v45  ;;  %v2379_v44 = vunpack.c.h.bf16 %v2948_v30  ;;  %v2443_v45 = vunpack.c.h.bf16 %v2964_v31 }
  0xad   : > { %v1547_v8 = vmax.f32 %v1415_v60, %v3243_v61  ;;  %v1579_v9 = vmax.f32 %v1447_v62, %v3243_v61  ;;  %v2570_v60 = vunpack.c.l.bf16 %v2996_v52 }
  0xaf   : > { %v999_v53 = vpop.f32.mrf.mxu2  ;;  %v1079_v54 = vpop.f32.mrf.mxu3 }
  0xb0   : > { %v841_v58 = vpop.f32.mrf.mxu0  ;;  %v921_v59 = vpop.f32.mrf.mxu1  ;;  %v1000_v2 = vadd.f32 %v3233_v46, %v999_v53  ;;  %v1080_v6 = vadd.f32 %v3233_v46, %v1079_v54 }
  0xb1   : > { %v842_v0 = vadd.f32 %v3233_v46, %v841_v58  ;;  %v922_v1 = vadd.f32 %v3233_v46, %v921_v59 }
  0xb2   : > { %v1479_v14 = vadd.f32 %v2502_v3, %v1000_v2  ;;  %v1511_v21 = vadd.f32 %v2566_v7, %v1080_v6  ;;  %v2507_v2 = vunpack.c.h.bf16 %v2980_v47  ;;  %v2571_v3 = vunpack.c.h.bf16 %v2996_v52 }
  0xb3   : > { %v1416_v4 = vadd.f32 %v2375_v55, %v842_v0  ;;  %v1448_v5 = vadd.f32 %v2439_v56, %v922_v1  ;;  %v2506_v56 = vunpack.c.l.bf16 %v2980_v47 }
  0xb4   : > { %v1611_v32 = vmax.f32 %v1479_v14, %v3243_v61  ;;  %v1643_v33 = vmax.f32 %v1511_v21, %v3243_v61  ;;  %v2965_v21 = vld [vmem:[%s3224_s19 + $0x90] sm:$0xff]  }
  0xb5   : > { %v1548_v10 = vmax.f32 %v1416_v4, %v3243_v61  ;;  %v1580_v11 = vmax.f32 %v1448_v5, %v3243_v61 }
  0xb7   : > { %v2631_v15 = vpack.c.bf16 %v1548_v10, %v1547_v8  ;;  %v2711_v16 = vpack.c.bf16 %v1580_v11, %v1579_v9  ;;  %v1001_v17 = vpop.f32.mrf.mxu2  ;;  %v1081_v18 = vpop.f32.mrf.mxu3  ;;  %v2310_v9 = vld [vmem:[%s3186_s15 + $0x50] sm:$0xff] }
  0xb8   : > { %v1002_v22 = vadd.f32 %v3233_v46, %v1001_v17  ;;  %v1082_v23 = vadd.f32 %v3233_v46, %v1081_v18  ;;  %v844_v24 = vpop.f32.mrf.mxu0  ;;  %v924_v25 = vpop.f32.mrf.mxu1  ;;  %v2326_v10 = vld [vmem:[%s3186_s15 + $0xd0] sm:$0xff] }
  0xb9   : > { %2632 = vst [vmem:[%s3258_s26] sm:$0xff] %v2631_v15   ;;  %v845_v36 = vadd.f32 %v3233_v46, %v844_v24  ;;  %v925_v38 = vadd.f32 %v3233_v46, %v924_v25  ;;  %v2358_v17 = vld [vmem:[%s3186_s15 + $0x1d0] sm:$0xff] }
  0xba   : > { %3026 = vst [vmem:[%s3258_s26 + $0x80] sm:$0xff] %v2711_v16   ;;  %v1480_v28 = vadd.f32 %v2503_v12, %v1002_v22  ;;  %v1512_v29 = vadd.f32 %v2567_v13, %v1082_v23  ;;  %v2342_v16 = vld [vmem:[%s3186_s15 + $0x150] sm:$0xff] }
  0xbb   : > { %883 = vmatmul.bf16.gmra.mxu0 %v2309_v19  ;;  %963 = vmatmul.bf16.gmra.mxu1 %v2325_v20  ;;  %v1417_v50 = vadd.f32 %v2378_v37, %v845_v36  ;;  %v1449_v51 = vadd.f32 %v2442_v39, %v925_v38  ;;  %v2949_v20 = vld [vmem:[%s3224_s19 + $0x10] sm:$0xff]  }
  0xbc   : > { %v1612_v34 = vmax.f32 %v1480_v28, %v3243_v61  ;;  %v1644_v35 = vmax.f32 %v1512_v29, %v3243_v61  ;;  %1043 = vmatmul.bf16.gmra.mxu2 %v2341_v26  ;;  %1123 = vmatmul.bf16.gmra.mxu3 %v2357_v27  ;;  %v2382_v27 = vunpack.c.l.bf16 %v2949_v20  ;;  %v2446_v29 = vunpack.c.l.bf16 %v2965_v21  ;;  %v2981_v36 = vld [vmem:[%s3224_s19 + $0x110] sm:$0xff]  }
  0xbd   : > { %v1549_v62 = vmax.f32 %v1417_v50, %v3243_v61  ;;  %v1581_v63 = vmax.f32 %v1449_v51, %v3243_v61 }
  0xbe   : > { %v2791_v40 = vpack.c.bf16 %v1612_v34, %v1611_v32  ;;  %v2871_v41 = vpack.c.bf16 %v1644_v35, %v1643_v33  ;;  %v2383_v34 = vunpack.c.h.bf16 %v2949_v20  ;;  %v2447_v35 = vunpack.c.h.bf16 %v2965_v21 }
  0xbf   : > { %v1004_v42 = vpop.f32.mrf.mxu2  ;;  %v1084_v43 = vpop.f32.mrf.mxu3 }
  0xc0   : > { %3042 = vst [vmem:[%s3258_s26 + $0x100] sm:$0xff] %v2791_v40   ;;  %v846_v48 = vpop.f32.mrf.mxu0  ;;  %v926_v49 = vpop.f32.mrf.mxu1  ;;  %v1005_v55 = vadd.f32 %v3233_v46, %v1004_v42  ;;  %v1085_v59 = vadd.f32 %v3233_v46, %v1084_v43 }
  0xc1   : > { %3058 = vst [vmem:[%s3258_s26 + $0x180] sm:$0xff] %v2871_v41   ;;  %v847_v53 = vadd.f32 %v3233_v46, %v846_v48  ;;  %v927_v54 = vadd.f32 %v3233_v46, %v926_v49  ;;  %v2997_v41 = vld [vmem:[%s3224_s19 + $0x190] sm:$0xff]  }
  0xc2   : > { %v1481_v4 = vadd.f32 %v2506_v56, %v1005_v55  ;;  %v1513_v11 = vadd.f32 %v2570_v60, %v1085_v59  ;;  %v2574_v50 = vunpack.c.l.bf16 %v2997_v41  ;;  %v2511_v55 = vunpack.c.h.bf16 %v2981_v36 }
  0xc3   : > { %v1418_v57 = vadd.f32 %v2379_v44, %v847_v53  ;;  %v1450_v58 = vadd.f32 %v2443_v45, %v927_v54  ;;  %v2510_v45 = vunpack.c.l.bf16 %v2981_v36  ;;  %v2575_v56 = vunpack.c.h.bf16 %v2997_v41 }
  0xc4   : > { %v1613_v22 = vmax.f32 %v1481_v4, %v3243_v61  ;;  %v1645_v23 = vmax.f32 %v1513_v11, %v3243_v61  ;;  %v2966_v11 = vld [vmem:[%s3224_s19 + $0x98] sm:$0xff]  }
  0xc5   : > { %v1550_v0 = vmax.f32 %v1418_v57, %v3243_v61  ;;  %v1582_v1 = vmax.f32 %v1450_v58, %v3243_v61 }
  0xc7   : > { %v2636_v5 = vpack.c.bf16 %v1550_v0, %v1549_v62  ;;  %v2716_v6 = vpack.c.bf16 %v1582_v1, %v1581_v63  ;;  %v1006_v7 = vpop.f32.mrf.mxu2  ;;  %v1086_v8 = vpop.f32.mrf.mxu3  ;;  %v2311_v63 = vld [vmem:[%s3186_s15 + $0x58] sm:$0xff] }
  0xc8   : > { %v1007_v12 = vadd.f32 %v3233_v46, %v1006_v7  ;;  %v1087_v13 = vadd.f32 %v3233_v46, %v1086_v8  ;;  %v849_v14 = vpop.f32.mrf.mxu0  ;;  %v929_v15 = vpop.f32.mrf.mxu1  ;;  %v2327_v0 = vld [vmem:[%s3186_s15 + $0xd8] sm:$0xff] }
  0xc9   : > { %3011 = vst [vmem:[%s3258_s26 + $0x8] sm:$0xff] %v2636_v5   ;;  %v850_v26 = vadd.f32 %v3233_v46, %v849_v14  ;;  %v930_v28 = vadd.f32 %v3233_v46, %v929_v15  ;;  %v2359_v7 = vld [vmem:[%s3186_s15 + $0x1d8] sm:$0xff] }
  0xca   : > { %3027 = vst [vmem:[%s3258_s26 + $0x88] sm:$0xff] %v2716_v6   ;;  %v1482_v18 = vadd.f32 %v2507_v2, %v1007_v12  ;;  %v1514_v19 = vadd.f32 %v2571_v3, %v1087_v13  ;;  %v2343_v6 = vld [vmem:[%s3186_s15 + $0x158] sm:$0xff] }
  0xcb   : > { %888 = vmatmul.bf16.gmra.mxu0 %v2310_v9  ;;  %968 = vmatmul.bf16.gmra.mxu1 %v2326_v10  ;;  %v1419_v39 = vadd.f32 %v2382_v27, %v850_v26  ;;  %v1451_v40 = vadd.f32 %v2446_v29, %v930_v28  ;;  %v2950_v10 = vld [vmem:[%s3224_s19 + $0x18] sm:$0xff]  }
  0xcc   : > { %v1614_v24 = vmax.f32 %v1482_v18, %v3243_v61  ;;  %v1646_v25 = vmax.f32 %v1514_v19, %v3243_v61  ;;  %1048 = vmatmul.bf16.gmra.mxu2 %v2342_v16  ;;  %1128 = vmatmul.bf16.gmra.mxu3 %v2358_v17  ;;  %v2386_v17 = vunpack.c.l.bf16 %v2950_v10  ;;  %v2450_v19 = vunpack.c.l.bf16 %v2966_v11  ;;  %v2982_v26 = vld [vmem:[%s3224_s19 + $0x118] sm:$0xff]  }
  0xcd   : > { %v1551_v51 = vmax.f32 %v1419_v39, %v3243_v61  ;;  %v1583_v52 = vmax.f32 %v1451_v40, %v3243_v61 }
  0xce   : > { %v2796_v30 = vpack.c.bf16 %v1614_v24, %v1613_v22  ;;  %v2876_v31 = vpack.c.bf16 %v1646_v25, %v1645_v23  ;;  %v2387_v24 = vunpack.c.h.bf16 %v2950_v10  ;;  %v2451_v25 = vunpack.c.h.bf16 %v2966_v11 }
  0xcf   : > { %v1009_v32 = vpop.f32.mrf.mxu2  ;;  %v1089_v33 = vpop.f32.mrf.mxu3 }
  0xd0   : > { %3043 = vst [vmem:[%s3258_s26 + $0x108] sm:$0xff] %v2796_v30   ;;  %v851_v37 = vpop.f32.mrf.mxu0  ;;  %v931_v38 = vpop.f32.mrf.mxu1  ;;  %v1010_v44 = vadd.f32 %v3233_v46, %v1009_v32  ;;  %v1090_v49 = vadd.f32 %v3233_v46, %v1089_v33 }
  0xd1   : > { %3059 = vst [vmem:[%s3258_s26 + $0x188] sm:$0xff] %v2876_v31   ;;  %v852_v42 = vadd.f32 %v3233_v46, %v851_v37  ;;  %v932_v43 = vadd.f32 %v3233_v46, %v931_v38  ;;  %v2998_v31 = vld [vmem:[%s3224_s19 + $0x198] sm:$0xff]  }
  0xd2   : > { %v1483_v57 = vadd.f32 %v2510_v45, %v1010_v44  ;;  %v1515_v1 = vadd.f32 %v2574_v50, %v1090_v49  ;;  %v2578_v39 = vunpack.c.l.bf16 %v2998_v31  ;;  %v2515_v44 = vunpack.c.h.bf16 %v2982_v26 }
  0xd3   : > { %v1420_v47 = vadd.f32 %v2383_v34, %v852_v42  ;;  %v1452_v48 = vadd.f32 %v2447_v35, %v932_v43  ;;  %v2514_v35 = vunpack.c.l.bf16 %v2982_v26  ;;  %v2579_v45 = vunpack.c.h.bf16 %v2998_v31 }
  0xd4   : > { %v1615_v12 = vmax.f32 %v1483_v57, %v3243_v61  ;;  %v1647_v13 = vmax.f32 %v1515_v1, %v3243_v61  ;;  %v2967_v1 = vld [vmem:[%s3224_s19 + $0xa0] sm:$0xff]  }
  0xd5   : > { %v1552_v53 = vmax.f32 %v1420_v47, %v3243_v61  ;;  %v1584_v54 = vmax.f32 %v1452_v48, %v3243_v61 }
  0xd7   : > { %v2641_v58 = vpack.c.bf16 %v1552_v53, %v1551_v51  ;;  %v2721_v59 = vpack.c.bf16 %v1584_v54, %v1583_v52  ;;  %v1011_v60 = vpop.f32.mrf.mxu2  ;;  %v1091_v62 = vpop.f32.mrf.mxu3  ;;  %v2312_v52 = vld [vmem:[%s3186_s15 + $0x60] sm:$0xff] }
  0xd8   : > { %v1012_v2 = vadd.f32 %v3233_v46, %v1011_v60  ;;  %v1092_v3 = vadd.f32 %v3233_v46, %v1091_v62  ;;  %v854_v4 = vpop.f32.mrf.mxu0  ;;  %v934_v5 = vpop.f32.mrf.mxu1  ;;  %v2328_v53 = vld [vmem:[%s3186_s15 + $0xe0] sm:$0xff] }
  0xd9   : > { %3012 = vst [vmem:[%s3258_s26 + $0x10] sm:$0xff] %v2641_v58   ;;  %v855_v16 = vadd.f32 %v3233_v46, %v854_v4  ;;  %v935_v18 = vadd.f32 %v3233_v46, %v934_v5  ;;  %v2360_v60 = vld [vmem:[%s3186_s15 + $0x1e0] sm:$0xff] }
  0xda   : > { %3028 = vst [vmem:[%s3258_s26 + $0x90] sm:$0xff] %v2721_v59   ;;  %v1484_v8 = vadd.f32 %v2511_v55, %v1012_v2  ;;  %v1516_v9 = vadd.f32 %v2575_v56, %v1092_v3  ;;  %v2344_v59 = vld [vmem:[%s3186_s15 + $0x160] sm:$0xff] }
  0xdb   : > { %893 = vmatmul.bf16.gmra.mxu0 %v2311_v63  ;;  %973 = vmatmul.bf16.gmra.mxu1 %v2327_v0  ;;  %v1421_v29 = vadd.f32 %v2386_v17, %v855_v16  ;;  %v1453_v30 = vadd.f32 %v2450_v19, %v935_v18  ;;  %v2951_v0 = vld [vmem:[%s3224_s19 + $0x20] sm:$0xff]  }
  0xdc   : > { %v1616_v14 = vmax.f32 %v1484_v8, %v3243_v61  ;;  %v1648_v15 = vmax.f32 %v1516_v9, %v3243_v61  ;;  %1053 = vmatmul.bf16.gmra.mxu2 %v2343_v6  ;;  %1133 = vmatmul.bf16.gmra.mxu3 %v2359_v7  ;;  %v2390_v7 = vunpack.c.l.bf16 %v2951_v0  ;;  %v2454_v9 = vunpack.c.l.bf16 %v2967_v1  ;;  %v2983_v16 = vld [vmem:[%s3224_s19 + $0x120] sm:$0xff]  }
  0xdd   : > { %v1553_v40 = vmax.f32 %v1421_v29, %v3243_v61  ;;  %v1585_v41 = vmax.f32 %v1453_v30, %v3243_v61 }
  0xde   : > { %v2801_v20 = vpack.c.bf16 %v1616_v14, %v1615_v12  ;;  %v2881_v21 = vpack.c.bf16 %v1648_v15, %v1647_v13  ;;  %v2391_v14 = vunpack.c.h.bf16 %v2951_v0  ;;  %v2455_v15 = vunpack.c.h.bf16 %v2967_v1 }
  0xdf   : > { %v1014_v22 = vpop.f32.mrf.mxu2  ;;  %v1094_v23 = vpop.f32.mrf.mxu3 }
  0xe0   : > { %3044 = vst [vmem:[%s3258_s26 + $0x110] sm:$0xff] %v2801_v20   ;;  %v856_v27 = vpop.f32.mrf.mxu0  ;;  %v936_v28 = vpop.f32.mrf.mxu1  ;;  %v1015_v34 = vadd.f32 %v3233_v46, %v1014_v22  ;;  %v1095_v38 = vadd.f32 %v3233_v46, %v1094_v23 }
  0xe1   : > { %3060 = vst [vmem:[%s3258_s26 + $0x190] sm:$0xff] %v2881_v21   ;;  %v857_v32 = vadd.f32 %v3233_v46, %v856_v27  ;;  %v937_v33 = vadd.f32 %v3233_v46, %v936_v28  ;;  %v2999_v21 = vld [vmem:[%s3224_s19 + $0x1a0] sm:$0xff]  }
  0xe2   : > { %v1485_v47 = vadd.f32 %v2514_v35, %v1015_v34  ;;  %v1517_v54 = vadd.f32 %v2578_v39, %v1095_v38  ;;  %v2582_v29 = vunpack.c.l.bf16 %v2999_v21  ;;  %v2519_v34 = vunpack.c.h.bf16 %v2983_v16 }
  0xe3   : > { %v1422_v36 = vadd.f32 %v2387_v24, %v857_v32  ;;  %v1454_v37 = vadd.f32 %v2451_v25, %v937_v33  ;;  %v2518_v25 = vunpack.c.l.bf16 %v2983_v16  ;;  %v2583_v35 = vunpack.c.h.bf16 %v2999_v21 }
  0xe4   : > { %v1617_v2 = vmax.f32 %v1485_v47, %v3243_v61  ;;  %v1649_v3 = vmax.f32 %v1517_v54, %v3243_v61  ;;  %v2968_v54 = vld [vmem:[%s3224_s19 + $0xa8] sm:$0xff]  }
  0xe5   : > { %v1554_v42 = vmax.f32 %v1422_v36, %v3243_v61  ;;  %v1586_v43 = vmax.f32 %v1454_v37, %v3243_v61 }
  0xe7   : > { %v2646_v48 = vpack.c.bf16 %v1554_v42, %v1553_v40  ;;  %v2726_v49 = vpack.c.bf16 %v1586_v43, %v1585_v41  ;;  %v1016_v50 = vpop.f32.mrf.mxu2  ;;  %v1096_v51 = vpop.f32.mrf.mxu3  ;;  %v2313_v41 = vld [vmem:[%s3186_s15 + $0x68] sm:$0xff] }
  0xe8   : > { %v1017_v55 = vadd.f32 %v3233_v46, %v1016_v50  ;;  %v1097_v56 = vadd.f32 %v3233_v46, %v1096_v51  ;;  %v859_v57 = vpop.f32.mrf.mxu0  ;;  %v939_v58 = vpop.f32.mrf.mxu1  ;;  %v2329_v42 = vld [vmem:[%s3186_s15 + $0xe8] sm:$0xff] }
  0xe9   : > { %3013 = vst [vmem:[%s3258_s26 + $0x18] sm:$0xff] %v2646_v48   ;;  %v860_v6 = vadd.f32 %v3233_v46, %v859_v57  ;;  %v940_v8 = vadd.f32 %v3233_v46, %v939_v58  ;;  %v2361_v50 = vld [vmem:[%s3186_s15 + $0x1e8] sm:$0xff] }
  0xea   : > { %3029 = vst [vmem:[%s3258_s26 + $0x98] sm:$0xff] %v2726_v49   ;;  %v1486_v62 = vadd.f32 %v2515_v44, %v1017_v55  ;;  %v1518_v63 = vadd.f32 %v2579_v45, %v1097_v56  ;;  %v2345_v49 = vld [vmem:[%s3186_s15 + $0x168] sm:$0xff] }
  0xeb   : > { %898 = vmatmul.bf16.gmra.mxu0 %v2312_v52  ;;  %978 = vmatmul.bf16.gmra.mxu1 %v2328_v53  ;;  %v1423_v19 = vadd.f32 %v2390_v7, %v860_v6  ;;  %v1455_v20 = vadd.f32 %v2454_v9, %v940_v8  ;;  %v2952_v53 = vld [vmem:[%s3224_s19 + $0x28] sm:$0xff]  }
  0xec   : > { %v1618_v4 = vmax.f32 %v1486_v62, %v3243_v61  ;;  %v1650_v5 = vmax.f32 %v1518_v63, %v3243_v61  ;;  %1058 = vmatmul.bf16.gmra.mxu2 %v2344_v59  ;;  %1138 = vmatmul.bf16.gmra.mxu3 %v2360_v60  ;;  %v2394_v60 = vunpack.c.l.bf16 %v2952_v53  ;;  %v2458_v63 = vunpack.c.l.bf16 %v2968_v54  ;;  %v2984_v6 = vld [vmem:[%s3224_s19 + $0x128] sm:$0xff]  }
  0xed   : > { %v1555_v30 = vmax.f32 %v1423_v19, %v3243_v61  ;;  %v1587_v31 = vmax.f32 %v1455_v20, %v3243_v61 }
  0xee   : > { %v2806_v10 = vpack.c.bf16 %v1618_v4, %v1617_v2  ;;  %v2886_v11 = vpack.c.bf16 %v1650_v5, %v1649_v3  ;;  %v2395_v4 = vunpack.c.h.bf16 %v2952_v53  ;;  %v2459_v5 = vunpack.c.h.bf16 %v2968_v54 }
  0xef   : > { %v1019_v12 = vpop.f32.mrf.mxu2  ;;  %v1099_v13 = vpop.f32.mrf.mxu3 }
  0xf0   : > { %3045 = vst [vmem:[%s3258_s26 + $0x118] sm:$0xff] %v2806_v10   ;;  %v861_v17 = vpop.f32.mrf.mxu0  ;;  %v941_v18 = vpop.f32.mrf.mxu1  ;;  %v1020_v24 = vadd.f32 %v3233_v46, %v1019_v12  ;;  %v1100_v28 = vadd.f32 %v3233_v46, %v1099_v13 }
  0xf1   : > { %3061 = vst [vmem:[%s3258_s26 + $0x198] sm:$0xff] %v2886_v11   ;;  %v862_v22 = vadd.f32 %v3233_v46, %v861_v17  ;;  %v942_v23 = vadd.f32 %v3233_v46, %v941_v18  ;;  %v3000_v11 = vld [vmem:[%s3224_s19 + $0x1a8] sm:$0xff]  }
  0xf2   : > { %v1487_v36 = vadd.f32 %v2518_v25, %v1020_v24  ;;  %v1519_v43 = vadd.f32 %v2582_v29, %v1100_v28  ;;  %v2586_v19 = vunpack.c.l.bf16 %v3000_v11  ;;  %v2523_v24 = vunpack.c.h.bf16 %v2984_v6 }
  0xf3   : > { %v1424_v26 = vadd.f32 %v2391_v14, %v862_v22  ;;  %v1456_v27 = vadd.f32 %v2455_v15, %v942_v23  ;;  %v2522_v15 = vunpack.c.l.bf16 %v2984_v6  ;;  %v2587_v25 = vunpack.c.h.bf16 %v3000_v11 }
  0xf4   : > { %v1619_v55 = vmax.f32 %v1487_v36, %v3243_v61  ;;  %v1651_v56 = vmax.f32 %v1519_v43, %v3243_v61  ;;  %v2969_v43 = vld [vmem:[%s3224_s19 + $0xb0] sm:$0xff]  }
  0xf5   : > { %v1556_v32 = vmax.f32 %v1424_v26, %v3243_v61  ;;  %v1588_v33 = vmax.f32 %v1456_v27, %v3243_v61 }
  0xf7   : > { %v2651_v37 = vpack.c.bf16 %v1556_v32, %v1555_v30  ;;  %v2731_v38 = vpack.c.bf16 %v1588_v33, %v1587_v31  ;;  %v1021_v39 = vpop.f32.mrf.mxu2  ;;  %v1101_v40 = vpop.f32.mrf.mxu3  ;;  %v2314_v31 = vld [vmem:[%s3186_s15 + $0x70] sm:$0xff] }
  0xf8   : > { %v1022_v44 = vadd.f32 %v3233_v46, %v1021_v39  ;;  %v1102_v45 = vadd.f32 %v3233_v46, %v1101_v40  ;;  %v864_v47 = vpop.f32.mrf.mxu0  ;;  %v944_v48 = vpop.f32.mrf.mxu1  ;;  %v2330_v32 = vld [vmem:[%s3186_s15 + $0xf0] sm:$0xff] }
  0xf9   : > { %3014 = vst [vmem:[%s3258_s26 + $0x20] sm:$0xff] %v2651_v37   ;;  %v865_v59 = vadd.f32 %v3233_v46, %v864_v47  ;;  %v945_v62 = vadd.f32 %v3233_v46, %v944_v48  ;;  %v2362_v39 = vld [vmem:[%s3186_s15 + $0x1f0] sm:$0xff] }
  0xfa   : > { %3030 = vst [vmem:[%s3258_s26 + $0xa0] sm:$0xff] %v2731_v38   ;;  %v1488_v51 = vadd.f32 %v2519_v34, %v1022_v44  ;;  %v1520_v52 = vadd.f32 %v2583_v35, %v1102_v45  ;;  %v2346_v38 = vld [vmem:[%s3186_s15 + $0x170] sm:$0xff] }
  0xfb   : > { %903 = vmatmul.bf16.gmra.mxu0 %v2313_v41  ;;  %983 = vmatmul.bf16.gmra.mxu1 %v2329_v42  ;;  %v1425_v9 = vadd.f32 %v2394_v60, %v865_v59  ;;  %v1457_v10 = vadd.f32 %v2458_v63, %v945_v62  ;;  %v2953_v42 = vld [vmem:[%s3224_s19 + $0x30] sm:$0xff]  }
  0xfc   : > { %v1620_v57 = vmax.f32 %v1488_v51, %v3243_v61  ;;  %v1652_v58 = vmax.f32 %v1520_v52, %v3243_v61  ;;  %1063 = vmatmul.bf16.gmra.mxu2 %v2345_v49  ;;  %1143 = vmatmul.bf16.gmra.mxu3 %v2361_v50  ;;  %v2398_v50 = vunpack.c.l.bf16 %v2953_v42  ;;  %v2462_v52 = vunpack.c.l.bf16 %v2969_v43  ;;  %v2985_v59 = vld [vmem:[%s3224_s19 + $0x130] sm:$0xff]  }
  0xfd   : > { %v1557_v20 = vmax.f32 %v1425_v9, %v3243_v61  ;;  %v1589_v21 = vmax.f32 %v1457_v10, %v3243_v61 }
  0xfe   : > { %v2811_v0 = vpack.c.bf16 %v1620_v57, %v1619_v55  ;;  %v2891_v1 = vpack.c.bf16 %v1652_v58, %v1651_v56  ;;  %v2399_v57 = vunpack.c.h.bf16 %v2953_v42  ;;  %v2463_v58 = vunpack.c.h.bf16 %v2969_v43 }
  0xff   : > { %v1024_v2 = vpop.f32.mrf.mxu2  ;;  %v1104_v3 = vpop.f32.mrf.mxu3 }
 0x100   : > { %3046 = vst [vmem:[%s3258_s26 + $0x120] sm:$0xff] %v2811_v0   ;;  %v866_v7 = vpop.f32.mrf.mxu0  ;;  %v946_v8 = vpop.f32.mrf.mxu1  ;;  %v1025_v14 = vadd.f32 %v3233_v46, %v1024_v2  ;;  %v1105_v18 = vadd.f32 %v3233_v46, %v1104_v3 }
 0x101   : > { %3062 = vst [vmem:[%s3258_s26 + $0x1a0] sm:$0xff] %v2891_v1   ;;  %v867_v12 = vadd.f32 %v3233_v46, %v866_v7  ;;  %v947_v13 = vadd.f32 %v3233_v46, %v946_v8  ;;  %v3001_v1 = vld [vmem:[%s3224_s19 + $0x1b0] sm:$0xff]  }
 0x102   : > { %v1489_v26 = vadd.f32 %v2522_v15, %v1025_v14  ;;  %v1521_v33 = vadd.f32 %v2586_v19, %v1105_v18  ;;  %v2590_v9 = vunpack.c.l.bf16 %v3001_v1  ;;  %v2527_v14 = vunpack.c.h.bf16 %v2985_v59 }
 0x103   : > { %v1426_v16 = vadd.f32 %v2395_v4, %v867_v12  ;;  %v1458_v17 = vadd.f32 %v2459_v5, %v947_v13  ;;  %v2526_v5 = vunpack.c.l.bf16 %v2985_v59  ;;  %v2591_v15 = vunpack.c.h.bf16 %v3001_v1 }
 0x104   : > { %v1621_v44 = vmax.f32 %v1489_v26, %v3243_v61  ;;  %v1653_v45 = vmax.f32 %v1521_v33, %v3243_v61  ;;  %v2970_v33 = vld [vmem:[%s3224_s19 + $0xb8] sm:$0xff]  }
 0x105   : > { %v1558_v22 = vmax.f32 %v1426_v16, %v3243_v61  ;;  %v1590_v23 = vmax.f32 %v1458_v17, %v3243_v61 }
 0x107   : > { %v2656_v27 = vpack.c.bf16 %v1558_v22, %v1557_v20  ;;  %v2736_v28 = vpack.c.bf16 %v1590_v23, %v1589_v21  ;;  %v1026_v29 = vpop.f32.mrf.mxu2  ;;  %v1106_v30 = vpop.f32.mrf.mxu3  ;;  %v2315_v21 = vld [vmem:[%s3186_s15 + $0x78] sm:$0xff] }
 0x108   : > { %v1027_v34 = vadd.f32 %v3233_v46, %v1026_v29  ;;  %v1107_v35 = vadd.f32 %v3233_v46, %v1106_v30  ;;  %v869_v36 = vpop.f32.mrf.mxu0  ;;  %v949_v37 = vpop.f32.mrf.mxu1  ;;  %v2331_v22 = vld [vmem:[%s3186_s15 + $0xf8] sm:$0xff] }
 0x109   : > { %3015 = vst [vmem:[%s3258_s26 + $0x28] sm:$0xff] %v2656_v27   ;;  %v870_v49 = vadd.f32 %v3233_v46, %v869_v36  ;;  %v950_v51 = vadd.f32 %v3233_v46, %v949_v37  ;;  %v2363_v29 = vld [vmem:[%s3186_s15 + $0x1f8] sm:$0xff] }
 0x10a   : > { %3031 = vst [vmem:[%s3258_s26 + $0xa8] sm:$0xff] %v2736_v28   ;;  %v1490_v40 = vadd.f32 %v2523_v24, %v1027_v34  ;;  %v1522_v41 = vadd.f32 %v2587_v25, %v1107_v35  ;;  %v2347_v28 = vld [vmem:[%s3186_s15 + $0x178] sm:$0xff] }
 0x10b   : > { %908 = vmatmul.bf16.gmra.mxu0 %v2314_v31  ;;  %988 = vmatmul.bf16.gmra.mxu1 %v2330_v32  ;;  %v1427_v63 = vadd.f32 %v2398_v50, %v870_v49  ;;  %v1459_v0 = vadd.f32 %v2462_v52, %v950_v51  ;;  %v2954_v32 = vld [vmem:[%s3224_s19 + $0x38] sm:$0xff]  }
 0x10c   : > { %v1622_v47 = vmax.f32 %v1490_v40, %v3243_v61  ;;  %v1654_v48 = vmax.f32 %v1522_v41, %v3243_v61  ;;  %1068 = vmatmul.bf16.gmra.mxu2 %v2346_v38  ;;  %1148 = vmatmul.bf16.gmra.mxu3 %v2362_v39  ;;  %v2402_v39 = vunpack.c.l.bf16 %v2954_v32  ;;  %v2466_v41 = vunpack.c.l.bf16 %v2970_v33 }
 0x10d   : > { %v1559_v10 = vmax.f32 %v1427_v63, %v3243_v61  ;;  %v1591_v11 = vmax.f32 %v1459_v0, %v3243_v61 }
 0x10e   : > { %v2816_v53 = vpack.c.bf16 %v1622_v47, %v1621_v44  ;;  %v2896_v54 = vpack.c.bf16 %v1654_v48, %v1653_v45  ;;  %v2403_v47 = vunpack.c.h.bf16 %v2954_v32  ;;  %v2467_v48 = vunpack.c.h.bf16 %v2970_v33 }
 0x10f   : > { %v1029_v55 = vpop.f32.mrf.mxu2  ;;  %v1109_v56 = vpop.f32.mrf.mxu3 }
 0x110   : > { %3047 = vst [vmem:[%s3258_s26 + $0x128] sm:$0xff] %v2816_v53   ;;  %v871_v60 = vpop.f32.mrf.mxu0  ;;  %v951_v62 = vpop.f32.mrf.mxu1  ;;  %v1030_v4 = vadd.f32 %v3233_v46, %v1029_v55  ;;  %v1110_v8 = vadd.f32 %v3233_v46, %v1109_v56  ;;  %v2986_v53 = vld [vmem:[%s3224_s19 + $0x138] sm:$0xff]  }
 0x111   : > { %3063 = vst [vmem:[%s3258_s26 + $0x1a8] sm:$0xff] %v2896_v54   ;;  %v872_v2 = vadd.f32 %v3233_v46, %v871_v60  ;;  %v952_v3 = vadd.f32 %v3233_v46, %v951_v62  ;;  %v3002_v54 = vld [vmem:[%s3224_s19 + $0x1b8] sm:$0xff]   ;;  %v2530_v60 = vunpack.c.l.bf16 %v2986_v53 }
 0x112   : > { %v1491_v16 = vadd.f32 %v2526_v5, %v1030_v4  ;;  %v1523_v23 = vadd.f32 %v2590_v9, %v1110_v8  ;;  %v2594_v63 = vunpack.c.l.bf16 %v3002_v54  ;;  %v2531_v4 = vunpack.c.h.bf16 %v2986_v53 }
 0x113   : > { %v1428_v6 = vadd.f32 %v2399_v57, %v872_v2  ;;  %v1460_v7 = vadd.f32 %v2463_v58, %v952_v3  ;;  %v2595_v5 = vunpack.c.h.bf16 %v3002_v54 }
 0x114   : > { %v1623_v34 = vmax.f32 %v1491_v16, %v3243_v61  ;;  %v1655_v35 = vmax.f32 %v1523_v23, %v3243_v61 }
 0x115   : > { %v1560_v12 = vmax.f32 %v1428_v6, %v3243_v61  ;;  %v1592_v13 = vmax.f32 %v1460_v7, %v3243_v61 }
 0x117   : > { %v2661_v17 = vpack.c.bf16 %v1560_v12, %v1559_v10  ;;  %v2741_v18 = vpack.c.bf16 %v1592_v13, %v1591_v11  ;;  %v1031_v19 = vpop.f32.mrf.mxu2  ;;  %v1111_v20 = vpop.f32.mrf.mxu3 }
 0x118   : > { %v1032_v24 = vadd.f32 %v3233_v46, %v1031_v19  ;;  %v1112_v25 = vadd.f32 %v3233_v46, %v1111_v20  ;;  %v874_v26 = vpop.f32.mrf.mxu0  ;;  %v954_v27 = vpop.f32.mrf.mxu1  ;;  %v2971_v19 = vld [vmem:[%s3224_s19 + $0xc0] sm:$0xff]  }
 0x119   : > { %3016 = vst [vmem:[%s3258_s26 + $0x30] sm:$0xff] %v2661_v17   ;;  %v875_v38 = vadd.f32 %v3233_v46, %v874_v26  ;;  %v955_v40 = vadd.f32 %v3233_v46, %v954_v27  ;;  %v2470_v27 = vunpack.c.l.bf16 %v2971_v19  ;;  %v2471_v33 = vunpack.c.h.bf16 %v2971_v19 }
 0x11a   : > { %3032 = vst [vmem:[%s3258_s26 + $0xb0] sm:$0xff] %v2741_v18   ;;  %v1492_v30 = vadd.f32 %v2527_v14, %v1032_v24  ;;  %v1524_v31 = vadd.f32 %v2591_v15, %v1112_v25  ;;  %v2955_v18 = vld [vmem:[%s3224_s19 + $0x40] sm:$0xff]  }
 0x11b   : > { %913 = vmatmul.bf16.gmra.mxu0 %v2315_v21  ;;  %993 = vmatmul.bf16.gmra.mxu1 %v2331_v22  ;;  %v1429_v51 = vadd.f32 %v2402_v39, %v875_v38  ;;  %v1461_v52 = vadd.f32 %v2466_v41, %v955_v40  ;;  %v2406_v25 = vunpack.c.l.bf16 %v2955_v18  ;;  %v2407_v32 = vunpack.c.h.bf16 %v2955_v18  ;;  %v2987_v38 = vld [vmem:[%s3224_s19 + $0x140] sm:$0xff]  }
 0x11c   : > { %v1624_v36 = vmax.f32 %v1492_v30, %v3243_v61  ;;  %v1656_v37 = vmax.f32 %v1524_v31, %v3243_v61  ;;  %1073 = vmatmul.bf16.gmra.mxu2 %v2347_v28  ;;  %1153 = vmatmul.bf16.gmra.mxu3 %v2363_v29  ;;  %v3003_v39 = vld [vmem:[%s3224_s19 + $0x1c0] sm:$0xff]   ;;  %v2535_v53 = vunpack.c.h.bf16 %v2987_v38 }
 0x11d   : > { %v1561_v0 = vmax.f32 %v1429_v51, %v3243_v61  ;;  %v1593_v1 = vmax.f32 %v1461_v52, %v3243_v61  ;;  %v2599_v54 = vunpack.c.h.bf16 %v3003_v39 }
 0x11e   : > { %v2821_v42 = vpack.c.bf16 %v1624_v36, %v1623_v34  ;;  %v2901_v43 = vpack.c.bf16 %v1656_v37, %v1655_v35 }
 0x11f   : > { %v1034_v44 = vpop.f32.mrf.mxu2  ;;  %v1114_v45 = vpop.f32.mrf.mxu3 }
 0x120   : > { %3048 = vst [vmem:[%s3258_s26 + $0x130] sm:$0xff] %v2821_v42   ;;  %v876_v49 = vpop.f32.mrf.mxu0  ;;  %v956_v50 = vpop.f32.mrf.mxu1  ;;  %v1035_v59 = vadd.f32 %v3233_v46, %v1034_v44  ;;  %v1115_v62 = vadd.f32 %v3233_v46, %v1114_v45  ;;  %v2534_v45 = vunpack.c.l.bf16 %v2987_v38 }
 0x121   : > { %3064 = vst [vmem:[%s3258_s26 + $0x1b0] sm:$0xff] %v2901_v43   ;;  %v877_v55 = vadd.f32 %v3233_v46, %v876_v49  ;;  %v957_v56 = vadd.f32 %v3233_v46, %v956_v50 }
 0x122   : > { %v1493_v10 = vadd.f32 %v2530_v60, %v1035_v59  ;;  %v1525_v11 = vadd.f32 %v2594_v63, %v1115_v62  ;;  %v3483_v60 = vld [vmem:[%s3673_s2] ss:$0 sm:$0xff] }
 0x123   : > { %v1430_v57 = vadd.f32 %v2403_v47, %v877_v55  ;;  %v1462_v58 = vadd.f32 %v2467_v48, %v957_v56  ;;  %v2598_v48 = vunpack.c.l.bf16 %v3003_v39 }
 0x124   : > { %v1625_v20 = vmax.f32 %v1493_v10, %v3243_v61  ;;  %v1657_v21 = vmax.f32 %v1525_v11, %v3243_v61 }
 0x125   : > { %v1562_v2 = vmax.f32 %v1430_v57, %v3243_v61  ;;  %v1594_v3 = vmax.f32 %v1462_v58, %v3243_v61 }
 0x127   : > { %v2666_v6 = vpack.c.bf16 %v1562_v2, %v1561_v0  ;;  %v2746_v7 = vpack.c.bf16 %v1594_v3, %v1593_v1  ;;  %v1036_v8 = vpop.f32.mrf.mxu2  ;;  %v1116_v9 = vpop.f32.mrf.mxu3 }
 0x128   : > { %v1037_v12 = vadd.f32 %v3233_v46, %v1036_v8  ;;  %v1117_v13 = vadd.f32 %v3233_v46, %v1116_v9  ;;  %v879_v14 = vpop.f32.mrf.mxu0  ;;  %v959_v15 = vpop.f32.mrf.mxu1 }
 0x129   : > { %3017 = vst [vmem:[%s3258_s26 + $0x38] sm:$0xff] %v2666_v6   ;;  %v880_v24 = vadd.f32 %v3233_v46, %v879_v14  ;;  %v960_v26 = vadd.f32 %v3233_v46, %v959_v15 }
 0x12a   : > { %3033 = vst [vmem:[%s3258_s26 + $0xb8] sm:$0xff] %v2746_v7   ;;  %v1494_v16 = vadd.f32 %v2531_v4, %v1037_v12  ;;  %v1526_v17 = vadd.f32 %v2595_v5, %v1117_v13  ;;  %v2956_v4 = vld [vmem:[%s3224_s19 + $0x48] sm:$0xff]  }
 0x12b   : > { %v1431_v36 = vadd.f32 %v2406_v25, %v880_v24  ;;  %v1463_v37 = vadd.f32 %v2470_v27, %v960_v26  ;;  %v2972_v5 = vld [vmem:[%s3224_s19 + $0xc8] sm:$0xff]   ;;  %v2410_v11 = vunpack.c.l.bf16 %v2956_v4  ;;  %v2411_v18 = vunpack.c.h.bf16 %v2956_v4 }
 0x12c   : > { %v1626_v22 = vmax.f32 %v1494_v16, %v3243_v61  ;;  %v1658_v23 = vmax.f32 %v1526_v17, %v3243_v61  ;;  %v2474_v13 = vunpack.c.l.bf16 %v2972_v5  ;;  %v2475_v19 = vunpack.c.h.bf16 %v2972_v5  ;;  %v3004_v24 = vld [vmem:[%s3224_s19 + $0x1c8] sm:$0xff]  }
 0x12d   : > { %v1563_v49 = vmax.f32 %v1431_v36, %v3243_v61  ;;  %v1595_v50 = vmax.f32 %v1463_v37, %v3243_v61  ;;  %v2603_v39 = vunpack.c.h.bf16 %v3004_v24 }
 0x12e   : > { %v2826_v28 = vpack.c.bf16 %v1626_v22, %v1625_v20  ;;  %v2906_v29 = vpack.c.bf16 %v1658_v23, %v1657_v21  ;;  %v2988_v23 = vld [vmem:[%s3224_s19 + $0x148] sm:$0xff]  }
 0x12f   : > { %v1039_v30 = vpop.f32.mrf.mxu2  ;;  %v1119_v31 = vpop.f32.mrf.mxu3  ;;  %v2539_v38 = vunpack.c.h.bf16 %v2988_v23 }
 0x130   : > { %3049 = vst [vmem:[%s3258_s26 + $0x138] sm:$0xff] %v2826_v28   ;;  %v881_v34 = vpop.f32.mrf.mxu0  ;;  %v961_v35 = vpop.f32.mrf.mxu1  ;;  %v1040_v44 = vadd.f32 %v3233_v46, %v1039_v30  ;;  %v1120_v47 = vadd.f32 %v3233_v46, %v1119_v31  ;;  %v2538_v30 = vunpack.c.l.bf16 %v2988_v23 }
 0x131   : > { %3065 = vst [vmem:[%s3258_s26 + $0x1b8] sm:$0xff] %v2906_v29   ;;  %v882_v40 = vadd.f32 %v3233_v46, %v881_v34  ;;  %v962_v41 = vadd.f32 %v3233_v46, %v961_v35 }
 0x132   : > { %v1495_v46 = vadd.f32 %v2534_v45, %v1040_v44  ;;  %v1527_v59 = vadd.f32 %v2598_v48, %v1120_v47 }
 0x133   : > { %v1432_v42 = vadd.f32 %v2407_v32, %v882_v40  ;;  %v1464_v43 = vadd.f32 %v2471_v33, %v962_v41  ;;  %v2602_v32 = vunpack.c.l.bf16 %v3004_v24  ;;  %v3508_v33 = vld [vmem:[%s3674_s3] ss:$0 sm:$0xff] }
 0x134   : > { %v1627_v6 = vmax.f32 %v1495_v46, %v3243_v61  ;;  %v1659_v7 = vmax.f32 %v1527_v59, %v3243_v61 }
 0x135   : > { %v1564_v51 = vmax.f32 %v1432_v42, %v3243_v61  ;;  %v1596_v52 = vmax.f32 %v1464_v43, %v3243_v61 }
 0x137   : > { %v2671_v55 = vpack.c.bf16 %v1564_v51, %v1563_v49  ;;  %v2751_v56 = vpack.c.bf16 %v1596_v52, %v1595_v50  ;;  %v1041_v57 = vpop.f32.mrf.mxu2  ;;  %v1121_v58 = vpop.f32.mrf.mxu3 }
 0x138   : > { %v1042_v62 = vadd.f32 %v3483_v60, %v1041_v57  ;;  %v1122_v63 = vadd.f32 %v3483_v60, %v1121_v58  ;;  %v884_v0 = vpop.f32.mrf.mxu0  ;;  %v964_v1 = vpop.f32.mrf.mxu1 }
 0x139   : > { %3018 = vst [vmem:[%s3258_s26 + $0x40] sm:$0xff] %v2671_v55   ;;  %v885_v10 = vadd.f32 %v3483_v60, %v884_v0  ;;  %v965_v12 = vadd.f32 %v3483_v60, %v964_v1 }
 0x13a   : > { %3034 = vst [vmem:[%s3258_s26 + $0xc0] sm:$0xff] %v2751_v56   ;;  %v1496_v2 = vadd.f32 %v2535_v53, %v1042_v62  ;;  %v1528_v3 = vadd.f32 %v2599_v54, %v1122_v63  ;;  %v2957_v53 = vld [vmem:[%s3224_s19 + $0x50] sm:$0xff]  }
 0x13b   : > { %v1433_v22 = vadd.f32 %v2410_v11, %v885_v10  ;;  %v2973_v54 = vld [vmem:[%s3224_s19 + $0xd0] sm:$0xff]   ;;  %v2414_v59 = vunpack.c.l.bf16 %v2957_v53  ;;  %v2415_v4 = vunpack.c.h.bf16 %v2957_v53 }
 0x13c   : > { %v1628_v8 = vmax.f32 %v1496_v2, %v3243_v61  ;;  %v1660_v9 = vmax.f32 %v1528_v3, %v3243_v61  ;;  %v1465_v61 = vadd.f32 %v2474_v13, %v965_v12  ;;  %v2478_v63 = vunpack.c.l.bf16 %v2973_v54  ;;  %v2989_v10 = vld [vmem:[%s3224_s19 + $0x150] sm:$0xff]  }
 0x13d   : > { %v1565_v34 = vmax.f32 %v1433_v22, %v3508_v33  ;;  %v2479_v5 = vunpack.c.h.bf16 %v2973_v54  ;;  %v3005_v11 = vld [vmem:[%s3224_s19 + $0x1d0] sm:$0xff]   ;;  %v2543_v23 = vunpack.c.h.bf16 %v2989_v10 }
 0x13e   : > { %v2831_v14 = vpack.c.bf16 %v1628_v8, %v1627_v6  ;;  %v2911_v15 = vpack.c.bf16 %v1660_v9, %v1659_v7  ;;  %v1597_v35 = vmax.f32 %v1465_v61, %v3508_v33  ;;  %v2607_v24 = vunpack.c.h.bf16 %v3005_v11 }
 0x13f   : > { %v1044_v16 = vpop.f32.mrf.mxu2  ;;  %v1124_v17 = vpop.f32.mrf.mxu3 }
 0x140   : > { %3050 = vst [vmem:[%s3258_s26 + $0x140] sm:$0xff] %v2831_v14   ;;  %v886_v20 = vpop.f32.mrf.mxu0  ;;  %v966_v21 = vpop.f32.mrf.mxu1  ;;  %v1045_v29 = vadd.f32 %v3483_v60, %v1044_v16  ;;  %v1125_v31 = vadd.f32 %v3483_v60, %v1124_v17  ;;  %v2542_v17 = vunpack.c.l.bf16 %v2989_v10 }
 0x141   : > { %3066 = vst [vmem:[%s3258_s26 + $0x1c0] sm:$0xff] %v2911_v15   ;;  %v887_v25 = vadd.f32 %v3483_v60, %v886_v20  ;;  %v967_v26 = vadd.f32 %v3483_v60, %v966_v21 }
 0x142   : > { %v1497_v44 = vadd.f32 %v2538_v30, %v1045_v29  ;;  %v1529_v45 = vadd.f32 %v2602_v32, %v1125_v31 }
 0x143   : > { %v1434_v27 = vadd.f32 %v2411_v18, %v887_v25  ;;  %v1466_v28 = vadd.f32 %v2475_v19, %v967_v26  ;;  %v2606_v19 = vunpack.c.l.bf16 %v3005_v11 }
 0x144   : > { %v1629_v55 = vmax.f32 %v1497_v44, %v3508_v33  ;;  %v1661_v56 = vmax.f32 %v1529_v45, %v3508_v33 }
 0x145   : > { %v1566_v36 = vmax.f32 %v1434_v27, %v3508_v33  ;;  %v1598_v37 = vmax.f32 %v1466_v28, %v3508_v33 }
 0x147   : > { %v2676_v40 = vpack.c.bf16 %v1566_v36, %v1565_v34  ;;  %v2756_v41 = vpack.c.bf16 %v1598_v37, %v1597_v35  ;;  %v1046_v42 = vpop.f32.mrf.mxu2  ;;  %v1126_v43 = vpop.f32.mrf.mxu3 }
 0x148   : > { %v1047_v47 = vadd.f32 %v3483_v60, %v1046_v42  ;;  %v1127_v48 = vadd.f32 %v3483_v60, %v1126_v43  ;;  %v889_v49 = vpop.f32.mrf.mxu0  ;;  %v969_v50 = vpop.f32.mrf.mxu1 }
 0x149   : > { %3019 = vst [vmem:[%s3258_s26 + $0x48] sm:$0xff] %v2676_v40   ;;  %v890_v46 = vadd.f32 %v3483_v60, %v889_v49  ;;  %v970_v62 = vadd.f32 %v3483_v60, %v969_v50 }
 0x14a   : > { %3035 = vst [vmem:[%s3258_s26 + $0xc8] sm:$0xff] %v2756_v41   ;;  %v1498_v51 = vadd.f32 %v2539_v38, %v1047_v47  ;;  %v1530_v52 = vadd.f32 %v2603_v39, %v1127_v48  ;;  %v2958_v38 = vld [vmem:[%s3224_s19 + $0x58] sm:$0xff]  }
 0x14b   : > { %v1435_v8 = vadd.f32 %v2414_v59, %v890_v46  ;;  %v1467_v9 = vadd.f32 %v2478_v63, %v970_v62  ;;  %v2974_v39 = vld [vmem:[%s3224_s19 + $0xd8] sm:$0xff]   ;;  %v2418_v45 = vunpack.c.l.bf16 %v2958_v38  ;;  %v2419_v53 = vunpack.c.h.bf16 %v2958_v38 }
 0x14c   : > { %v1630_v57 = vmax.f32 %v1498_v51, %v3508_v33  ;;  %v1662_v58 = vmax.f32 %v1530_v52, %v3508_v33  ;;  %v2482_v48 = vunpack.c.l.bf16 %v2974_v39  ;;  %v2483_v54 = vunpack.c.h.bf16 %v2974_v39  ;;  %v2990_v46 = vld [vmem:[%s3224_s19 + $0x158] sm:$0xff]  }
 0x14d   : > { %v1567_v20 = vmax.f32 %v1435_v8, %v3508_v33  ;;  %v1599_v21 = vmax.f32 %v1467_v9, %v3508_v33  ;;  %v3006_v59 = vld [vmem:[%s3224_s19 + $0x1d8] sm:$0xff]   ;;  %v2547_v10 = vunpack.c.h.bf16 %v2990_v46 }
 0x14e   : > { %v2836_v0 = vpack.c.bf16 %v1630_v57, %v1629_v55  ;;  %v2916_v1 = vpack.c.bf16 %v1662_v58, %v1661_v56  ;;  %v2611_v11 = vunpack.c.h.bf16 %v3006_v59 }
 0x14f   : > { %v1049_v2 = vpop.f32.mrf.mxu2  ;;  %v1129_v3 = vpop.f32.mrf.mxu3 }
 0x150   : > { %3051 = vst [vmem:[%s3258_s26 + $0x148] sm:$0xff] %v2836_v0   ;;  %v891_v6 = vpop.f32.mrf.mxu0  ;;  %v971_v7 = vpop.f32.mrf.mxu1  ;;  %v1050_v16 = vadd.f32 %v3483_v60, %v1049_v2  ;;  %v1130_v18 = vadd.f32 %v3483_v60, %v1129_v3  ;;  %v2546_v3 = vunpack.c.l.bf16 %v2990_v46 }
 0x151   : > { %3067 = vst [vmem:[%s3258_s26 + $0x1c8] sm:$0xff] %v2916_v1   ;;  %v892_v12 = vadd.f32 %v3483_v60, %v891_v6  ;;  %v972_v13 = vadd.f32 %v3483_v60, %v971_v7 }
 0x152   : > { %v1499_v29 = vadd.f32 %v2542_v17, %v1050_v16  ;;  %v1531_v30 = vadd.f32 %v2606_v19, %v1130_v18 }
 0x153   : > { %v1436_v14 = vadd.f32 %v2415_v4, %v892_v12  ;;  %v1468_v15 = vadd.f32 %v2479_v5, %v972_v13  ;;  %v2610_v5 = vunpack.c.l.bf16 %v3006_v59 }
 0x154   : > { %v1631_v40 = vmax.f32 %v1499_v29, %v3508_v33  ;;  %v1663_v41 = vmax.f32 %v1531_v30, %v3508_v33 }
 0x155   : > { %v1568_v22 = vmax.f32 %v1436_v14, %v3508_v33  ;;  %v1600_v61 = vmax.f32 %v1468_v15, %v3508_v33 }
 0x157   : > { %v2681_v25 = vpack.c.bf16 %v1568_v22, %v1567_v20  ;;  %v2761_v26 = vpack.c.bf16 %v1600_v61, %v1599_v21  ;;  %v1051_v27 = vpop.f32.mrf.mxu2  ;;  %v1131_v28 = vpop.f32.mrf.mxu3 }
 0x158   : > { %v1052_v31 = vadd.f32 %v3483_v60, %v1051_v27  ;;  %v1132_v32 = vadd.f32 %v3483_v60, %v1131_v28  ;;  %v894_v34 = vpop.f32.mrf.mxu0  ;;  %v974_v35 = vpop.f32.mrf.mxu1 }
 0x159   : > { %3020 = vst [vmem:[%s3258_s26 + $0x50] sm:$0xff] %v2681_v25   ;;  %v895_v44 = vadd.f32 %v3483_v60, %v894_v34  ;;  %v975_v47 = vadd.f32 %v3483_v60, %v974_v35 }
 0x15a   : > { %3036 = vst [vmem:[%s3258_s26 + $0xd0] sm:$0xff] %v2761_v26   ;;  %v1500_v36 = vadd.f32 %v2543_v23, %v1052_v31  ;;  %v1532_v37 = vadd.f32 %v2607_v24, %v1132_v32  ;;  %v2959_v23 = vld [vmem:[%s3224_s19 + $0x60] sm:$0xff]  }
 0x15b   : > { %v1437_v57 = vadd.f32 %v2418_v45, %v895_v44  ;;  %v1469_v58 = vadd.f32 %v2482_v48, %v975_v47  ;;  %v2975_v24 = vld [vmem:[%s3224_s19 + $0xe0] sm:$0xff]   ;;  %v2422_v30 = vunpack.c.l.bf16 %v2959_v23  ;;  %v2423_v38 = vunpack.c.h.bf16 %v2959_v23 }
 0x15c   : > { %v1632_v42 = vmax.f32 %v1500_v36, %v3508_v33  ;;  %v1664_v43 = vmax.f32 %v1532_v37, %v3508_v33  ;;  %v2486_v32 = vunpack.c.l.bf16 %v2975_v24  ;;  %v2487_v39 = vunpack.c.h.bf16 %v2975_v24  ;;  %v2991_v44 = vld [vmem:[%s3224_s19 + $0x160] sm:$0xff]  }
 0x15d   : > { %v1569_v6 = vmax.f32 %v1437_v57, %v3508_v33  ;;  %v1601_v7 = vmax.f32 %v1469_v58, %v3508_v33  ;;  %v3007_v45 = vld [vmem:[%s3224_s19 + $0x1e0] sm:$0xff]   ;;  %v2551_v46 = vunpack.c.h.bf16 %v2991_v44 }
 0x15e   : > { %v2841_v49 = vpack.c.bf16 %v1632_v42, %v1631_v40  ;;  %v2921_v50 = vpack.c.bf16 %v1664_v43, %v1663_v41  ;;  %v2615_v59 = vunpack.c.h.bf16 %v3007_v45 }
 0x15f   : > { %v1054_v51 = vpop.f32.mrf.mxu2  ;;  %v1134_v52 = vpop.f32.mrf.mxu3 }
 0x160   : > { %3052 = vst [vmem:[%s3258_s26 + $0x150] sm:$0xff] %v2841_v49   ;;  %v896_v55 = vpop.f32.mrf.mxu0  ;;  %v976_v56 = vpop.f32.mrf.mxu1  ;;  %v1055_v2 = vadd.f32 %v3483_v60, %v1054_v51  ;;  %v1135_v4 = vadd.f32 %v3483_v60, %v1134_v52  ;;  %v2550_v52 = vunpack.c.l.bf16 %v2991_v44 }
 0x161   : > { %3068 = vst [vmem:[%s3258_s26 + $0x1d0] sm:$0xff] %v2921_v50   ;;  %v897_v62 = vadd.f32 %v3483_v60, %v896_v55  ;;  %v977_v63 = vadd.f32 %v3483_v60, %v976_v56 }
 0x162   : > { %v1501_v16 = vadd.f32 %v2546_v3, %v1055_v2  ;;  %v1533_v17 = vadd.f32 %v2610_v5, %v1135_v4 }
 0x163   : > { %v1438_v0 = vadd.f32 %v2419_v53, %v897_v62  ;;  %v1470_v1 = vadd.f32 %v2483_v54, %v977_v63  ;;  %v2614_v54 = vunpack.c.l.bf16 %v3007_v45 }
 0x164   : > { %v1633_v25 = vmax.f32 %v1501_v16, %v3508_v33  ;;  %v1665_v26 = vmax.f32 %v1533_v17, %v3508_v33 }
 0x165   : > { %v1570_v8 = vmax.f32 %v1438_v0, %v3508_v33  ;;  %v1602_v9 = vmax.f32 %v1470_v1, %v3508_v33 }
 0x167   : > { %v2686_v12 = vpack.c.bf16 %v1570_v8, %v1569_v6  ;;  %v2766_v13 = vpack.c.bf16 %v1602_v9, %v1601_v7  ;;  %v1056_v14 = vpop.f32.mrf.mxu2  ;;  %v1136_v15 = vpop.f32.mrf.mxu3 }
 0x168   : > { %v1057_v18 = vadd.f32 %v3483_v60, %v1056_v14  ;;  %v1137_v19 = vadd.f32 %v3483_v60, %v1136_v15  ;;  %v899_v20 = vpop.f32.mrf.mxu0  ;;  %v979_v21 = vpop.f32.mrf.mxu1 }
 0x169   : > { %3021 = vst [vmem:[%s3258_s26 + $0x58] sm:$0xff] %v2686_v12   ;;  %v900_v29 = vadd.f32 %v3483_v60, %v899_v20  ;;  %v980_v31 = vadd.f32 %v3483_v60, %v979_v21 }
 0x16a   : > { %3037 = vst [vmem:[%s3258_s26 + $0xd8] sm:$0xff] %v2766_v13   ;;  %v1502_v22 = vadd.f32 %v2547_v10, %v1057_v18  ;;  %v1534_v61 = vadd.f32 %v2611_v11, %v1137_v19  ;;  %v2960_v10 = vld [vmem:[%s3224_s19 + $0x68] sm:$0xff]  }
 0x16b   : > { %v1439_v42 = vadd.f32 %v2422_v30, %v900_v29  ;;  %v1471_v43 = vadd.f32 %v2486_v32, %v980_v31  ;;  %v2976_v11 = vld [vmem:[%s3224_s19 + $0xe8] sm:$0xff]   ;;  %v2426_v17 = vunpack.c.l.bf16 %v2960_v10  ;;  %v2427_v23 = vunpack.c.h.bf16 %v2960_v10 }
 0x16c   : > { %v1634_v27 = vmax.f32 %v1502_v22, %v3508_v33  ;;  %v1666_v28 = vmax.f32 %v1534_v61, %v3508_v33  ;;  %v2490_v19 = vunpack.c.l.bf16 %v2976_v11  ;;  %v2491_v24 = vunpack.c.h.bf16 %v2976_v11  ;;  %v2992_v29 = vld [vmem:[%s3224_s19 + $0x168] sm:$0xff]  }
 0x16d   : > { %v1571_v55 = vmax.f32 %v1439_v42, %v3508_v33  ;;  %v1603_v56 = vmax.f32 %v1471_v43, %v3508_v33  ;;  %v3008_v30 = vld [vmem:[%s3224_s19 + $0x1e8] sm:$0xff]   ;;  %v2555_v44 = vunpack.c.h.bf16 %v2992_v29 }
 0x16e   : > { %v2846_v34 = vpack.c.bf16 %v1634_v27, %v1633_v25  ;;  %v2926_v35 = vpack.c.bf16 %v1666_v28, %v1665_v26  ;;  %v2619_v45 = vunpack.c.h.bf16 %v3008_v30 }
 0x16f   : > { %v1059_v36 = vpop.f32.mrf.mxu2  ;;  %v1139_v37 = vpop.f32.mrf.mxu3 }
 0x170   : > { %3053 = vst [vmem:[%s3258_s26 + $0x158] sm:$0xff] %v2846_v34   ;;  %v901_v40 = vpop.f32.mrf.mxu0  ;;  %v981_v41 = vpop.f32.mrf.mxu1  ;;  %v1060_v51 = vadd.f32 %v3483_v60, %v1059_v36  ;;  %v1140_v53 = vadd.f32 %v3483_v60, %v1139_v37  ;;  %v2554_v37 = vunpack.c.l.bf16 %v2992_v29 }
 0x171   : > { %3069 = vst [vmem:[%s3258_s26 + $0x1d8] sm:$0xff] %v2926_v35   ;;  %v902_v47 = vadd.f32 %v3483_v60, %v901_v40  ;;  %v982_v48 = vadd.f32 %v3483_v60, %v981_v41 }
 0x172   : > { %v1503_v2 = vadd.f32 %v2550_v52, %v1060_v51  ;;  %v1535_v3 = vadd.f32 %v2614_v54, %v1140_v53 }
 0x173   : > { %v1440_v49 = vadd.f32 %v2423_v38, %v902_v47  ;;  %v1472_v50 = vadd.f32 %v2487_v39, %v982_v48  ;;  %v2618_v39 = vunpack.c.l.bf16 %v3008_v30 }
 0x174   : > { %v1635_v12 = vmax.f32 %v1503_v2, %v3508_v33  ;;  %v1667_v13 = vmax.f32 %v1535_v3, %v3508_v33 }
 0x175   : > { %v1572_v57 = vmax.f32 %v1440_v49, %v3508_v33  ;;  %v1604_v58 = vmax.f32 %v1472_v50, %v3508_v33 }
 0x177   : > { %v2691_v62 = vpack.c.bf16 %v1572_v57, %v1571_v55  ;;  %v2771_v63 = vpack.c.bf16 %v1604_v58, %v1603_v56  ;;  %v1061_v0 = vpop.f32.mrf.mxu2  ;;  %v1141_v1 = vpop.f32.mrf.mxu3 }
 0x178   : > { %v1062_v4 = vadd.f32 %v3483_v60, %v1061_v0  ;;  %v1142_v5 = vadd.f32 %v3483_v60, %v1141_v1  ;;  %v904_v6 = vpop.f32.mrf.mxu0  ;;  %v984_v7 = vpop.f32.mrf.mxu1 }
 0x179   : > { %3022 = vst [vmem:[%s3258_s26 + $0x60] sm:$0xff] %v2691_v62   ;;  %v905_v16 = vadd.f32 %v3483_v60, %v904_v6  ;;  %v985_v18 = vadd.f32 %v3483_v60, %v984_v7 }
 0x17a   : > { %3038 = vst [vmem:[%s3258_s26 + $0xe0] sm:$0xff] %v2771_v63   ;;  %v1504_v8 = vadd.f32 %v2551_v46, %v1062_v4  ;;  %v1536_v9 = vadd.f32 %v2615_v59, %v1142_v5  ;;  %v2961_v46 = vld [vmem:[%s3224_s19 + $0x70] sm:$0xff]  }
 0x17b   : > { %v1441_v27 = vadd.f32 %v2426_v17, %v905_v16  ;;  %v1473_v28 = vadd.f32 %v2490_v19, %v985_v18  ;;  %v2977_v59 = vld [vmem:[%s3224_s19 + $0xf0] sm:$0xff]   ;;  %v2430_v3 = vunpack.c.l.bf16 %v2961_v46  ;;  %v2431_v10 = vunpack.c.h.bf16 %v2961_v46 }
 0x17c   : > { %v1636_v14 = vmax.f32 %v1504_v8, %v3508_v33  ;;  %v1668_v15 = vmax.f32 %v1536_v9, %v3508_v33  ;;  %v2494_v5 = vunpack.c.l.bf16 %v2977_v59  ;;  %v2495_v11 = vunpack.c.h.bf16 %v2977_v59  ;;  %v2993_v16 = vld [vmem:[%s3224_s19 + $0x170] sm:$0xff]  }
 0x17d   : > { %v1573_v40 = vmax.f32 %v1441_v27, %v3508_v33  ;;  %v1605_v41 = vmax.f32 %v1473_v28, %v3508_v33  ;;  %v3009_v17 = vld [vmem:[%s3224_s19 + $0x1f0] sm:$0xff]   ;;  %v2559_v29 = vunpack.c.h.bf16 %v2993_v16 }
 0x17e   : > { %v2851_v20 = vpack.c.bf16 %v1636_v14, %v1635_v12  ;;  %v2931_v21 = vpack.c.bf16 %v1668_v15, %v1667_v13  ;;  %v2623_v30 = vunpack.c.h.bf16 %v3009_v17 }
 0x17f   : > { %v1064_v22 = vpop.f32.mrf.mxu2  ;;  %v1144_v61 = vpop.f32.mrf.mxu3 }
 0x180   : > { %3054 = vst [vmem:[%s3258_s26 + $0x160] sm:$0xff] %v2851_v20   ;;  %v906_v25 = vpop.f32.mrf.mxu0  ;;  %v986_v26 = vpop.f32.mrf.mxu1  ;;  %v1065_v36 = vadd.f32 %v3483_v60, %v1064_v22  ;;  %v1145_v38 = vadd.f32 %v3483_v60, %v1144_v61  ;;  %v2558_v61 = vunpack.c.l.bf16 %v2993_v16 }
 0x181   : > { %3070 = vst [vmem:[%s3258_s26 + $0x1e0] sm:$0xff] %v2931_v21   ;;  %v907_v31 = vadd.f32 %v3483_v60, %v906_v25  ;;  %v987_v32 = vadd.f32 %v3483_v60, %v986_v26 }
 0x182   : > { %v1505_v51 = vadd.f32 %v2554_v37, %v1065_v36  ;;  %v1537_v52 = vadd.f32 %v2618_v39, %v1145_v38 }
 0x183   : > { %v1442_v34 = vadd.f32 %v2427_v23, %v907_v31  ;;  %v1474_v35 = vadd.f32 %v2491_v24, %v987_v32  ;;  %v2622_v24 = vunpack.c.l.bf16 %v3009_v17 }
 0x184   : > { %v1637_v62 = vmax.f32 %v1505_v51, %v3508_v33  ;;  %v1669_v63 = vmax.f32 %v1537_v52, %v3508_v33 }
 0x185   : > { %v1574_v42 = vmax.f32 %v1442_v34, %v3508_v33  ;;  %v1606_v43 = vmax.f32 %v1474_v35, %v3508_v33 }
 0x187   : > { %v2696_v47 = vpack.c.bf16 %v1574_v42, %v1573_v40  ;;  %v2776_v48 = vpack.c.bf16 %v1606_v43, %v1605_v41  ;;  %v1066_v49 = vpop.f32.mrf.mxu2  ;;  %v1146_v50 = vpop.f32.mrf.mxu3 }
 0x188   : > { %v1067_v53 = vadd.f32 %v3483_v60, %v1066_v49  ;;  %v1147_v54 = vadd.f32 %v3483_v60, %v1146_v50  ;;  %v909_v55 = vpop.f32.mrf.mxu0  ;;  %v989_v56 = vpop.f32.mrf.mxu1 }
 0x189   : > { %3023 = vst [vmem:[%s3258_s26 + $0x68] sm:$0xff] %v2696_v47   ;;  %v910_v2 = vadd.f32 %v3483_v60, %v909_v55  ;;  %v990_v4 = vadd.f32 %v3483_v60, %v989_v56 }
 0x18a   : > { %3039 = vst [vmem:[%s3258_s26 + $0xe8] sm:$0xff] %v2776_v48   ;;  %v1506_v57 = vadd.f32 %v2555_v44, %v1067_v53  ;;  %v1538_v58 = vadd.f32 %v2619_v45, %v1147_v54  ;;  %v2962_v44 = vld [vmem:[%s3224_s19 + $0x78] sm:$0xff]  }
 0x18b   : > { %v1443_v14 = vadd.f32 %v2430_v3, %v910_v2  ;;  %v1475_v15 = vadd.f32 %v2494_v5, %v990_v4  ;;  %v2978_v45 = vld [vmem:[%s3224_s19 + $0xf8] sm:$0xff]   ;;  %v2434_v52 = vunpack.c.l.bf16 %v2962_v44  ;;  %v2435_v46 = vunpack.c.h.bf16 %v2962_v44 }
 0x18c   : > { %v1638_v0 = vmax.f32 %v1506_v57, %v3508_v33  ;;  %v1670_v1 = vmax.f32 %v1538_v58, %v3508_v33  ;;  %v2498_v54 = vunpack.c.l.bf16 %v2978_v45  ;;  %v2499_v59 = vunpack.c.h.bf16 %v2978_v45  ;;  %v2994_v2 = vld [vmem:[%s3224_s19 + $0x178] sm:$0xff]  }
 0x18d   : > { %v1575_v25 = vmax.f32 %v1443_v14, %v3508_v33  ;;  %v1607_v26 = vmax.f32 %v1475_v15, %v3508_v33  ;;  %v3010_v3 = vld [vmem:[%s3224_s19 + $0x1f8] sm:$0xff]   ;;  %v2563_v16 = vunpack.c.h.bf16 %v2994_v2 }
 0x18e   : > { %v2856_v6 = vpack.c.bf16 %v1638_v0, %v1637_v62  ;;  %v2936_v7 = vpack.c.bf16 %v1670_v1, %v1669_v63  ;;  %v2627_v17 = vunpack.c.h.bf16 %v3010_v3 }
 0x18f   : > { %v1069_v8 = vpop.f32.mrf.mxu2  ;;  %v1149_v9 = vpop.f32.mrf.mxu3 }
 0x190   : > { %3055 = vst [vmem:[%s3258_s26 + $0x168] sm:$0xff] %v2856_v6   ;;  %v911_v12 = vpop.f32.mrf.mxu0  ;;  %v991_v13 = vpop.f32.mrf.mxu1  ;;  %v1070_v22 = vadd.f32 %v3483_v60, %v1069_v8  ;;  %v1150_v23 = vadd.f32 %v3483_v60, %v1149_v9  ;;  %v2562_v9 = vunpack.c.l.bf16 %v2994_v2 }
 0x191   : > { %3071 = vst [vmem:[%s3258_s26 + $0x1e8] sm:$0xff] %v2936_v7   ;;  %v912_v18 = vadd.f32 %v3483_v60, %v911_v12  ;;  %v992_v19 = vadd.f32 %v3483_v60, %v991_v13 }
 0x192   : > { %v1507_v36 = vadd.f32 %v2558_v61, %v1070_v22  ;;  %v1539_v37 = vadd.f32 %v2622_v24, %v1150_v23 }
 0x193   : > { %v1444_v20 = vadd.f32 %v2431_v10, %v912_v18  ;;  %v1476_v21 = vadd.f32 %v2495_v11, %v992_v19  ;;  %v2626_v11 = vunpack.c.l.bf16 %v3010_v3 }
 0x194   : > { %v1639_v47 = vmax.f32 %v1507_v36, %v3508_v33  ;;  %v1671_v48 = vmax.f32 %v1539_v37, %v3508_v33 }
 0x195   : > { %v1576_v27 = vmax.f32 %v1444_v20, %v3508_v33  ;;  %v1608_v28 = vmax.f32 %v1476_v21, %v3508_v33 }
 0x197   : > { %v2701_v31 = vpack.c.bf16 %v1576_v27, %v1575_v25  ;;  %v2781_v32 = vpack.c.bf16 %v1608_v28, %v1607_v26  ;;  %v1071_v34 = vpop.f32.mrf.mxu2  ;;  %v1151_v35 = vpop.f32.mrf.mxu3 }
 0x198   : > { %v1072_v38 = vadd.f32 %v3483_v60, %v1071_v34  ;;  %v1152_v39 = vadd.f32 %v3483_v60, %v1151_v35  ;;  %v914_v40 = vpop.f32.mrf.mxu0  ;;  %v994_v41 = vpop.f32.mrf.mxu1 }
 0x199   : > { %3024 = vst [vmem:[%s3258_s26 + $0x70] sm:$0xff] %v2701_v31   ;;  %v915_v51 = vadd.f32 %v3483_v60, %v914_v40  ;;  %v995_v53 = vadd.f32 %v3483_v60, %v994_v41 }
 0x19a   : > { %3040 = vst [vmem:[%s3258_s26 + $0xf0] sm:$0xff] %v2781_v32   ;;  %v1508_v42 = vadd.f32 %v2559_v29, %v1072_v38  ;;  %v1540_v43 = vadd.f32 %v2623_v30, %v1152_v39 }
 0x19b   : > { %v1445_v0 = vadd.f32 %v2434_v52, %v915_v51  ;;  %v1477_v1 = vadd.f32 %v2498_v54, %v995_v53 }
 0x19c   : > { %v1640_v49 = vmax.f32 %v1508_v42, %v3508_v33  ;;  %v1672_v50 = vmax.f32 %v1540_v43, %v3508_v33 }
 0x19d   : > { %v1577_v12 = vmax.f32 %v1445_v0, %v3508_v33  ;;  %v1609_v13 = vmax.f32 %v1477_v1, %v3508_v33 }
 0x19e   : > { %v2861_v55 = vpack.c.bf16 %v1640_v49, %v1639_v47  ;;  %v2941_v56 = vpack.c.bf16 %v1672_v50, %v1671_v48 }
 0x19f   : > { %v1074_v57 = vpop.f32.mrf.mxu2  ;;  %v1154_v58 = vpop.f32.mrf.mxu3 }
 0x1a0   : > { %3056 = vst [vmem:[%s3258_s26 + $0x170] sm:$0xff] %v2861_v55   ;;  %v916_v62 = vpop.f32.mrf.mxu0  ;;  %v996_v63 = vpop.f32.mrf.mxu1  ;;  %v1075_v8 = vadd.f32 %v3483_v60, %v1074_v57  ;;  %v1155_v10 = vadd.f32 %v3483_v60, %v1154_v58 }
 0x1a1   : > { %3072 = vst [vmem:[%s3258_s26 + $0x1f0] sm:$0xff] %v2941_v56   ;;  %v917_v4 = vadd.f32 %v3483_v60, %v916_v62  ;;  %v997_v5 = vadd.f32 %v3483_v60, %v996_v63 }
 0x1a2   : > { %v1509_v22 = vadd.f32 %v2562_v9, %v1075_v8  ;;  %v1541_v61 = vadd.f32 %v2626_v11, %v1155_v10 }
 0x1a3   : > { %v1446_v6 = vadd.f32 %v2435_v46, %v917_v4  ;;  %v1478_v7 = vadd.f32 %v2499_v59, %v997_v5 }
 0x1a4   : > { %v1641_v27 = vmax.f32 %v1509_v22, %v3508_v33  ;;  %v1673_v28 = vmax.f32 %v1541_v61, %v3508_v33 }
 0x1a5   : > { %v1578_v14 = vmax.f32 %v1446_v6, %v3508_v33  ;;  %v1610_v15 = vmax.f32 %v1478_v7, %v3508_v33 }
 0x1a7   : > { %v2706_v18 = vpack.c.bf16 %v1578_v14, %v1577_v12  ;;  %v2786_v19 = vpack.c.bf16 %v1610_v15, %v1609_v13  ;;  %v1076_v20 = vpop.f32.mrf.mxu2  ;;  %v1156_v21 = vpop.f32.mrf.mxu3 }
 0x1a8   : > { %v1077_v23 = vadd.f32 %v3483_v60, %v1076_v20  ;;  %v1157_v24 = vadd.f32 %v3483_v60, %v1156_v21 }
 0x1a9   : > { %3025 = vst [vmem:[%s3258_s26 + $0x78] sm:$0xff] %v2706_v18  }
 0x1aa   : > { %3041 = vst [vmem:[%s3258_s26 + $0xf8] sm:$0xff] %v2786_v19   ;;  %v1510_v25 = vadd.f32 %v2563_v16, %v1077_v23  ;;  %v1542_v26 = vadd.f32 %v2627_v17, %v1157_v24 }
 0x1ac   : > { %v1642_v29 = vmax.f32 %v1510_v25, %v3508_v33  ;;  %v1674_v30 = vmax.f32 %v1542_v26, %v3508_v33 }
 0x1ae   : > { %v2866_v31 = vpack.c.bf16 %v1642_v29, %v1641_v27  ;;  %v2946_v32 = vpack.c.bf16 %v1674_v30, %v1673_v28 }
 0x1b0   : > { %3057 = vst [vmem:[%s3258_s26 + $0x178] sm:$0xff] %v2866_v31  }
 0x1b1   : > { %3073 = vst [vmem:[%s3258_s26 + $0x1f8] sm:$0xff] %v2946_v32  }
 0x1b2 PF: > { %s15_s18 = sadd.s32 1, %s3116_s18  }
 0x1b3   : > { %p12_p4 = scmp.ge.s32.totalorder %s15_s18, 4  }
 0x1b5   :  { %14 = sbr.rel (!%p12_p4) target bundleno = 1 (0x1), region = 73 }

// kernel: _lambda_.10
= control target key start
LH: loop header
LB: loop body
LE: loop exit
PB: predicated region body
PF: predicated region fallthrough
CT: control target
= control target key end

     0   :  { %s1033_s15 = smov 0   ;;  %s1346_s0 = inlined_call_operand.vmem [shape: bf16[512,128], index: 0, kind: input, shape index: {}]   ;;  %s1347_s1 = inlined_call_operand.vmem [shape: bf16[128,256], index: 1, kind: input, shape index: {}]   ;;  %s1348_s2 = inlined_call_operand.vmem [shape: f32[1,256], index: 2, kind: input, shape index: {}]   ;;  %s1349_s3 = inlined_call_operand.vmem [shape: f32[1,256], index: 3, kind: input, shape index: {}]   ;;  %s1350_s4 = inlined_call_operand.vmem [shape: bf16[512,256], index: 4, kind: output, shape index: {}]  }
   0x1 LB: > { %s803_s16 = sadd.s32 4294967295, %s1006_s15   ;;  %p807_p0 = scmp.ge.s32.totalorder %s1006_s15, 1  ;;  %s1006_s15 = sphi %s1033_s15, %s14_s15  }
   0x2   : > { %p163_p1 = scmp.lt.s32.totalorder %s1006_s15, 3 }
   0x4   : > { %p164_p2 = pnand %p807_p0, %p163_p1 }
   0x5   : > { %s808_s7 = sshll.u32 (!%p164_p2), %s803_s16, 5 }
   0x6   : > { %167 = sbr.rel (%p164_p2) target bundleno = 305 (0x131), region = 36  ;;  %p191_p3 = scmp.lt.s32.totalorder (!%p164_p2), %s808_s7, 63 }
   0xb   : > { %v935_v0 = vld [vmem:[%s1347_s1 + $0x70] sm:$0xf]  ;;  %v975_v1 = vld [vmem:[%s1347_s1 + $0x74] sm:$0xf0]  ;;  %v974_v2 = vld [vmem:[%s1347_s1 + $0x74] sm:$0xf] }
   0xc   : > { %v936_v3 = vor.u32 %v975_v1, %v935_v0  ;;  %v937_v4 = vld [vmem:[%s1347_s1 + $0x78] sm:$0xf0]  ;;  %v927_v5 = vld [vmem:[%s1347_s1 + $0x60] sm:$0xf]  ;;  %v973_v6 = vld [vmem:[%s1347_s1 + $0x64] sm:$0xf0] }
   0xd   : > { %v940_v7 = vor.u32 %v974_v2, %v937_v4  ;;  %v972_v8 = vld [vmem:[%s1347_s1 + $0x64] sm:$0xf]  ;;  %v929_v9 = vld [vmem:[%s1347_s1 + $0x68] sm:$0xf0]  ;;  %v928_v10 = vor.u32 %v973_v6, %v927_v5  ;;  %v919_v12 = vld [vmem:[%s1347_s1 + $0x50] sm:$0xf] }
   0xe   : > { %433 = vmatpush.bf16.msra.mxu0 %v936_v3  ;;  %976 = vmatpush.bf16.msra.mxu2 %v936_v3  ;;  %v932_v11 = vor.u32 %v972_v8, %v929_v9  ;;  %v971_v13 = vld [vmem:[%s1347_s1 + $0x54] sm:$0xf0]  ;;  %v970_v14 = vld [vmem:[%s1347_s1 + $0x54] sm:$0xf]  ;;  %v921_v15 = vld [vmem:[%s1347_s1 + $0x58] sm:$0xf0] }
   0xf   : > { %522 = vmatpush.bf16.msra.mxu1 %v940_v7  ;;  %984 = vmatpush.bf16.msra.mxu3 %v940_v7  ;;  %v920_v16 = vor.u32 %v971_v13, %v919_v12  ;;  %v924_v17 = vor.u32 %v970_v14, %v921_v15  ;;  %v911_v18 = vld [vmem:[%s1347_s1 + $0x40] sm:$0xf]  ;;  %v969_v19 = vld [vmem:[%s1347_s1 + $0x44] sm:$0xf0]  ;;  %v968_v20 = vld [vmem:[%s1347_s1 + $0x44] sm:$0xf] }
  0x10   : > { %v913_v21 = vld [vmem:[%s1347_s1 + $0x48] sm:$0xf0]  ;;  %v912_v22 = vor.u32 %v969_v19, %v911_v18  ;;  %v903_v24 = vld [vmem:[%s1347_s1 + $0x30] sm:$0xf]  ;;  %v967_v25 = vld [vmem:[%s1347_s1 + $0x34] sm:$0xf0] }
  0x11   : > { %v916_v23 = vor.u32 %v968_v20, %v913_v21  ;;  %v966_v26 = vld [vmem:[%s1347_s1 + $0x34] sm:$0xf]  ;;  %v905_v27 = vld [vmem:[%s1347_s1 + $0x38] sm:$0xf0]  ;;  %v904_v28 = vor.u32 %v967_v25, %v903_v24  ;;  %v895_v30 = vld [vmem:[%s1347_s1 + $0x20] sm:$0xf] }
  0x12   : > { %434 = vmatpush.bf16.msra.mxu0 %v928_v10  ;;  %977 = vmatpush.bf16.msra.mxu2 %v928_v10  ;;  %v908_v29 = vor.u32 %v966_v26, %v905_v27  ;;  %v965_v31 = vld [vmem:[%s1347_s1 + $0x24] sm:$0xf0]  ;;  %v964_v32 = vld [vmem:[%s1347_s1 + $0x24] sm:$0xf]  ;;  %v897_v33 = vld [vmem:[%s1347_s1 + $0x28] sm:$0xf0] }
  0x13   : > { %523 = vmatpush.bf16.msra.mxu1 %v932_v11  ;;  %985 = vmatpush.bf16.msra.mxu3 %v932_v11  ;;  %v896_v34 = vor.u32 %v965_v31, %v895_v30  ;;  %v900_v35 = vor.u32 %v964_v32, %v897_v33  ;;  %v887_v36 = vld [vmem:[%s1347_s1 + $0x10] sm:$0xf]  ;;  %v963_v37 = vld [vmem:[%s1347_s1 + $0x14] sm:$0xf0]  ;;  %s1352_s7 = smov (!%p191_p3, %s808_s7), 63 }
  0x14   : > { %v962_v38 = vld [vmem:[%s1347_s1 + $0x14] sm:$0xf]  ;;  %v889_v39 = vld [vmem:[%s1347_s1 + $0x18] sm:$0xf0]  ;;  %v888_v40 = vor.u32 %v963_v37, %v887_v36  ;;  %v879_v42 = vld [vmem:[%s1347_s1] sm:$0xf] }
  0x15   : > { %v892_v41 = vor.u32 %v962_v38, %v889_v39  ;;  %v961_v43 = vld [vmem:[%s1347_s1 + $0x4] sm:$0xf0]  ;;  %s809_s29 = sshll.u32 %s1352_s7, 2  ;;  %v960_v44 = vld [vmem:[%s1347_s1 + $0x4] sm:$0xf]  ;;  %s943_s17 = sshll.u32 %s1352_s7, 3 }
  0x16   : > { %435 = vmatpush.bf16.msra.mxu0 %v920_v16  ;;  %978 = vmatpush.bf16.msra.mxu2 %v920_v16  ;;  %v881_v45 = vld [vmem:[%s1347_s1 + $0x8] sm:$0xf0]  ;;  %v880_v46 = vor.u32 %v961_v43, %v879_v42  ;;  %s1145_s11 = scalar_lea.vmem %s1346_s0, %s809_s29  ;;  %v251_v0 = vld [vmem:[%s1348_s2] sm:$0x3]  ;;  %s1185_s20 = scalar_lea.vmem %s1350_s4, %s943_s17 }
  0x17   : > { %524 = vmatpush.bf16.msra.mxu1 %v924_v17  ;;  %986 = vmatpush.bf16.msra.mxu3 %v924_v17  ;;  %v884_v47 = vor.u32 %v960_v44, %v881_v45  ;;  %v944_v48 = vld [vmem:[%s1145_s11] sm:$0xff]  ;;  %v945_v50 = vld [vmem:[%s1145_s11 + $0x8] sm:$0xff]  ;;  %v946_v52 = vld [vmem:[%s1145_s11 + $0x10] sm:$0xff]  ;;  %v1169_v2 = vperm.slane %v251_v0, 0  ;;  %v1171_v3 = vperm.slane %v251_v0, 1 }
  0x18   : > { %v952_v49 = vld [vmem:[%s1145_s11 + $0x40] sm:$0xff]  ;;  %v953_v51 = vld [vmem:[%s1145_s11 + $0x48] sm:$0xff]  ;;  %v954_v53 = vld [vmem:[%s1145_s11 + $0x50] sm:$0xff] }
  0x19   : > { %v947_v54 = vld [vmem:[%s1145_s11 + $0x18] sm:$0xff]  ;;  %v948_v56 = vld [vmem:[%s1145_s11 + $0x20] sm:$0xff]  ;;  %v949_v58 = vld [vmem:[%s1145_s11 + $0x28] sm:$0xff] }
  0x1a   : > { %436 = vmatpush.bf16.msra.mxu0 %v912_v22  ;;  %979 = vmatpush.bf16.msra.mxu2 %v912_v22  ;;  %v955_v55 = vld [vmem:[%s1145_s11 + $0x58] sm:$0xff]  ;;  %v956_v57 = vld [vmem:[%s1145_s11 + $0x60] sm:$0xff]  ;;  %v957_v59 = vld [vmem:[%s1145_s11 + $0x68] sm:$0xff] }
  0x1b   : > { %525 = vmatpush.bf16.msra.mxu1 %v916_v23  ;;  %987 = vmatpush.bf16.msra.mxu3 %v916_v23  ;;  %v950_v60 = vld [vmem:[%s1145_s11 + $0x30] sm:$0xff]  ;;  %v951_v62 = vld [vmem:[%s1145_s11 + $0x38] sm:$0xff]  ;;  %v611_v1 = vld [vmem:[%s1349_s3] sm:$0x3] }
  0x1c   : > { %v958_v61 = vld [vmem:[%s1145_s11 + $0x70] sm:$0xff]  ;;  %v959_v63 = vld [vmem:[%s1145_s11 + $0x78] sm:$0xff]  ;;  %v1173_v4 = vperm.slane %v611_v1, 0  ;;  %v1175_v6 = vperm.slane %v611_v1, 1 }
  0x1e   : > { %437 = vmatpush.bf16.msra.mxu0 %v904_v28  ;;  %980 = vmatpush.bf16.msra.mxu2 %v904_v28 }
  0x1f   : > { %526 = vmatpush.bf16.msra.mxu1 %v908_v29  ;;  %988 = vmatpush.bf16.msra.mxu3 %v908_v29 }
  0x22   : > { %438 = vmatpush.bf16.msra.mxu0 %v896_v34  ;;  %981 = vmatpush.bf16.msra.mxu2 %v896_v34 }
  0x23   : > { %527 = vmatpush.bf16.msra.mxu1 %v900_v35  ;;  %989 = vmatpush.bf16.msra.mxu3 %v900_v35 }
  0x26   : > { %439 = vmatpush.bf16.msra.mxu0 %v888_v40  ;;  %982 = vmatpush.bf16.msra.mxu2 %v888_v40 }
  0x27   : > { %528 = vmatpush.bf16.msra.mxu1 %v892_v41  ;;  %990 = vmatpush.bf16.msra.mxu3 %v892_v41 }
  0x2a   : > { %440 = vmatpush.bf16.msra.mxu0 %v880_v46  ;;  %983 = vmatpush.bf16.msra.mxu2 %v880_v46 }
  0x2b   : > { %529 = vmatpush.bf16.msra.mxu1 %v884_v47  ;;  %991 = vmatpush.bf16.msra.mxu3 %v884_v47 }
  0x2d   : > { %441 = vmatmul.bf16.vlgmr.msra.gmra.mxu0 %v944_v48  ;;  %481 = vmatmul.bf16.vlgmr.msra.gmra.mxu2 %v952_v49 }
  0x2e   : > { %530 = vmatmul.bf16.vlgmr.msra.gmra.mxu1 %v944_v48  ;;  %570 = vmatmul.bf16.vlgmr.msra.gmra.mxu3 %v952_v49 }
  0x3d   : > { %446 = vmatmul.bf16.gmra.mxu0 %v945_v50  ;;  %486 = vmatmul.bf16.gmra.mxu2 %v953_v51 }
  0x3e   : > { %535 = vmatmul.bf16.gmra.mxu1 %v945_v50  ;;  %575 = vmatmul.bf16.gmra.mxu3 %v953_v51 }
  0x4d   : > { %451 = vmatmul.bf16.gmra.mxu0 %v946_v52  ;;  %491 = vmatmul.bf16.gmra.mxu2 %v954_v53 }
  0x4e   : > { %540 = vmatmul.bf16.gmra.mxu1 %v946_v52  ;;  %580 = vmatmul.bf16.gmra.mxu3 %v954_v53 }
  0x5d   : > { %456 = vmatmul.bf16.gmra.mxu0 %v947_v54  ;;  %496 = vmatmul.bf16.gmra.mxu2 %v955_v55 }
  0x5e   : > { %545 = vmatmul.bf16.gmra.mxu1 %v947_v54  ;;  %585 = vmatmul.bf16.gmra.mxu3 %v955_v55 }
  0x6d   : > { %461 = vmatmul.bf16.gmra.mxu0 %v948_v56  ;;  %501 = vmatmul.bf16.gmra.mxu2 %v956_v57 }
  0x6e   : > { %550 = vmatmul.bf16.gmra.mxu1 %v948_v56  ;;  %590 = vmatmul.bf16.gmra.mxu3 %v956_v57 }
  0x7d   : > { %466 = vmatmul.bf16.gmra.mxu0 %v949_v58  ;;  %506 = vmatmul.bf16.gmra.mxu2 %v957_v59 }
  0x7e   : > { %555 = vmatmul.bf16.gmra.mxu1 %v949_v58  ;;  %595 = vmatmul.bf16.gmra.mxu3 %v957_v59 }
  0x8d   : > { %471 = vmatmul.bf16.gmra.mxu0 %v950_v60  ;;  %511 = vmatmul.bf16.gmra.mxu2 %v958_v61 }
  0x8e   : > { %560 = vmatmul.bf16.gmra.mxu1 %v950_v60  ;;  %600 = vmatmul.bf16.gmra.mxu3 %v958_v61 }
  0x9d   : > { %476 = vmatmul.bf16.gmra.mxu0 %v951_v62  ;;  %516 = vmatmul.bf16.gmra.mxu2 %v959_v63 }
  0x9e   : > { %565 = vmatmul.bf16.gmra.mxu1 %v951_v62  ;;  %605 = vmatmul.bf16.gmra.mxu3 %v959_v63 }
  0xaa   : > { %v442_v5 = vpop.f32.mrf.mxu0 }
  0xab   : > { %v443_v7 = vadd.f32 %v442_v5, %v1169_v2  ;;  %v531_v8 = vpop.f32.mrf.mxu1 }
  0xac   : > { %v532_v9 = vadd.f32 %v531_v8, %v1171_v3 }
  0xad   : > { %v617_v10 = vmax.f32 %v443_v7, %v1173_v4 }
  0xae   : > { %v618_v11 = vmax.f32 %v532_v9, %v1175_v6 }
  0xb0   : > { %v681_v12 = vpack.c.bf16 %v618_v11, %v617_v10  ;;  %v482_v13 = vpop.f32.mrf.mxu2 }
  0xb1   : > { %v483_v14 = vadd.f32 %v482_v13, %v1169_v2  ;;  %v571_v15 = vpop.f32.mrf.mxu3 }
  0xb2   : > { %713 = vst [vmem:[%s1185_s20] sm:$0xff] %v681_v12  ;;  %v572_v16 = vadd.f32 %v571_v15, %v1171_v3  ;;  %v444_v17 = vpop.f32.mrf.mxu0 }
  0xb3   : > { %v649_v18 = vmax.f32 %v483_v14, %v1173_v4  ;;  %v445_v19 = vadd.f32 %v444_v17, %v1169_v2  ;;  %v533_v20 = vpop.f32.mrf.mxu1 }
  0xb4   : > { %v650_v21 = vmax.f32 %v572_v16, %v1175_v6  ;;  %v534_v22 = vadd.f32 %v533_v20, %v1171_v3 }
  0xb5   : > { %v619_v23 = vmax.f32 %v445_v19, %v1173_v4 }
  0xb6   : > { %v697_v24 = vpack.c.bf16 %v650_v21, %v649_v18  ;;  %v620_v25 = vmax.f32 %v534_v22, %v1175_v6 }
  0xb8   : > { %729 = vst [vmem:[%s1185_s20 + $0x80] sm:$0xff] %v697_v24  ;;  %v682_v26 = vpack.c.bf16 %v620_v25, %v619_v23  ;;  %v484_v27 = vpop.f32.mrf.mxu2 }
  0xb9   : > { %v485_v28 = vadd.f32 %v484_v27, %v1169_v2  ;;  %v573_v29 = vpop.f32.mrf.mxu3 }
  0xba   : > { %714 = vst [vmem:[%s1185_s20 + $0x8] sm:$0xff] %v682_v26  ;;  %v574_v30 = vadd.f32 %v573_v29, %v1171_v3  ;;  %v447_v31 = vpop.f32.mrf.mxu0 }
  0xbb   : > { %v651_v32 = vmax.f32 %v485_v28, %v1173_v4  ;;  %v448_v33 = vadd.f32 %v447_v31, %v1169_v2  ;;  %v536_v34 = vpop.f32.mrf.mxu1 }
  0xbc   : > { %v652_v35 = vmax.f32 %v574_v30, %v1175_v6  ;;  %v537_v36 = vadd.f32 %v536_v34, %v1171_v3 }
  0xbd   : > { %v621_v37 = vmax.f32 %v448_v33, %v1173_v4 }
  0xbe   : > { %v698_v38 = vpack.c.bf16 %v652_v35, %v651_v32  ;;  %v622_v39 = vmax.f32 %v537_v36, %v1175_v6 }
  0xc0   : > { %730 = vst [vmem:[%s1185_s20 + $0x88] sm:$0xff] %v698_v38  ;;  %v683_v40 = vpack.c.bf16 %v622_v39, %v621_v37  ;;  %v487_v41 = vpop.f32.mrf.mxu2 }
  0xc1   : > { %v488_v42 = vadd.f32 %v487_v41, %v1169_v2  ;;  %v576_v43 = vpop.f32.mrf.mxu3 }
  0xc2   : > { %715 = vst [vmem:[%s1185_s20 + $0x10] sm:$0xff] %v683_v40  ;;  %v577_v44 = vadd.f32 %v576_v43, %v1171_v3  ;;  %v449_v45 = vpop.f32.mrf.mxu0 }
  0xc3   : > { %v653_v46 = vmax.f32 %v488_v42, %v1173_v4  ;;  %v450_v47 = vadd.f32 %v449_v45, %v1169_v2  ;;  %v538_v48 = vpop.f32.mrf.mxu1 }
  0xc4   : > { %v654_v49 = vmax.f32 %v577_v44, %v1175_v6  ;;  %v539_v50 = vadd.f32 %v538_v48, %v1171_v3 }
  0xc5   : > { %v623_v51 = vmax.f32 %v450_v47, %v1173_v4 }
  0xc6   : > { %v699_v52 = vpack.c.bf16 %v654_v49, %v653_v46  ;;  %v624_v53 = vmax.f32 %v539_v50, %v1175_v6 }
  0xc8   : > { %731 = vst [vmem:[%s1185_s20 + $0x90] sm:$0xff] %v699_v52  ;;  %v684_v54 = vpack.c.bf16 %v624_v53, %v623_v51  ;;  %v489_v55 = vpop.f32.mrf.mxu2 }
  0xc9   : > { %v490_v56 = vadd.f32 %v489_v55, %v1169_v2  ;;  %v578_v57 = vpop.f32.mrf.mxu3 }
  0xca   : > { %716 = vst [vmem:[%s1185_s20 + $0x18] sm:$0xff] %v684_v54  ;;  %v579_v58 = vadd.f32 %v578_v57, %v1171_v3  ;;  %v452_v59 = vpop.f32.mrf.mxu0 }
  0xcb   : > { %v655_v60 = vmax.f32 %v490_v56, %v1173_v4  ;;  %v453_v61 = vadd.f32 %v452_v59, %v1169_v2  ;;  %v541_v62 = vpop.f32.mrf.mxu1 }
  0xcc   : > { %v656_v63 = vmax.f32 %v579_v58, %v1175_v6  ;;  %v542_v0 = vadd.f32 %v541_v62, %v1171_v3 }
  0xcd   : > { %v625_v1 = vmax.f32 %v453_v61, %v1173_v4 }
  0xce   : > { %v700_v5 = vpack.c.bf16 %v656_v63, %v655_v60  ;;  %v626_v7 = vmax.f32 %v542_v0, %v1175_v6 }
  0xd0   : > { %732 = vst [vmem:[%s1185_s20 + $0x98] sm:$0xff] %v700_v5  ;;  %v685_v8 = vpack.c.bf16 %v626_v7, %v625_v1  ;;  %v492_v9 = vpop.f32.mrf.mxu2 }
  0xd1   : > { %v493_v10 = vadd.f32 %v492_v9, %v1169_v2  ;;  %v581_v11 = vpop.f32.mrf.mxu3 }
  0xd2   : > { %717 = vst [vmem:[%s1185_s20 + $0x20] sm:$0xff] %v685_v8  ;;  %v582_v12 = vadd.f32 %v581_v11, %v1171_v3  ;;  %v454_v13 = vpop.f32.mrf.mxu0 }
  0xd3   : > { %v657_v14 = vmax.f32 %v493_v10, %v1173_v4  ;;  %v455_v15 = vadd.f32 %v454_v13, %v1169_v2  ;;  %v543_v16 = vpop.f32.mrf.mxu1 }
  0xd4   : > { %v658_v17 = vmax.f32 %v582_v12, %v1175_v6  ;;  %v544_v18 = vadd.f32 %v543_v16, %v1171_v3 }
  0xd5   : > { %v627_v19 = vmax.f32 %v455_v15, %v1173_v4 }
  0xd6   : > { %v701_v20 = vpack.c.bf16 %v658_v17, %v657_v14  ;;  %v628_v21 = vmax.f32 %v544_v18, %v1175_v6 }
  0xd8   : > { %733 = vst [vmem:[%s1185_s20 + $0xa0] sm:$0xff] %v701_v20  ;;  %v686_v22 = vpack.c.bf16 %v628_v21, %v627_v19  ;;  %v494_v23 = vpop.f32.mrf.mxu2 }
  0xd9   : > { %v495_v24 = vadd.f32 %v494_v23, %v1169_v2  ;;  %v583_v25 = vpop.f32.mrf.mxu3 }
  0xda   : > { %718 = vst [vmem:[%s1185_s20 + $0x28] sm:$0xff] %v686_v22  ;;  %v584_v26 = vadd.f32 %v583_v25, %v1171_v3  ;;  %v457_v27 = vpop.f32.mrf.mxu0 }
  0xdb   : > { %v659_v28 = vmax.f32 %v495_v24, %v1173_v4  ;;  %v458_v29 = vadd.f32 %v457_v27, %v1169_v2  ;;  %v546_v30 = vpop.f32.mrf.mxu1 }
  0xdc   : > { %v660_v31 = vmax.f32 %v584_v26, %v1175_v6  ;;  %v547_v32 = vadd.f32 %v546_v30, %v1171_v3 }
  0xdd   : > { %v629_v33 = vmax.f32 %v458_v29, %v1173_v4 }
  0xde   : > { %v702_v34 = vpack.c.bf16 %v660_v31, %v659_v28  ;;  %v630_v35 = vmax.f32 %v547_v32, %v1175_v6 }
  0xe0   : > { %734 = vst [vmem:[%s1185_s20 + $0xa8] sm:$0xff] %v702_v34  ;;  %v687_v36 = vpack.c.bf16 %v630_v35, %v629_v33  ;;  %v497_v37 = vpop.f32.mrf.mxu2 }
  0xe1   : > { %v498_v38 = vadd.f32 %v497_v37, %v1169_v2  ;;  %v586_v39 = vpop.f32.mrf.mxu3 }
  0xe2   : > { %719 = vst [vmem:[%s1185_s20 + $0x30] sm:$0xff] %v687_v36  ;;  %v587_v40 = vadd.f32 %v586_v39, %v1171_v3  ;;  %v459_v41 = vpop.f32.mrf.mxu0 }
  0xe3   : > { %v661_v42 = vmax.f32 %v498_v38, %v1173_v4  ;;  %v460_v43 = vadd.f32 %v459_v41, %v1169_v2  ;;  %v548_v44 = vpop.f32.mrf.mxu1 }
  0xe4   : > { %v662_v45 = vmax.f32 %v587_v40, %v1175_v6  ;;  %v549_v46 = vadd.f32 %v548_v44, %v1171_v3 }
  0xe5   : > { %v631_v47 = vmax.f32 %v460_v43, %v1173_v4 }
  0xe6   : > { %v703_v48 = vpack.c.bf16 %v662_v45, %v661_v42  ;;  %v632_v49 = vmax.f32 %v549_v46, %v1175_v6 }
  0xe8   : > { %735 = vst [vmem:[%s1185_s20 + $0xb0] sm:$0xff] %v703_v48  ;;  %v688_v50 = vpack.c.bf16 %v632_v49, %v631_v47  ;;  %v499_v51 = vpop.f32.mrf.mxu2 }
  0xe9   : > { %v500_v52 = vadd.f32 %v499_v51, %v1169_v2  ;;  %v588_v53 = vpop.f32.mrf.mxu3 }
  0xea   : > { %720 = vst [vmem:[%s1185_s20 + $0x38] sm:$0xff] %v688_v50  ;;  %v589_v54 = vadd.f32 %v588_v53, %v1171_v3  ;;  %v462_v55 = vpop.f32.mrf.mxu0 }
  0xeb   : > { %v663_v56 = vmax.f32 %v500_v52, %v1173_v4  ;;  %v463_v57 = vadd.f32 %v462_v55, %v1169_v2  ;;  %v551_v58 = vpop.f32.mrf.mxu1 }
  0xec   : > { %v664_v59 = vmax.f32 %v589_v54, %v1175_v6  ;;  %v552_v60 = vadd.f32 %v551_v58, %v1171_v3 }
  0xed   : > { %v633_v61 = vmax.f32 %v463_v57, %v1173_v4 }
  0xee   : > { %v704_v62 = vpack.c.bf16 %v664_v59, %v663_v56  ;;  %v634_v63 = vmax.f32 %v552_v60, %v1175_v6 }
  0xf0   : > { %736 = vst [vmem:[%s1185_s20 + $0xb8] sm:$0xff] %v704_v62  ;;  %v689_v0 = vpack.c.bf16 %v634_v63, %v633_v61  ;;  %v502_v1 = vpop.f32.mrf.mxu2 }
  0xf1   : > { %v503_v5 = vadd.f32 %v502_v1, %v1169_v2  ;;  %v591_v7 = vpop.f32.mrf.mxu3 }
  0xf2   : > { %721 = vst [vmem:[%s1185_s20 + $0x40] sm:$0xff] %v689_v0  ;;  %v592_v8 = vadd.f32 %v591_v7, %v1171_v3  ;;  %v464_v9 = vpop.f32.mrf.mxu0 }
  0xf3   : > { %v665_v10 = vmax.f32 %v503_v5, %v1173_v4  ;;  %v465_v11 = vadd.f32 %v464_v9, %v1169_v2  ;;  %v553_v12 = vpop.f32.mrf.mxu1 }
  0xf4   : > { %v666_v13 = vmax.f32 %v592_v8, %v1175_v6  ;;  %v554_v14 = vadd.f32 %v553_v12, %v1171_v3 }
  0xf5   : > { %v635_v15 = vmax.f32 %v465_v11, %v1173_v4 }
  0xf6   : > { %v705_v16 = vpack.c.bf16 %v666_v13, %v665_v10  ;;  %v636_v17 = vmax.f32 %v554_v14, %v1175_v6 }
  0xf8   : > { %737 = vst [vmem:[%s1185_s20 + $0xc0] sm:$0xff] %v705_v16  ;;  %v690_v18 = vpack.c.bf16 %v636_v17, %v635_v15  ;;  %v504_v19 = vpop.f32.mrf.mxu2 }
  0xf9   : > { %v505_v20 = vadd.f32 %v504_v19, %v1169_v2  ;;  %v593_v21 = vpop.f32.mrf.mxu3 }
  0xfa   : > { %722 = vst [vmem:[%s1185_s20 + $0x48] sm:$0xff] %v690_v18  ;;  %v594_v22 = vadd.f32 %v593_v21, %v1171_v3  ;;  %v467_v23 = vpop.f32.mrf.mxu0 }
  0xfb   : > { %v667_v24 = vmax.f32 %v505_v20, %v1173_v4  ;;  %v468_v25 = vadd.f32 %v467_v23, %v1169_v2  ;;  %v556_v26 = vpop.f32.mrf.mxu1 }
  0xfc   : > { %v668_v27 = vmax.f32 %v594_v22, %v1175_v6  ;;  %v557_v28 = vadd.f32 %v556_v26, %v1171_v3 }
  0xfd   : > { %v637_v29 = vmax.f32 %v468_v25, %v1173_v4 }
  0xfe   : > { %v706_v30 = vpack.c.bf16 %v668_v27, %v667_v24  ;;  %v638_v31 = vmax.f32 %v557_v28, %v1175_v6 }
 0x100   : > { %738 = vst [vmem:[%s1185_s20 + $0xc8] sm:$0xff] %v706_v30  ;;  %v691_v32 = vpack.c.bf16 %v638_v31, %v637_v29  ;;  %v507_v33 = vpop.f32.mrf.mxu2 }
 0x101   : > { %v508_v34 = vadd.f32 %v507_v33, %v1169_v2  ;;  %v596_v35 = vpop.f32.mrf.mxu3 }
 0x102   : > { %723 = vst [vmem:[%s1185_s20 + $0x50] sm:$0xff] %v691_v32  ;;  %v597_v36 = vadd.f32 %v596_v35, %v1171_v3  ;;  %v469_v37 = vpop.f32.mrf.mxu0 }
 0x103   : > { %v669_v38 = vmax.f32 %v508_v34, %v1173_v4  ;;  %v470_v39 = vadd.f32 %v469_v37, %v1169_v2  ;;  %v558_v40 = vpop.f32.mrf.mxu1 }
 0x104   : > { %v670_v41 = vmax.f32 %v597_v36, %v1175_v6  ;;  %v559_v42 = vadd.f32 %v558_v40, %v1171_v3 }
 0x105   : > { %v639_v43 = vmax.f32 %v470_v39, %v1173_v4 }
 0x106   : > { %v707_v44 = vpack.c.bf16 %v670_v41, %v669_v38  ;;  %v640_v45 = vmax.f32 %v559_v42, %v1175_v6 }
 0x108   : > { %739 = vst [vmem:[%s1185_s20 + $0xd0] sm:$0xff] %v707_v44  ;;  %v692_v46 = vpack.c.bf16 %v640_v45, %v639_v43  ;;  %v509_v47 = vpop.f32.mrf.mxu2 }
 0x109   : > { %v510_v48 = vadd.f32 %v509_v47, %v1169_v2  ;;  %v598_v49 = vpop.f32.mrf.mxu3 }
 0x10a   : > { %724 = vst [vmem:[%s1185_s20 + $0x58] sm:$0xff] %v692_v46  ;;  %v599_v50 = vadd.f32 %v598_v49, %v1171_v3  ;;  %v472_v51 = vpop.f32.mrf.mxu0 }
 0x10b   : > { %v671_v52 = vmax.f32 %v510_v48, %v1173_v4  ;;  %v473_v53 = vadd.f32 %v472_v51, %v1169_v2  ;;  %v561_v54 = vpop.f32.mrf.mxu1 }
 0x10c   : > { %v672_v55 = vmax.f32 %v599_v50, %v1175_v6  ;;  %v562_v56 = vadd.f32 %v561_v54, %v1171_v3 }
 0x10d   : > { %v641_v57 = vmax.f32 %v473_v53, %v1173_v4 }
 0x10e   : > { %v708_v58 = vpack.c.bf16 %v672_v55, %v671_v52  ;;  %v642_v59 = vmax.f32 %v562_v56, %v1175_v6 }
 0x110   : > { %740 = vst [vmem:[%s1185_s20 + $0xd8] sm:$0xff] %v708_v58  ;;  %v693_v60 = vpack.c.bf16 %v642_v59, %v641_v57  ;;  %v512_v61 = vpop.f32.mrf.mxu2 }
 0x111   : > { %v513_v62 = vadd.f32 %v512_v61, %v1169_v2  ;;  %v601_v63 = vpop.f32.mrf.mxu3 }
 0x112   : > { %725 = vst [vmem:[%s1185_s20 + $0x60] sm:$0xff] %v693_v60  ;;  %v602_v0 = vadd.f32 %v601_v63, %v1171_v3  ;;  %v474_v1 = vpop.f32.mrf.mxu0 }
 0x113   : > { %v673_v5 = vmax.f32 %v513_v62, %v1173_v4  ;;  %v475_v7 = vadd.f32 %v474_v1, %v1169_v2  ;;  %v563_v8 = vpop.f32.mrf.mxu1 }
 0x114   : > { %v674_v9 = vmax.f32 %v602_v0, %v1175_v6  ;;  %v564_v10 = vadd.f32 %v563_v8, %v1171_v3 }
 0x115   : > { %v643_v11 = vmax.f32 %v475_v7, %v1173_v4 }
 0x116   : > { %v709_v12 = vpack.c.bf16 %v674_v9, %v673_v5  ;;  %v644_v13 = vmax.f32 %v564_v10, %v1175_v6 }
 0x118   : > { %741 = vst [vmem:[%s1185_s20 + $0xe0] sm:$0xff] %v709_v12  ;;  %v694_v14 = vpack.c.bf16 %v644_v13, %v643_v11  ;;  %v514_v15 = vpop.f32.mrf.mxu2 }
 0x119   : > { %v515_v16 = vadd.f32 %v514_v15, %v1169_v2  ;;  %v603_v17 = vpop.f32.mrf.mxu3 }
 0x11a   : > { %726 = vst [vmem:[%s1185_s20 + $0x68] sm:$0xff] %v694_v14  ;;  %v604_v18 = vadd.f32 %v603_v17, %v1171_v3  ;;  %v477_v19 = vpop.f32.mrf.mxu0 }
 0x11b   : > { %v675_v20 = vmax.f32 %v515_v16, %v1173_v4  ;;  %v478_v21 = vadd.f32 %v477_v19, %v1169_v2  ;;  %v566_v22 = vpop.f32.mrf.mxu1 }
 0x11c   : > { %v676_v23 = vmax.f32 %v604_v18, %v1175_v6  ;;  %v567_v24 = vadd.f32 %v566_v22, %v1171_v3 }
 0x11d   : > { %v645_v25 = vmax.f32 %v478_v21, %v1173_v4 }
 0x11e   : > { %v710_v26 = vpack.c.bf16 %v676_v23, %v675_v20  ;;  %v646_v27 = vmax.f32 %v567_v24, %v1175_v6 }
 0x120   : > { %742 = vst [vmem:[%s1185_s20 + $0xe8] sm:$0xff] %v710_v26  ;;  %v695_v28 = vpack.c.bf16 %v646_v27, %v645_v25  ;;  %v517_v29 = vpop.f32.mrf.mxu2 }
 0x121   : > { %v518_v30 = vadd.f32 %v517_v29, %v1169_v2  ;;  %v606_v31 = vpop.f32.mrf.mxu3 }
 0x122   : > { %727 = vst [vmem:[%s1185_s20 + $0x70] sm:$0xff] %v695_v28  ;;  %v607_v32 = vadd.f32 %v606_v31, %v1171_v3  ;;  %v479_v33 = vpop.f32.mrf.mxu0 }
 0x123   : > { %v677_v34 = vmax.f32 %v518_v30, %v1173_v4  ;;  %v480_v35 = vadd.f32 %v479_v33, %v1169_v2  ;;  %v568_v36 = vpop.f32.mrf.mxu1 }
 0x124   : > { %v678_v37 = vmax.f32 %v607_v32, %v1175_v6  ;;  %v569_v38 = vadd.f32 %v568_v36, %v1171_v3 }
 0x125   : > { %v647_v39 = vmax.f32 %v480_v35, %v1173_v4 }
 0x126   : > { %v711_v40 = vpack.c.bf16 %v678_v37, %v677_v34  ;;  %v648_v41 = vmax.f32 %v569_v38, %v1175_v6 }
 0x128   : > { %743 = vst [vmem:[%s1185_s20 + $0xf0] sm:$0xff] %v711_v40  ;;  %v696_v42 = vpack.c.bf16 %v648_v41, %v647_v39  ;;  %v519_v43 = vpop.f32.mrf.mxu2 }
 0x129   : > { %v520_v44 = vadd.f32 %v519_v43, %v1169_v2  ;;  %v608_v45 = vpop.f32.mrf.mxu3 }
 0x12a   : > { %728 = vst [vmem:[%s1185_s20 + $0x78] sm:$0xff] %v696_v42  ;;  %v609_v46 = vadd.f32 %v608_v45, %v1171_v3 }
 0x12b   : > { %v679_v47 = vmax.f32 %v520_v44, %v1173_v4 }
 0x12c   : > { %v680_v48 = vmax.f32 %v609_v46, %v1175_v6 }
 0x12e   : > { %v712_v49 = vpack.c.bf16 %v680_v48, %v679_v47 }
 0x130   : > { %744 = vst [vmem:[%s1185_s20 + $0xf8] sm:$0xff] %v712_v49 }
 0x131 PF: > { %s14_s15 = sadd.s32 1, %s1006_s15  }
 0x132   : > { %p11_p4 = scmp.ge.s32.totalorder %s14_s15, 4  }
 0x134   :  { %13 = sbr.rel (!%p11_p4) target bundleno = 1 (0x1), region = 66 }

// kernel: _lambda_.11
= control target key start
LH: loop header
LB: loop body
LE: loop exit
PB: predicated region body
PF: predicated region fallthrough
CT: control target
= control target key end

     0   :  { %s1512_s18 = smov 0   ;;  %s1764_s0 = inlined_call_operand.vmem [shape: bf16[512,256], index: 0, kind: input, shape index: {}]   ;;  %s1765_s1 = inlined_call_operand.vmem [shape: bf16[256,128], index: 1, kind: input, shape index: {}]   ;;  %s1766_s2 = inlined_call_operand.vmem [shape: f32[1,128], index: 2, kind: input, shape index: {}]   ;;  %s1767_s3 = inlined_call_operand.vmem [shape: f32[1,128], index: 3, kind: input, shape index: {}]   ;;  %s1768_s4 = inlined_call_operand.vmem [shape: bf16[512,128], index: 4, kind: input, shape index: {}]   ;;  %s1769_s5 = inlined_call_operand.vmem [shape: bf16[512,128], index: 5, kind: output, shape index: {}]  }
   0x1 LB: > { %s1019_s19 = sadd.s32 4294967295, %s1480_s18   ;;  %p1023_p0 = scmp.ge.s32.totalorder %s1480_s18, 1  ;;  %s1480_s18 = sphi %s1512_s18, %s15_s18  }
   0x2   : > { %p200_p1 = scmp.lt.s32.totalorder %s1480_s18, 3 }
   0x4   : > { %p201_p2 = pnand %p1023_p0, %p200_p1 }
   0x5   : > { %s1024_s7 = sshll.u32 (!%p201_p2), %s1019_s19, 5 }
   0x6   : > { %204 = sbr.rel (%p201_p2) target bundleno = 306 (0x132), region = 40  ;;  %p235_p3 = scmp.lt.s32.totalorder (!%p201_p2), %s1024_s7, 63 }
   0xb   : > { %v1265_v0 = vld [vmem:[%s1765_s1 + $0x38] sm:$0xff]  ;;  %v1264_v2 = vld [vmem:[%s1765_s1 + $0x30] sm:$0xff]  ;;  %v1263_v4 = vld [vmem:[%s1765_s1 + $0x28] sm:$0xff]  ;;  %s1771_s7 = smov (!%p235_p3, %s1024_s7), 63 }
   0xc   : > { %v1273_v1 = vld [vmem:[%s1765_s1 + $0x78] sm:$0xff]  ;;  %577 = vmatpush.bf16.msra.mxu0 %v1265_v0  ;;  %1448 = vmatpush.bf16.msra.mxu2 %v1265_v0  ;;  %v1272_v3 = vld [vmem:[%s1765_s1 + $0x70] sm:$0xff]  ;;  %v1271_v5 = vld [vmem:[%s1765_s1 + $0x68] sm:$0xff]  ;;  %s1225_s21 = sshll.u32 %s1771_s7, 3  ;;  %s1028_s9 = sshll.u32 %s1771_s7, 2 }
   0xd   : > { %666 = vmatpush.bf16.msra.mxu1 %v1273_v1  ;;  %1456 = vmatpush.bf16.msra.mxu3 %v1273_v1  ;;  %v1262_v6 = vld [vmem:[%s1765_s1 + $0x20] sm:$0xff]  ;;  %v1261_v8 = vld [vmem:[%s1765_s1 + $0x18] sm:$0xff]  ;;  %v1260_v10 = vld [vmem:[%s1765_s1 + $0x10] sm:$0xff]  ;;  %s1565_s26 = scalar_lea.vmem %s1764_s0, %s1225_s21  ;;  %s1651_s14 = scalar_lea.vmem %s1768_s4, %s1028_s9 }
   0xe   : > { %v1270_v7 = vld [vmem:[%s1765_s1 + $0x60] sm:$0xff]  ;;  %v1269_v9 = vld [vmem:[%s1765_s1 + $0x58] sm:$0xff]  ;;  %v1268_v11 = vld [vmem:[%s1765_s1 + $0x50] sm:$0xff]  ;;  %s1671_s20 = scalar_lea.vmem %s1769_s5, %s1028_s9 }
   0xf   : > { %v1259_v12 = vld [vmem:[%s1765_s1 + $0x8] sm:$0xff]  ;;  %v1258_v14 = vld [vmem:[%s1765_s1] sm:$0xff]  ;;  %v1041_v28 = vld [vmem:[%s1565_s26 + $0x10] sm:$0xf] }
  0x10   : > { %578 = vmatpush.bf16.msra.mxu0 %v1264_v2  ;;  %1449 = vmatpush.bf16.msra.mxu2 %v1264_v2  ;;  %v1267_v13 = vld [vmem:[%s1765_s1 + $0x48] sm:$0xff]  ;;  %v1266_v15 = vld [vmem:[%s1765_s1 + $0x40] sm:$0xff]  ;;  %v1229_v29 = vld [vmem:[%s1565_s26 + $0x14] sm:$0xf0] }
  0x11   : > { %667 = vmatpush.bf16.msra.mxu1 %v1272_v3  ;;  %1457 = vmatpush.bf16.msra.mxu3 %v1272_v3  ;;  %v1033_v16 = vld [vmem:[%s1565_s26] sm:$0xf]  ;;  %v1227_v17 = vld [vmem:[%s1565_s26 + $0x4] sm:$0xf0]  ;;  %v1226_v20 = vld [vmem:[%s1565_s26 + $0x4] sm:$0xf]  ;;  %v1042_v36 = vor.u32 %v1229_v29, %v1041_v28 }
  0x12   : > { %v1097_v18 = vld [vmem:[%s1565_s26 + $0x80] sm:$0xf]  ;;  %v1243_v19 = vld [vmem:[%s1565_s26 + $0x84] sm:$0xf0]  ;;  %v1035_v21 = vld [vmem:[%s1565_s26 + $0x8] sm:$0xf0]  ;;  %v1034_v24 = vor.u32 %v1227_v17, %v1033_v16 }
  0x13   : > { %v1242_v22 = vld [vmem:[%s1565_s26 + $0x84] sm:$0xf]  ;;  %v1099_v23 = vld [vmem:[%s1565_s26 + $0x88] sm:$0xf0]  ;;  %v1098_v25 = vor.u32 %v1243_v19, %v1097_v18  ;;  %v1038_v26 = vor.u32 %v1226_v20, %v1035_v21  ;;  %v1105_v30 = vld [vmem:[%s1565_s26 + $0x90] sm:$0xf] }
  0x14   : > { %579 = vmatpush.bf16.msra.mxu0 %v1263_v4  ;;  %1450 = vmatpush.bf16.msra.mxu2 %v1263_v4  ;;  %v1102_v27 = vor.u32 %v1242_v22, %v1099_v23  ;;  %v1245_v31 = vld [vmem:[%s1565_s26 + $0x94] sm:$0xf0]  ;;  %v1228_v32 = vld [vmem:[%s1565_s26 + $0x14] sm:$0xf]  ;;  %v1043_v33 = vld [vmem:[%s1565_s26 + $0x18] sm:$0xf0] }
  0x15   : > { %668 = vmatpush.bf16.msra.mxu1 %v1271_v5  ;;  %1458 = vmatpush.bf16.msra.mxu3 %v1271_v5  ;;  %v1244_v34 = vld [vmem:[%s1565_s26 + $0x94] sm:$0xf]  ;;  %v1107_v35 = vld [vmem:[%s1565_s26 + $0x98] sm:$0xf0]  ;;  %v1106_v37 = vor.u32 %v1245_v31, %v1105_v30  ;;  %v1046_v38 = vor.u32 %v1228_v32, %v1043_v33  ;;  %v1049_v40 = vld [vmem:[%s1565_s26 + $0x20] sm:$0xf] }
  0x16   : > { %v1110_v39 = vor.u32 %v1244_v34, %v1107_v35  ;;  %v1231_v41 = vld [vmem:[%s1565_s26 + $0x24] sm:$0xf0]  ;;  %v1113_v42 = vld [vmem:[%s1565_s26 + $0xa0] sm:$0xf]  ;;  %v1230_v44 = vld [vmem:[%s1565_s26 + $0x24] sm:$0xf] }
  0x17   : > { %v1247_v43 = vld [vmem:[%s1565_s26 + $0xa4] sm:$0xf0]  ;;  %v1051_v45 = vld [vmem:[%s1565_s26 + $0x28] sm:$0xf0]  ;;  %v1246_v46 = vld [vmem:[%s1565_s26 + $0xa4] sm:$0xf]  ;;  %v1050_v48 = vor.u32 %v1231_v41, %v1049_v40 }
  0x18   : > { %580 = vmatpush.bf16.msra.mxu0 %v1262_v6  ;;  %1451 = vmatpush.bf16.msra.mxu2 %v1262_v6  ;;  %v1115_v47 = vld [vmem:[%s1565_s26 + $0xa8] sm:$0xf0]  ;;  %v1114_v49 = vor.u32 %v1247_v43, %v1113_v42  ;;  %v1054_v50 = vor.u32 %v1230_v44, %v1051_v45  ;;  %v1057_v52 = vld [vmem:[%s1565_s26 + $0x30] sm:$0xf]  ;;  %v1233_v53 = vld [vmem:[%s1565_s26 + $0x34] sm:$0xf0] }
  0x19   : > { %669 = vmatpush.bf16.msra.mxu1 %v1270_v7  ;;  %1459 = vmatpush.bf16.msra.mxu3 %v1270_v7  ;;  %v1118_v51 = vor.u32 %v1246_v46, %v1115_v47  ;;  %v1121_v54 = vld [vmem:[%s1565_s26 + $0xb0] sm:$0xf]  ;;  %v1249_v55 = vld [vmem:[%s1565_s26 + $0xb4] sm:$0xf0]  ;;  %v1232_v56 = vld [vmem:[%s1565_s26 + $0x34] sm:$0xf]  ;;  %v1058_v60 = vor.u32 %v1233_v53, %v1057_v52 }
  0x1a   : > { %v1059_v57 = vld [vmem:[%s1565_s26 + $0x38] sm:$0xf0]  ;;  %v1248_v58 = vld [vmem:[%s1565_s26 + $0xb4] sm:$0xf]  ;;  %v1122_v61 = vor.u32 %v1249_v55, %v1121_v54  ;;  %v1065_v0 = vld [vmem:[%s1565_s26 + $0x40] sm:$0xf] }
  0x1b   : > { %v1123_v59 = vld [vmem:[%s1565_s26 + $0xb8] sm:$0xf0]  ;;  %v1062_v62 = vor.u32 %v1232_v56, %v1059_v57  ;;  %v1235_v1 = vld [vmem:[%s1565_s26 + $0x44] sm:$0xf0]  ;;  %v1129_v2 = vld [vmem:[%s1565_s26 + $0xc0] sm:$0xf] }
  0x1c   : > { %581 = vmatpush.bf16.msra.mxu0 %v1261_v8  ;;  %1452 = vmatpush.bf16.msra.mxu2 %v1261_v8  ;;  %v1126_v63 = vor.u32 %v1248_v58, %v1123_v59  ;;  %v1251_v3 = vld [vmem:[%s1565_s26 + $0xc4] sm:$0xf0]  ;;  %v1234_v4 = vld [vmem:[%s1565_s26 + $0x44] sm:$0xf]  ;;  %v1067_v5 = vld [vmem:[%s1565_s26 + $0x48] sm:$0xf0]  ;;  %v1066_v8 = vor.u32 %v1235_v1, %v1065_v0 }
  0x1d   : > { %670 = vmatpush.bf16.msra.mxu1 %v1269_v9  ;;  %1460 = vmatpush.bf16.msra.mxu3 %v1269_v9  ;;  %v1250_v6 = vld [vmem:[%s1565_s26 + $0xc4] sm:$0xf]  ;;  %v1131_v7 = vld [vmem:[%s1565_s26 + $0xc8] sm:$0xf0]  ;;  %v1130_v9 = vor.u32 %v1251_v3, %v1129_v2  ;;  %v1236_v16 = vld [vmem:[%s1565_s26 + $0x54] sm:$0xf] }
  0x1e   : > { %v1075_v17 = vld [vmem:[%s1565_s26 + $0x58] sm:$0xf0]  ;;  %v1252_v18 = vld [vmem:[%s1565_s26 + $0xd4] sm:$0xf]  ;;  %v1238_v28 = vld [vmem:[%s1565_s26 + $0x64] sm:$0xf] }
  0x1f   : > { %v1139_v19 = vld [vmem:[%s1565_s26 + $0xd8] sm:$0xf0]  ;;  %v1078_v22 = vor.u32 %v1236_v16, %v1075_v17  ;;  %v1083_v29 = vld [vmem:[%s1565_s26 + $0x68] sm:$0xf0]  ;;  %v1254_v30 = vld [vmem:[%s1565_s26 + $0xe4] sm:$0xf] }
  0x20   : > { %582 = vmatpush.bf16.msra.mxu0 %v1260_v10  ;;  %1453 = vmatpush.bf16.msra.mxu2 %v1260_v10  ;;  %v1070_v10 = vor.u32 %v1234_v4, %v1067_v5  ;;  %v1142_v23 = vor.u32 %v1252_v18, %v1139_v19  ;;  %v1147_v31 = vld [vmem:[%s1565_s26 + $0xe8] sm:$0xf0]  ;;  %v1086_v34 = vor.u32 %v1238_v28, %v1083_v29  ;;  %v1240_v40 = vld [vmem:[%s1565_s26 + $0x74] sm:$0xf]  ;;  %v1091_v41 = vld [vmem:[%s1565_s26 + $0x78] sm:$0xf0] }
  0x21   : > { %671 = vmatpush.bf16.msra.mxu1 %v1268_v11  ;;  %1461 = vmatpush.bf16.msra.mxu3 %v1268_v11  ;;  %v1134_v11 = vor.u32 %v1250_v6, %v1131_v7  ;;  %v1150_v35 = vor.u32 %v1254_v30, %v1147_v31  ;;  %v1256_v42 = vld [vmem:[%s1565_s26 + $0xf4] sm:$0xf]  ;;  %v1155_v43 = vld [vmem:[%s1565_s26 + $0xf8] sm:$0xf0]  ;;  %v1094_v46 = vor.u32 %v1240_v40, %v1091_v41  ;;  %v1275_v52 = vld [vmem:[%s1651_s14] sm:$0xff]  }
  0x22   : > { %v1158_v47 = vor.u32 %v1256_v42, %v1155_v43  ;;  %v1276_v55 = vunpack.c.l.bf16 %v1275_v52  ;;  %v1661_v0 = vld [vmem:[%s1767_s3] ss:$0 sm:$0xff]  ;;  %v1418_v18 = vld [vmem:[%s1651_s14 + $0x8] sm:$0xff]  }
  0x23   : > { %v1281_v30 = vunpack.c.h.bf16 %v1418_v18  ;;  %v1426_v31 = vld [vmem:[%s1651_s14 + $0x48] sm:$0xff]  }
  0x24   : > { %583 = vmatpush.bf16.msra.mxu0 %v1259_v12  ;;  %1454 = vmatpush.bf16.msra.mxu2 %v1259_v12  ;;  %v1073_v12 = vld [vmem:[%s1565_s26 + $0x50] sm:$0xf]  ;;  %v1313_v42 = vunpack.c.h.bf16 %v1426_v31 }
  0x25   : > { %672 = vmatpush.bf16.msra.mxu1 %v1267_v13  ;;  %1462 = vmatpush.bf16.msra.mxu3 %v1267_v13  ;;  %v1237_v13 = vld [vmem:[%s1565_s26 + $0x54] sm:$0xf0] }
  0x26   : > { %v1074_v20 = vor.u32 %v1237_v13, %v1073_v12 }
  0x28   : > { %584 = vmatpush.bf16.msra.mxu0 %v1258_v14  ;;  %1455 = vmatpush.bf16.msra.mxu2 %v1258_v14  ;;  %v1137_v14 = vld [vmem:[%s1565_s26 + $0xd0] sm:$0xf] }
  0x29   : > { %673 = vmatpush.bf16.msra.mxu1 %v1266_v15  ;;  %1463 = vmatpush.bf16.msra.mxu3 %v1266_v15  ;;  %v1253_v15 = vld [vmem:[%s1565_s26 + $0xd4] sm:$0xf0] }
  0x2a   : > { %v1138_v21 = vor.u32 %v1253_v15, %v1137_v14 }
  0x2b   : > { %585 = vmatmul.bf16.vlgmr.msra.gmra.mxu0 %v1034_v24  ;;  %625 = vmatmul.bf16.vlgmr.msra.gmra.mxu2 %v1098_v25  ;;  %v1081_v24 = vld [vmem:[%s1565_s26 + $0x60] sm:$0xf]  ;;  %v1239_v25 = vld [vmem:[%s1565_s26 + $0x64] sm:$0xf0] }
  0x2c   : > { %674 = vmatmul.bf16.vlgmr.msra.gmra.mxu1 %v1038_v26  ;;  %714 = vmatmul.bf16.vlgmr.msra.gmra.mxu3 %v1102_v27  ;;  %v1145_v26 = vld [vmem:[%s1565_s26 + $0xe0] sm:$0xf]  ;;  %v1255_v27 = vld [vmem:[%s1565_s26 + $0xe4] sm:$0xf0]  ;;  %v1082_v32 = vor.u32 %v1239_v25, %v1081_v24  ;;  %v1280_v24 = vunpack.c.l.bf16 %v1418_v18 }
  0x2d   : > { %v1146_v33 = vor.u32 %v1255_v27, %v1145_v26 }
  0x3b   : > { %590 = vmatmul.bf16.gmra.mxu0 %v1042_v36  ;;  %630 = vmatmul.bf16.gmra.mxu2 %v1106_v37  ;;  %v1089_v36 = vld [vmem:[%s1565_s26 + $0x70] sm:$0xf]  ;;  %v1241_v37 = vld [vmem:[%s1565_s26 + $0x74] sm:$0xf0] }
  0x3c   : > { %679 = vmatmul.bf16.gmra.mxu1 %v1046_v38  ;;  %719 = vmatmul.bf16.gmra.mxu3 %v1110_v39  ;;  %v1153_v38 = vld [vmem:[%s1565_s26 + $0xf0] sm:$0xf]  ;;  %v1257_v39 = vld [vmem:[%s1565_s26 + $0xf4] sm:$0xf0]  ;;  %v1090_v44 = vor.u32 %v1241_v37, %v1089_v36 }
  0x3d   : > { %v1154_v45 = vor.u32 %v1257_v39, %v1153_v38 }
  0x4b   : > { %595 = vmatmul.bf16.gmra.mxu0 %v1050_v48  ;;  %635 = vmatmul.bf16.gmra.mxu2 %v1114_v49  ;;  %v1644_v48 = vld [vmem:[%s1766_s2] ss:$0 sm:$0xff] }
  0x4c   : > { %684 = vmatmul.bf16.gmra.mxu1 %v1054_v50  ;;  %724 = vmatmul.bf16.gmra.mxu3 %v1118_v51 }
  0x5b   : > { %600 = vmatmul.bf16.gmra.mxu0 %v1058_v60  ;;  %640 = vmatmul.bf16.gmra.mxu2 %v1122_v61  ;;  %v1277_v61 = vunpack.c.h.bf16 %v1275_v52 }
  0x5c   : > { %689 = vmatmul.bf16.gmra.mxu1 %v1062_v62  ;;  %729 = vmatmul.bf16.gmra.mxu3 %v1126_v63  ;;  %v1425_v62 = vld [vmem:[%s1651_s14 + $0x40] sm:$0xff]  }
  0x5d   : > { %v1308_v3 = vunpack.c.l.bf16 %v1425_v62 }
  0x6b   : > { %605 = vmatmul.bf16.gmra.mxu0 %v1066_v8  ;;  %645 = vmatmul.bf16.gmra.mxu2 %v1130_v9 }
  0x6c   : > { %694 = vmatmul.bf16.gmra.mxu1 %v1070_v10  ;;  %734 = vmatmul.bf16.gmra.mxu3 %v1134_v11  ;;  %v1309_v10 = vunpack.c.h.bf16 %v1425_v62 }
  0x7b   : > { %610 = vmatmul.bf16.gmra.mxu0 %v1074_v20  ;;  %650 = vmatmul.bf16.gmra.mxu2 %v1138_v21 }
  0x7c   : > { %699 = vmatmul.bf16.gmra.mxu1 %v1078_v22  ;;  %739 = vmatmul.bf16.gmra.mxu3 %v1142_v23 }
  0x8b   : > { %615 = vmatmul.bf16.gmra.mxu0 %v1082_v32  ;;  %655 = vmatmul.bf16.gmra.mxu2 %v1146_v33 }
  0x8c   : > { %704 = vmatmul.bf16.gmra.mxu1 %v1086_v34  ;;  %744 = vmatmul.bf16.gmra.mxu3 %v1150_v35  ;;  %v1312_v35 = vunpack.c.l.bf16 %v1426_v31 }
  0x9b   : > { %620 = vmatmul.bf16.gmra.mxu0 %v1090_v44  ;;  %660 = vmatmul.bf16.gmra.mxu2 %v1154_v45 }
  0x9c   : > { %709 = vmatmul.bf16.gmra.mxu1 %v1094_v46  ;;  %749 = vmatmul.bf16.gmra.mxu3 %v1158_v47 }
  0xa8   : > { %v586_v49 = vpop.f32.mrf.mxu0 }
  0xa9   : > { %v675_v50 = vpop.f32.mrf.mxu1  ;;  %v587_v51 = vadd.f32 %v1644_v48, %v586_v49 }
  0xab   : > { %v676_v54 = vadd.f32 %v675_v50, %v587_v51  ;;  %v1419_v51 = vld [vmem:[%s1651_s14 + $0x10] sm:$0xff]  }
  0xad   : > { %v819_v63 = vadd.f32 %v1276_v55, %v676_v54 }
  0xae   : > { %v626_v53 = vpop.f32.mrf.mxu2 }
  0xaf   : > { %v715_v56 = vpop.f32.mrf.mxu3  ;;  %v627_v58 = vadd.f32 %v1644_v48, %v626_v53  ;;  %v855_v6 = vmax.f32 %v819_v63, %v1661_v0  ;;  %v1285_v63 = vunpack.c.h.bf16 %v1419_v51 }
  0xb0   : > { %v588_v57 = vpop.f32.mrf.mxu0 }
  0xb1   : > { %v589_v59 = vadd.f32 %v1644_v48, %v588_v57  ;;  %v677_v60 = vpop.f32.mrf.mxu1  ;;  %v716_v2 = vadd.f32 %v715_v56, %v627_v58  ;;  %v1284_v57 = vunpack.c.l.bf16 %v1419_v51 }
  0xb3   : > { %v678_v1 = vadd.f32 %v677_v60, %v589_v59  ;;  %v835_v12 = vadd.f32 %v1308_v3, %v716_v2 }
  0xb5   : > { %v820_v4 = vadd.f32 %v1277_v61, %v678_v1  ;;  %v871_v19 = vmax.f32 %v835_v12, %v1661_v0  ;;  %v1427_v1 = vld [vmem:[%s1651_s14 + $0x50] sm:$0xff]  }
  0xb6   : > { %v628_v5 = vpop.f32.mrf.mxu2  ;;  %v1317_v12 = vunpack.c.h.bf16 %v1427_v1 }
  0xb7   : > { %v856_v7 = vmax.f32 %v820_v4, %v1661_v0  ;;  %v629_v8 = vadd.f32 %v1644_v48, %v628_v5  ;;  %v717_v9 = vpop.f32.mrf.mxu3  ;;  %v1316_v5 = vunpack.c.l.bf16 %v1427_v1 }
  0xb8   : > { %v591_v11 = vpop.f32.mrf.mxu0 }
  0xb9   : > { %v1341_v13 = vpack.c.bf16 %v856_v7, %v855_v6  ;;  %v718_v14 = vadd.f32 %v717_v9, %v629_v8  ;;  %v680_v15 = vpop.f32.mrf.mxu1  ;;  %v592_v17 = vadd.f32 %v1644_v48, %v591_v11 }
  0xbb   : > { %1342 = vst [vmem:[%s1671_s20] sm:$0xff] %v1341_v13   ;;  %v836_v16 = vadd.f32 %v1309_v10, %v718_v14  ;;  %v681_v23 = vadd.f32 %v680_v15, %v592_v17 }
  0xbd   : > { %v872_v20 = vmax.f32 %v836_v16, %v1661_v0  ;;  %v821_v32 = vadd.f32 %v1280_v24, %v681_v23 }
  0xbe   : > { %v631_v21 = vpop.f32.mrf.mxu2 }
  0xbf   : > { %v1381_v22 = vpack.c.bf16 %v872_v20, %v871_v19  ;;  %v720_v25 = vpop.f32.mrf.mxu3  ;;  %v632_v27 = vadd.f32 %v1644_v48, %v631_v21  ;;  %v857_v38 = vmax.f32 %v821_v32, %v1661_v0  ;;  %v1420_v20 = vld [vmem:[%s1651_s14 + $0x18] sm:$0xff]  }
  0xc0   : > { %v593_v26 = vpop.f32.mrf.mxu0  ;;  %v1289_v32 = vunpack.c.h.bf16 %v1420_v20 }
  0xc1   : > { %1440 = vst [vmem:[%s1671_s20 + $0x40] sm:$0xff] %v1381_v22   ;;  %v594_v28 = vadd.f32 %v1644_v48, %v593_v26  ;;  %v682_v29 = vpop.f32.mrf.mxu1  ;;  %v721_v34 = vadd.f32 %v720_v25, %v632_v27  ;;  %v1288_v26 = vunpack.c.l.bf16 %v1420_v20 }
  0xc3   : > { %v683_v33 = vadd.f32 %v682_v29, %v594_v28  ;;  %v837_v44 = vadd.f32 %v1312_v35, %v721_v34 }
  0xc5   : > { %v822_v36 = vadd.f32 %v1281_v30, %v683_v33  ;;  %v873_v52 = vmax.f32 %v837_v44, %v1661_v0  ;;  %v1428_v33 = vld [vmem:[%s1651_s14 + $0x58] sm:$0xff]  }
  0xc6   : > { %v633_v37 = vpop.f32.mrf.mxu2  ;;  %v1321_v44 = vunpack.c.h.bf16 %v1428_v33 }
  0xc7   : > { %v858_v39 = vmax.f32 %v822_v36, %v1661_v0  ;;  %v634_v40 = vadd.f32 %v1644_v48, %v633_v37  ;;  %v722_v41 = vpop.f32.mrf.mxu3  ;;  %v1320_v37 = vunpack.c.l.bf16 %v1428_v33 }
  0xc8   : > { %v596_v43 = vpop.f32.mrf.mxu0 }
  0xc9   : > { %v1346_v45 = vpack.c.bf16 %v858_v39, %v857_v38  ;;  %v723_v46 = vadd.f32 %v722_v41, %v634_v40  ;;  %v685_v47 = vpop.f32.mrf.mxu1  ;;  %v597_v50 = vadd.f32 %v1644_v48, %v596_v43 }
  0xcb   : > { %1433 = vst [vmem:[%s1671_s20 + $0x8] sm:$0xff] %v1346_v45   ;;  %v838_v49 = vadd.f32 %v1313_v42, %v723_v46  ;;  %v686_v56 = vadd.f32 %v685_v47, %v597_v50 }
  0xcd   : > { %v874_v53 = vmax.f32 %v838_v49, %v1661_v0  ;;  %v823_v2 = vadd.f32 %v1284_v57, %v686_v56 }
  0xce   : > { %v636_v54 = vpop.f32.mrf.mxu2 }
  0xcf   : > { %v1386_v55 = vpack.c.bf16 %v874_v53, %v873_v52  ;;  %v725_v58 = vpop.f32.mrf.mxu3  ;;  %v637_v60 = vadd.f32 %v1644_v48, %v636_v54  ;;  %v859_v8 = vmax.f32 %v823_v2, %v1661_v0  ;;  %v1421_v53 = vld [vmem:[%s1651_s14 + $0x20] sm:$0xff]  }
  0xd0   : > { %v598_v59 = vpop.f32.mrf.mxu0  ;;  %v1293_v2 = vunpack.c.h.bf16 %v1421_v53 }
  0xd1   : > { %1441 = vst [vmem:[%s1671_s20 + $0x48] sm:$0xff] %v1386_v55   ;;  %v599_v61 = vadd.f32 %v1644_v48, %v598_v59  ;;  %v687_v62 = vpop.f32.mrf.mxu1  ;;  %v726_v4 = vadd.f32 %v725_v58, %v637_v60  ;;  %v1292_v59 = vunpack.c.l.bf16 %v1421_v53 }
  0xd3   : > { %v688_v3 = vadd.f32 %v687_v62, %v599_v61  ;;  %v839_v14 = vadd.f32 %v1316_v5, %v726_v4 }
  0xd5   : > { %v824_v6 = vadd.f32 %v1285_v63, %v688_v3  ;;  %v875_v21 = vmax.f32 %v839_v14, %v1661_v0  ;;  %v1429_v3 = vld [vmem:[%s1651_s14 + $0x60] sm:$0xff]  }
  0xd6   : > { %v638_v7 = vpop.f32.mrf.mxu2  ;;  %v1325_v14 = vunpack.c.h.bf16 %v1429_v3 }
  0xd7   : > { %v860_v9 = vmax.f32 %v824_v6, %v1661_v0  ;;  %v639_v10 = vadd.f32 %v1644_v48, %v638_v7  ;;  %v727_v11 = vpop.f32.mrf.mxu3  ;;  %v1324_v7 = vunpack.c.l.bf16 %v1429_v3 }
  0xd8   : > { %v601_v13 = vpop.f32.mrf.mxu0 }
  0xd9   : > { %v1351_v15 = vpack.c.bf16 %v860_v9, %v859_v8  ;;  %v728_v16 = vadd.f32 %v727_v11, %v639_v10  ;;  %v690_v17 = vpop.f32.mrf.mxu1  ;;  %v602_v19 = vadd.f32 %v1644_v48, %v601_v13 }
  0xdb   : > { %1434 = vst [vmem:[%s1671_s20 + $0x10] sm:$0xff] %v1351_v15   ;;  %v840_v18 = vadd.f32 %v1317_v12, %v728_v16  ;;  %v691_v25 = vadd.f32 %v690_v17, %v602_v19 }
  0xdd   : > { %v876_v22 = vmax.f32 %v840_v18, %v1661_v0  ;;  %v825_v34 = vadd.f32 %v1288_v26, %v691_v25 }
  0xde   : > { %v641_v23 = vpop.f32.mrf.mxu2 }
  0xdf   : > { %v1391_v24 = vpack.c.bf16 %v876_v22, %v875_v21  ;;  %v730_v27 = vpop.f32.mrf.mxu3  ;;  %v642_v29 = vadd.f32 %v1644_v48, %v641_v23  ;;  %v861_v40 = vmax.f32 %v825_v34, %v1661_v0  ;;  %v1422_v22 = vld [vmem:[%s1651_s14 + $0x28] sm:$0xff]  }
  0xe0   : > { %v603_v28 = vpop.f32.mrf.mxu0  ;;  %v1297_v34 = vunpack.c.h.bf16 %v1422_v22 }
  0xe1   : > { %1442 = vst [vmem:[%s1671_s20 + $0x50] sm:$0xff] %v1391_v24   ;;  %v604_v30 = vadd.f32 %v1644_v48, %v603_v28  ;;  %v692_v31 = vpop.f32.mrf.mxu1  ;;  %v731_v36 = vadd.f32 %v730_v27, %v642_v29  ;;  %v1296_v28 = vunpack.c.l.bf16 %v1422_v22 }
  0xe3   : > { %v693_v35 = vadd.f32 %v692_v31, %v604_v30  ;;  %v841_v46 = vadd.f32 %v1320_v37, %v731_v36 }
  0xe5   : > { %v826_v38 = vadd.f32 %v1289_v32, %v693_v35  ;;  %v877_v54 = vmax.f32 %v841_v46, %v1661_v0  ;;  %v1430_v35 = vld [vmem:[%s1651_s14 + $0x68] sm:$0xff]  }
  0xe6   : > { %v643_v39 = vpop.f32.mrf.mxu2  ;;  %v1329_v46 = vunpack.c.h.bf16 %v1430_v35 }
  0xe7   : > { %v862_v41 = vmax.f32 %v826_v38, %v1661_v0  ;;  %v644_v42 = vadd.f32 %v1644_v48, %v643_v39  ;;  %v732_v43 = vpop.f32.mrf.mxu3  ;;  %v1328_v39 = vunpack.c.l.bf16 %v1430_v35 }
  0xe8   : > { %v606_v45 = vpop.f32.mrf.mxu0 }
  0xe9   : > { %v1356_v47 = vpack.c.bf16 %v862_v41, %v861_v40  ;;  %v733_v49 = vadd.f32 %v732_v43, %v644_v42  ;;  %v695_v50 = vpop.f32.mrf.mxu1  ;;  %v607_v52 = vadd.f32 %v1644_v48, %v606_v45 }
  0xeb   : > { %1435 = vst [vmem:[%s1671_s20 + $0x18] sm:$0xff] %v1356_v47   ;;  %v842_v51 = vadd.f32 %v1321_v44, %v733_v49  ;;  %v696_v58 = vadd.f32 %v695_v50, %v607_v52 }
  0xed   : > { %v878_v55 = vmax.f32 %v842_v51, %v1661_v0  ;;  %v827_v4 = vadd.f32 %v1292_v59, %v696_v58 }
  0xee   : > { %v646_v56 = vpop.f32.mrf.mxu2 }
  0xef   : > { %v1396_v57 = vpack.c.bf16 %v878_v55, %v877_v54  ;;  %v735_v60 = vpop.f32.mrf.mxu3  ;;  %v647_v62 = vadd.f32 %v1644_v48, %v646_v56  ;;  %v863_v10 = vmax.f32 %v827_v4, %v1661_v0  ;;  %v1423_v55 = vld [vmem:[%s1651_s14 + $0x30] sm:$0xff]  }
  0xf0   : > { %v608_v61 = vpop.f32.mrf.mxu0  ;;  %v1301_v4 = vunpack.c.h.bf16 %v1423_v55 }
  0xf1   : > { %1443 = vst [vmem:[%s1671_s20 + $0x58] sm:$0xff] %v1396_v57   ;;  %v609_v63 = vadd.f32 %v1644_v48, %v608_v61  ;;  %v697_v1 = vpop.f32.mrf.mxu1  ;;  %v736_v6 = vadd.f32 %v735_v60, %v647_v62  ;;  %v1300_v61 = vunpack.c.l.bf16 %v1423_v55 }
  0xf3   : > { %v698_v5 = vadd.f32 %v697_v1, %v609_v63  ;;  %v843_v16 = vadd.f32 %v1324_v7, %v736_v6 }
  0xf5   : > { %v828_v8 = vadd.f32 %v1293_v2, %v698_v5  ;;  %v879_v23 = vmax.f32 %v843_v16, %v1661_v0  ;;  %v1431_v5 = vld [vmem:[%s1651_s14 + $0x70] sm:$0xff]  }
  0xf6   : > { %v648_v9 = vpop.f32.mrf.mxu2  ;;  %v1333_v16 = vunpack.c.h.bf16 %v1431_v5 }
  0xf7   : > { %v864_v11 = vmax.f32 %v828_v8, %v1661_v0  ;;  %v649_v12 = vadd.f32 %v1644_v48, %v648_v9  ;;  %v737_v13 = vpop.f32.mrf.mxu3  ;;  %v1332_v9 = vunpack.c.l.bf16 %v1431_v5 }
  0xf8   : > { %v611_v15 = vpop.f32.mrf.mxu0 }
  0xf9   : > { %v1361_v17 = vpack.c.bf16 %v864_v11, %v863_v10  ;;  %v738_v18 = vadd.f32 %v737_v13, %v649_v12  ;;  %v700_v19 = vpop.f32.mrf.mxu1  ;;  %v612_v21 = vadd.f32 %v1644_v48, %v611_v15 }
  0xfb   : > { %1436 = vst [vmem:[%s1671_s20 + $0x20] sm:$0xff] %v1361_v17   ;;  %v844_v20 = vadd.f32 %v1325_v14, %v738_v18  ;;  %v701_v27 = vadd.f32 %v700_v19, %v612_v21 }
  0xfd   : > { %v880_v24 = vmax.f32 %v844_v20, %v1661_v0  ;;  %v829_v36 = vadd.f32 %v1296_v28, %v701_v27 }
  0xfe   : > { %v651_v25 = vpop.f32.mrf.mxu2 }
  0xff   : > { %v1401_v26 = vpack.c.bf16 %v880_v24, %v879_v23  ;;  %v740_v29 = vpop.f32.mrf.mxu3  ;;  %v652_v31 = vadd.f32 %v1644_v48, %v651_v25  ;;  %v865_v42 = vmax.f32 %v829_v36, %v1661_v0  ;;  %v1424_v24 = vld [vmem:[%s1651_s14 + $0x38] sm:$0xff]  }
 0x100   : > { %v613_v30 = vpop.f32.mrf.mxu0  ;;  %v1305_v35 = vunpack.c.h.bf16 %v1424_v24  ;;  %v1432_v36 = vld [vmem:[%s1651_s14 + $0x78] sm:$0xff]  }
 0x101   : > { %1444 = vst [vmem:[%s1671_s20 + $0x60] sm:$0xff] %v1401_v26   ;;  %v614_v32 = vadd.f32 %v1644_v48, %v613_v30  ;;  %v702_v33 = vpop.f32.mrf.mxu1  ;;  %v741_v38 = vadd.f32 %v740_v29, %v652_v31  ;;  %v1304_v30 = vunpack.c.l.bf16 %v1424_v24 }
 0x103   : > { %v703_v37 = vadd.f32 %v702_v33, %v614_v32  ;;  %v845_v49 = vadd.f32 %v1328_v39, %v741_v38 }
 0x105   : > { %v830_v40 = vadd.f32 %v1297_v34, %v703_v37  ;;  %v881_v56 = vmax.f32 %v845_v49, %v1661_v0 }
 0x106   : > { %v653_v41 = vpop.f32.mrf.mxu2 }
 0x107   : > { %v866_v43 = vmax.f32 %v830_v40, %v1661_v0  ;;  %v654_v44 = vadd.f32 %v1644_v48, %v653_v41  ;;  %v742_v45 = vpop.f32.mrf.mxu3  ;;  %v1336_v41 = vunpack.c.l.bf16 %v1432_v36 }
 0x108   : > { %v616_v47 = vpop.f32.mrf.mxu0 }
 0x109   : > { %v1366_v50 = vpack.c.bf16 %v866_v43, %v865_v42  ;;  %v743_v51 = vadd.f32 %v742_v45, %v654_v44  ;;  %v705_v52 = vpop.f32.mrf.mxu1  ;;  %v617_v54 = vadd.f32 %v1644_v48, %v616_v47  ;;  %v1337_v47 = vunpack.c.h.bf16 %v1432_v36 }
 0x10b   : > { %1437 = vst [vmem:[%s1671_s20 + $0x28] sm:$0xff] %v1366_v50   ;;  %v846_v53 = vadd.f32 %v1329_v46, %v743_v51  ;;  %v706_v60 = vadd.f32 %v705_v52, %v617_v54 }
 0x10d   : > { %v882_v57 = vmax.f32 %v846_v53, %v1661_v0  ;;  %v831_v6 = vadd.f32 %v1300_v61, %v706_v60 }
 0x10e   : > { %v656_v58 = vpop.f32.mrf.mxu2 }
 0x10f   : > { %v1406_v59 = vpack.c.bf16 %v882_v57, %v881_v56  ;;  %v745_v62 = vpop.f32.mrf.mxu3  ;;  %v657_v1 = vadd.f32 %v1644_v48, %v656_v58  ;;  %v867_v12 = vmax.f32 %v831_v6, %v1661_v0 }
 0x110   : > { %v618_v63 = vpop.f32.mrf.mxu0 }
 0x111   : > { %1445 = vst [vmem:[%s1671_s20 + $0x68] sm:$0xff] %v1406_v59   ;;  %v619_v2 = vadd.f32 %v1644_v48, %v618_v63  ;;  %v707_v3 = vpop.f32.mrf.mxu1  ;;  %v746_v8 = vadd.f32 %v745_v62, %v657_v1 }
 0x113   : > { %v708_v7 = vadd.f32 %v707_v3, %v619_v2  ;;  %v847_v18 = vadd.f32 %v1332_v9, %v746_v8 }
 0x115   : > { %v832_v10 = vadd.f32 %v1301_v4, %v708_v7  ;;  %v883_v25 = vmax.f32 %v847_v18, %v1661_v0 }
 0x116   : > { %v658_v11 = vpop.f32.mrf.mxu2 }
 0x117   : > { %v868_v13 = vmax.f32 %v832_v10, %v1661_v0  ;;  %v659_v14 = vadd.f32 %v1644_v48, %v658_v11  ;;  %v747_v15 = vpop.f32.mrf.mxu3 }
 0x118   : > { %v621_v17 = vpop.f32.mrf.mxu0 }
 0x119   : > { %v1371_v19 = vpack.c.bf16 %v868_v13, %v867_v12  ;;  %v748_v20 = vadd.f32 %v747_v15, %v659_v14  ;;  %v710_v21 = vpop.f32.mrf.mxu1  ;;  %v622_v23 = vadd.f32 %v1644_v48, %v621_v17 }
 0x11b   : > { %1438 = vst [vmem:[%s1671_s20 + $0x30] sm:$0xff] %v1371_v19   ;;  %v848_v22 = vadd.f32 %v1333_v16, %v748_v20  ;;  %v711_v29 = vadd.f32 %v710_v21, %v622_v23 }
 0x11d   : > { %v884_v26 = vmax.f32 %v848_v22, %v1661_v0  ;;  %v833_v38 = vadd.f32 %v1304_v30, %v711_v29 }
 0x11e   : > { %v661_v27 = vpop.f32.mrf.mxu2 }
 0x11f   : > { %v1411_v28 = vpack.c.bf16 %v884_v26, %v883_v25  ;;  %v750_v31 = vpop.f32.mrf.mxu3  ;;  %v662_v33 = vadd.f32 %v1644_v48, %v661_v27  ;;  %v869_v44 = vmax.f32 %v833_v38, %v1661_v0 }
 0x120   : > { %v623_v32 = vpop.f32.mrf.mxu0 }
 0x121   : > { %1446 = vst [vmem:[%s1671_s20 + $0x70] sm:$0xff] %v1411_v28   ;;  %v624_v34 = vadd.f32 %v1644_v48, %v623_v32  ;;  %v712_v37 = vpop.f32.mrf.mxu1  ;;  %v751_v40 = vadd.f32 %v750_v31, %v662_v33 }
 0x123   : > { %v713_v39 = vadd.f32 %v712_v37, %v624_v34  ;;  %v849_v50 = vadd.f32 %v1336_v41, %v751_v40 }
 0x125   : > { %v834_v42 = vadd.f32 %v1305_v35, %v713_v39  ;;  %v885_v54 = vmax.f32 %v849_v50, %v1661_v0 }
 0x126   : > { %v663_v43 = vpop.f32.mrf.mxu2 }
 0x127   : > { %v870_v45 = vmax.f32 %v834_v42, %v1661_v0  ;;  %v664_v46 = vadd.f32 %v1644_v48, %v663_v43  ;;  %v752_v49 = vpop.f32.mrf.mxu3 }
 0x129   : > { %v1376_v51 = vpack.c.bf16 %v870_v45, %v869_v44  ;;  %v753_v52 = vadd.f32 %v752_v49, %v664_v46 }
 0x12b   : > { %1439 = vst [vmem:[%s1671_s20 + $0x38] sm:$0xff] %v1376_v51   ;;  %v850_v53 = vadd.f32 %v1337_v47, %v753_v52 }
 0x12d   : > { %v886_v55 = vmax.f32 %v850_v53, %v1661_v0 }
 0x12f   : > { %v1416_v56 = vpack.c.bf16 %v886_v55, %v885_v54 }
 0x131   : > { %1447 = vst [vmem:[%s1671_s20 + $0x78] sm:$0xff] %v1416_v56  }
 0x132 PF: > { %s15_s18 = sadd.s32 1, %s1480_s18  }
 0x133   : > { %p12_p4 = scmp.ge.s32.totalorder %s15_s18, 4  }
 0x135   :  { %14 = sbr.rel (!%p12_p4) target bundleno = 1 (0x1), region = 73 }

// kernel: _lambda_.12
= control target key start
LH: loop header
LB: loop body
LE: loop exit
PB: predicated region body
PF: predicated region fallthrough
CT: control target
= control target key end

     0   :  { %s1260_s1 = inlined_call_operand.vmem [shape: bf16[256,256], index: 1, kind: input, shape index: {}]   ;;  %s1261_s0 = inlined_call_operand.vmem [shape: bf16[128,256], index: 0, kind: input, shape index: {}]   ;;  %s1262_s2 = inlined_call_operand.vmem [shape: f32[1,256], index: 2, kind: input, shape index: {}]   ;;  %s1263_s3 = inlined_call_operand.vmem [shape: f32[1,256], index: 3, kind: input, shape index: {}]   ;;  %s1264_s4 = inlined_call_operand.vmem [shape: bf16[128,256], index: 4, kind: output, shape index: {}]  }
   0x1   :  { %v703_v0 = vld [vmem:[%s1260_s1 + $0x70] sm:$0xf]  ;;  %v804_v1 = vld [vmem:[%s1260_s1 + $0x74] sm:$0xf0]  ;;  %v803_v5 = vld [vmem:[%s1260_s1 + $0x74] sm:$0xf] }
   0x2   :  { %v767_v2 = vld [vmem:[%s1260_s1 + $0xf0] sm:$0xf]  ;;  %v704_v3 = vor.u32 %v804_v1, %v703_v0  ;;  %v820_v4 = vld [vmem:[%s1260_s1 + $0xf4] sm:$0xf0]  ;;  %v705_v6 = vld [vmem:[%s1260_s1 + $0x78] sm:$0xf0] }
   0x3   :  { %v768_v7 = vor.u32 %v820_v4, %v767_v2  ;;  %v708_v8 = vor.u32 %v803_v5, %v705_v6  ;;  %v819_v9 = vld [vmem:[%s1260_s1 + $0xf4] sm:$0xf]  ;;  %v769_v10 = vld [vmem:[%s1260_s1 + $0xf8] sm:$0xf0]  ;;  %v695_v11 = vld [vmem:[%s1260_s1 + $0x60] sm:$0xf] }
   0x4   :  { %311 = vmatpush.bf16.msra.mxu0 %v704_v3  ;;  %v772_v12 = vor.u32 %v819_v9, %v769_v10  ;;  %v802_v13 = vld [vmem:[%s1260_s1 + $0x64] sm:$0xf0]  ;;  %v759_v14 = vld [vmem:[%s1260_s1 + $0xe0] sm:$0xf]  ;;  %v801_v18 = vld [vmem:[%s1260_s1 + $0x64] sm:$0xf] }
   0x5   :  { %v818_v15 = vld [vmem:[%s1260_s1 + $0xe4] sm:$0xf0]  ;;  %360 = vmatpush.bf16.msra.mxu1 %v768_v7  ;;  %409 = vmatpush.bf16.msra.mxu2 %v708_v8  ;;  %v696_v16 = vor.u32 %v802_v13, %v695_v11  ;;  %v697_v19 = vld [vmem:[%s1260_s1 + $0x68] sm:$0xf0]  ;;  %v817_v20 = vld [vmem:[%s1260_s1 + $0xe4] sm:$0xf] }
   0x6   :  { %v760_v17 = vor.u32 %v818_v15, %v759_v14  ;;  %458 = vmatpush.bf16.msra.mxu3 %v772_v12  ;;  %v700_v21 = vor.u32 %v801_v18, %v697_v19  ;;  %v761_v22 = vld [vmem:[%s1260_s1 + $0xe8] sm:$0xf0]  ;;  %v687_v23 = vld [vmem:[%s1260_s1 + $0x50] sm:$0xf]  ;;  %v800_v24 = vld [vmem:[%s1260_s1 + $0x54] sm:$0xf0] }
   0x7   :  { %v764_v25 = vor.u32 %v817_v20, %v761_v22  ;;  %v751_v26 = vld [vmem:[%s1260_s1 + $0xd0] sm:$0xf]  ;;  %v816_v27 = vld [vmem:[%s1260_s1 + $0xd4] sm:$0xf0]  ;;  %v799_v28 = vld [vmem:[%s1260_s1 + $0x54] sm:$0xf]  ;;  %v688_v29 = vor.u32 %v800_v24, %v687_v23 }
   0x8   :  { %312 = vmatpush.bf16.msra.mxu0 %v696_v16  ;;  %v689_v30 = vld [vmem:[%s1260_s1 + $0x58] sm:$0xf0]  ;;  %v815_v31 = vld [vmem:[%s1260_s1 + $0xd4] sm:$0xf]  ;;  %v752_v33 = vor.u32 %v816_v27, %v751_v26  ;;  %v679_v35 = vld [vmem:[%s1260_s1 + $0x40] sm:$0xf] }
   0x9   :  { %v753_v32 = vld [vmem:[%s1260_s1 + $0xd8] sm:$0xf0]  ;;  %361 = vmatpush.bf16.msra.mxu1 %v760_v17  ;;  %410 = vmatpush.bf16.msra.mxu2 %v700_v21  ;;  %v692_v34 = vor.u32 %v799_v28, %v689_v30  ;;  %v798_v36 = vld [vmem:[%s1260_s1 + $0x44] sm:$0xf0]  ;;  %v743_v37 = vld [vmem:[%s1260_s1 + $0xc0] sm:$0xf] }
   0xa   :  { %459 = vmatpush.bf16.msra.mxu3 %v764_v25  ;;  %v756_v38 = vor.u32 %v815_v31, %v753_v32  ;;  %v814_v39 = vld [vmem:[%s1260_s1 + $0xc4] sm:$0xf0]  ;;  %v797_v40 = vld [vmem:[%s1260_s1 + $0x44] sm:$0xf]  ;;  %v681_v41 = vld [vmem:[%s1260_s1 + $0x48] sm:$0xf0]  ;;  %v680_v44 = vor.u32 %v798_v36, %v679_v35 }
   0xb   :  { %v813_v42 = vld [vmem:[%s1260_s1 + $0xc4] sm:$0xf]  ;;  %v745_v43 = vld [vmem:[%s1260_s1 + $0xc8] sm:$0xf0]  ;;  %v744_v45 = vor.u32 %v814_v39, %v743_v37  ;;  %v684_v46 = vor.u32 %v797_v40, %v681_v41  ;;  %v671_v47 = vld [vmem:[%s1260_s1 + $0x30] sm:$0xf] }
   0xc   :  { %313 = vmatpush.bf16.msra.mxu0 %v688_v29  ;;  %v796_v48 = vld [vmem:[%s1260_s1 + $0x34] sm:$0xf0]  ;;  %v735_v49 = vld [vmem:[%s1260_s1 + $0xb0] sm:$0xf]  ;;  %v748_v50 = vor.u32 %v813_v42, %v745_v43  ;;  %v795_v52 = vld [vmem:[%s1260_s1 + $0x34] sm:$0xf] }
   0xd   :  { %362 = vmatpush.bf16.msra.mxu1 %v752_v33  ;;  %411 = vmatpush.bf16.msra.mxu2 %v692_v34  ;;  %v812_v51 = vld [vmem:[%s1260_s1 + $0xb4] sm:$0xf0]  ;;  %v673_v53 = vld [vmem:[%s1260_s1 + $0x38] sm:$0xf0]  ;;  %v811_v54 = vld [vmem:[%s1260_s1 + $0xb4] sm:$0xf]  ;;  %v672_v56 = vor.u32 %v796_v48, %v671_v47 }
   0xe   :  { %460 = vmatpush.bf16.msra.mxu3 %v756_v38  ;;  %v737_v55 = vld [vmem:[%s1260_s1 + $0xb8] sm:$0xf0]  ;;  %v736_v57 = vor.u32 %v812_v51, %v735_v49  ;;  %v676_v58 = vor.u32 %v795_v52, %v673_v53  ;;  %v663_v59 = vld [vmem:[%s1260_s1 + $0x20] sm:$0xf]  ;;  %v794_v60 = vld [vmem:[%s1260_s1 + $0x24] sm:$0xf0] }
   0xf   :  { %v727_v61 = vld [vmem:[%s1260_s1 + $0xa0] sm:$0xf]  ;;  %v740_v62 = vor.u32 %v811_v54, %v737_v55  ;;  %v810_v63 = vld [vmem:[%s1260_s1 + $0xa4] sm:$0xf0]  ;;  %v793_v0 = vld [vmem:[%s1260_s1 + $0x24] sm:$0xf]  ;;  %v664_v4 = vor.u32 %v794_v60, %v663_v59 }
  0x10   :  { %314 = vmatpush.bf16.msra.mxu0 %v680_v44  ;;  %v665_v1 = vld [vmem:[%s1260_s1 + $0x28] sm:$0xf0]  ;;  %v809_v2 = vld [vmem:[%s1260_s1 + $0xa4] sm:$0xf]  ;;  %v728_v5 = vor.u32 %v810_v63, %v727_v61  ;;  %v655_v7 = vld [vmem:[%s1260_s1 + $0x10] sm:$0xf] }
  0x11   :  { %363 = vmatpush.bf16.msra.mxu1 %v744_v45  ;;  %412 = vmatpush.bf16.msra.mxu2 %v684_v46  ;;  %v729_v3 = vld [vmem:[%s1260_s1 + $0xa8] sm:$0xf0]  ;;  %v668_v6 = vor.u32 %v793_v0, %v665_v1  ;;  %v792_v8 = vld [vmem:[%s1260_s1 + $0x14] sm:$0xf0]  ;;  %v719_v9 = vld [vmem:[%s1260_s1 + $0x90] sm:$0xf] }
  0x12   :  { %461 = vmatpush.bf16.msra.mxu3 %v748_v50  ;;  %v732_v10 = vor.u32 %v809_v2, %v729_v3  ;;  %v808_v11 = vld [vmem:[%s1260_s1 + $0x94] sm:$0xf0]  ;;  %v791_v12 = vld [vmem:[%s1260_s1 + $0x14] sm:$0xf]  ;;  %v657_v13 = vld [vmem:[%s1260_s1 + $0x18] sm:$0xf0]  ;;  %v656_v16 = vor.u32 %v792_v8, %v655_v7 }
  0x13   :  { %v807_v14 = vld [vmem:[%s1260_s1 + $0x94] sm:$0xf]  ;;  %v721_v15 = vld [vmem:[%s1260_s1 + $0x98] sm:$0xf0]  ;;  %v720_v17 = vor.u32 %v808_v11, %v719_v9  ;;  %v660_v18 = vor.u32 %v791_v12, %v657_v13  ;;  %v647_v19 = vld [vmem:[%s1260_s1] sm:$0xf] }
  0x14   :  { %315 = vmatpush.bf16.msra.mxu0 %v672_v56  ;;  %v790_v20 = vld [vmem:[%s1260_s1 + $0x4] sm:$0xf0]  ;;  %v711_v21 = vld [vmem:[%s1260_s1 + $0x80] sm:$0xf]  ;;  %v724_v22 = vor.u32 %v807_v14, %v721_v15  ;;  %v789_v24 = vld [vmem:[%s1260_s1 + $0x4] sm:$0xf] }
  0x15   :  { %364 = vmatpush.bf16.msra.mxu1 %v736_v57  ;;  %413 = vmatpush.bf16.msra.mxu2 %v676_v58  ;;  %v806_v23 = vld [vmem:[%s1260_s1 + $0x84] sm:$0xf0]  ;;  %v649_v25 = vld [vmem:[%s1260_s1 + $0x8] sm:$0xf0]  ;;  %v805_v26 = vld [vmem:[%s1260_s1 + $0x84] sm:$0xf]  ;;  %v648_v28 = vor.u32 %v790_v20, %v647_v19 }
  0x16   :  { %462 = vmatpush.bf16.msra.mxu3 %v740_v62  ;;  %v713_v27 = vld [vmem:[%s1260_s1 + $0x88] sm:$0xf0]  ;;  %v583_v29 = vld [vmem:[%s1261_s0] sm:$0xf]  ;;  %v774_v30 = vld [vmem:[%s1261_s0 + $0x4] sm:$0xf0]  ;;  %v712_v31 = vor.u32 %v806_v23, %v711_v21  ;;  %v652_v32 = vor.u32 %v789_v24, %v649_v25 }
  0x17   :  { %v773_v33 = vld [vmem:[%s1261_s0 + $0x4] sm:$0xf]  ;;  %v585_v34 = vld [vmem:[%s1261_s0 + $0x8] sm:$0xf0]  ;;  %v716_v35 = vor.u32 %v805_v26, %v713_v27  ;;  %v584_v36 = vor.u32 %v774_v30, %v583_v29  ;;  %v591_v38 = vld [vmem:[%s1261_s0 + $0x10] sm:$0xf] }
  0x18   :  { %316 = vmatpush.bf16.msra.mxu0 %v664_v4  ;;  %v588_v37 = vor.u32 %v773_v33, %v585_v34  ;;  %v776_v39 = vld [vmem:[%s1261_s0 + $0x14] sm:$0xf0]  ;;  %v775_v40 = vld [vmem:[%s1261_s0 + $0x14] sm:$0xf]  ;;  %v593_v41 = vld [vmem:[%s1261_s0 + $0x18] sm:$0xf0] }
  0x19   :  { %365 = vmatpush.bf16.msra.mxu1 %v728_v5  ;;  %414 = vmatpush.bf16.msra.mxu2 %v668_v6  ;;  %v592_v42 = vor.u32 %v776_v39, %v591_v38  ;;  %v596_v43 = vor.u32 %v775_v40, %v593_v41  ;;  %v599_v44 = vld [vmem:[%s1261_s0 + $0x20] sm:$0xf]  ;;  %v778_v45 = vld [vmem:[%s1261_s0 + $0x24] sm:$0xf0]  ;;  %v777_v46 = vld [vmem:[%s1261_s0 + $0x24] sm:$0xf] }
  0x1a   :  { %463 = vmatpush.bf16.msra.mxu3 %v732_v10  ;;  %v601_v47 = vld [vmem:[%s1261_s0 + $0x28] sm:$0xf0]  ;;  %v600_v48 = vor.u32 %v778_v45, %v599_v44  ;;  %v607_v50 = vld [vmem:[%s1261_s0 + $0x30] sm:$0xf]  ;;  %v780_v51 = vld [vmem:[%s1261_s0 + $0x34] sm:$0xf0] }
  0x1b   :  { %v604_v49 = vor.u32 %v777_v46, %v601_v47  ;;  %v779_v52 = vld [vmem:[%s1261_s0 + $0x34] sm:$0xf]  ;;  %v609_v53 = vld [vmem:[%s1261_s0 + $0x38] sm:$0xf0]  ;;  %v608_v54 = vor.u32 %v780_v51, %v607_v50  ;;  %v615_v56 = vld [vmem:[%s1261_s0 + $0x40] sm:$0xf] }
  0x1c   :  { %317 = vmatpush.bf16.msra.mxu0 %v656_v16  ;;  %v612_v55 = vor.u32 %v779_v52, %v609_v53  ;;  %v782_v57 = vld [vmem:[%s1261_s0 + $0x44] sm:$0xf0]  ;;  %v781_v58 = vld [vmem:[%s1261_s0 + $0x44] sm:$0xf]  ;;  %v617_v59 = vld [vmem:[%s1261_s0 + $0x48] sm:$0xf0] }
  0x1d   :  { %366 = vmatpush.bf16.msra.mxu1 %v720_v17  ;;  %415 = vmatpush.bf16.msra.mxu2 %v660_v18  ;;  %v616_v60 = vor.u32 %v782_v57, %v615_v56  ;;  %v620_v61 = vor.u32 %v781_v58, %v617_v59  ;;  %v623_v62 = vld [vmem:[%s1261_s0 + $0x50] sm:$0xf]  ;;  %v784_v63 = vld [vmem:[%s1261_s0 + $0x54] sm:$0xf0]  ;;  %v783_v0 = vld [vmem:[%s1261_s0 + $0x54] sm:$0xf] }
  0x1e   :  { %464 = vmatpush.bf16.msra.mxu3 %v724_v22  ;;  %v625_v1 = vld [vmem:[%s1261_s0 + $0x58] sm:$0xf0]  ;;  %v624_v2 = vor.u32 %v784_v63, %v623_v62  ;;  %v631_v4 = vld [vmem:[%s1261_s0 + $0x60] sm:$0xf]  ;;  %v786_v5 = vld [vmem:[%s1261_s0 + $0x64] sm:$0xf0] }
  0x1f   :  { %v628_v3 = vor.u32 %v783_v0, %v625_v1  ;;  %v785_v6 = vld [vmem:[%s1261_s0 + $0x64] sm:$0xf]  ;;  %v633_v7 = vld [vmem:[%s1261_s0 + $0x68] sm:$0xf0]  ;;  %v632_v8 = vor.u32 %v786_v5, %v631_v4  ;;  %v639_v10 = vld [vmem:[%s1261_s0 + $0x70] sm:$0xf] }
  0x20   :  { %318 = vmatpush.bf16.msra.mxu0 %v648_v28  ;;  %v636_v9 = vor.u32 %v785_v6, %v633_v7  ;;  %v788_v11 = vld [vmem:[%s1261_s0 + $0x74] sm:$0xf0]  ;;  %v787_v12 = vld [vmem:[%s1261_s0 + $0x74] sm:$0xf]  ;;  %v641_v13 = vld [vmem:[%s1261_s0 + $0x78] sm:$0xf0] }
  0x21   :  { %367 = vmatpush.bf16.msra.mxu1 %v712_v31  ;;  %416 = vmatpush.bf16.msra.mxu2 %v652_v32  ;;  %v640_v14 = vor.u32 %v788_v11, %v639_v10  ;;  %v644_v15 = vor.u32 %v787_v12, %v641_v13  ;;  %v65_v16 = vld [vmem:[%s1262_s2] sm:$0x3] }
  0x22   :  { %465 = vmatpush.bf16.msra.mxu3 %v716_v35  ;;  %v1137_v17 = vperm.slane %v65_v16, 0  ;;  %v507_v21 = vld [vmem:[%s1263_s3] sm:$0x3]  ;;  %v1143_v22 = vperm.slane %v65_v16, 1 }
  0x23   :  { %319 = vmatmul.bf16.vlgmr.msra.gmra.mxu0 %v584_v36  ;;  %v1145_v24 = vperm.slane %v507_v21, 0  ;;  %v1148_v28 = vperm.slane %v507_v21, 1 }
  0x24   :  { %368 = vmatmul.bf16.vlgmr.msra.gmra.mxu1 %v588_v37  ;;  %417 = vmatmul.bf16.vlgmr.msra.gmra.mxu2 %v584_v36 }
  0x25   :  { %466 = vmatmul.bf16.vlgmr.msra.gmra.mxu3 %v588_v37 }
  0x33   :  { %324 = vmatmul.bf16.gmra.mxu0 %v592_v42 }
  0x34   :  { %373 = vmatmul.bf16.gmra.mxu1 %v596_v43  ;;  %422 = vmatmul.bf16.gmra.mxu2 %v592_v42 }
  0x35   :  { %471 = vmatmul.bf16.gmra.mxu3 %v596_v43 }
  0x43   :  { %329 = vmatmul.bf16.gmra.mxu0 %v600_v48 }
  0x44   :  { %378 = vmatmul.bf16.gmra.mxu1 %v604_v49  ;;  %427 = vmatmul.bf16.gmra.mxu2 %v600_v48 }
  0x45   :  { %476 = vmatmul.bf16.gmra.mxu3 %v604_v49 }
  0x53   :  { %334 = vmatmul.bf16.gmra.mxu0 %v608_v54 }
  0x54   :  { %383 = vmatmul.bf16.gmra.mxu1 %v612_v55  ;;  %432 = vmatmul.bf16.gmra.mxu2 %v608_v54 }
  0x55   :  { %481 = vmatmul.bf16.gmra.mxu3 %v612_v55 }
  0x63   :  { %339 = vmatmul.bf16.gmra.mxu0 %v616_v60 }
  0x64   :  { %388 = vmatmul.bf16.gmra.mxu1 %v620_v61  ;;  %437 = vmatmul.bf16.gmra.mxu2 %v616_v60 }
  0x65   :  { %486 = vmatmul.bf16.gmra.mxu3 %v620_v61 }
  0x73   :  { %344 = vmatmul.bf16.gmra.mxu0 %v624_v2 }
  0x74   :  { %393 = vmatmul.bf16.gmra.mxu1 %v628_v3  ;;  %442 = vmatmul.bf16.gmra.mxu2 %v624_v2 }
  0x75   :  { %491 = vmatmul.bf16.gmra.mxu3 %v628_v3 }
  0x83   :  { %349 = vmatmul.bf16.gmra.mxu0 %v632_v8 }
  0x84   :  { %398 = vmatmul.bf16.gmra.mxu1 %v636_v9  ;;  %447 = vmatmul.bf16.gmra.mxu2 %v632_v8 }
  0x85   :  { %496 = vmatmul.bf16.gmra.mxu3 %v636_v9 }
  0x93   :  { %354 = vmatmul.bf16.gmra.mxu0 %v640_v14 }
  0x94   :  { %403 = vmatmul.bf16.gmra.mxu1 %v644_v15  ;;  %452 = vmatmul.bf16.gmra.mxu2 %v640_v14 }
  0x95   :  { %501 = vmatmul.bf16.gmra.mxu3 %v644_v15 }
  0xa0   :  { %v320_v18 = vpop.f32.mrf.mxu0 }
  0xa1   :  { %v369_v19 = vpop.f32.mrf.mxu1  ;;  %v321_v20 = vadd.f32 %v320_v18, %v1137_v17 }
  0xa3   :  { %v370_v23 = vadd.f32 %v369_v19, %v321_v20 }
  0xa5   :  { %v513_v31 = vmax.f32 %v370_v23, %v1145_v24 }
  0xa7   :  { %v418_v25 = vpop.f32.mrf.mxu2 }
  0xa8   :  { %v419_v26 = vadd.f32 %v418_v25, %v1143_v22  ;;  %v467_v27 = vpop.f32.mrf.mxu3  ;;  %v322_v29 = vpop.f32.mrf.mxu0 }
  0xa9   :  { %v371_v30 = vpop.f32.mrf.mxu1  ;;  %v323_v34 = vadd.f32 %v322_v29, %v1137_v17 }
  0xaa   :  { %v468_v32 = vadd.f32 %v467_v27, %v419_v26 }
  0xab   :  { %v372_v37 = vadd.f32 %v371_v30, %v323_v34 }
  0xac   :  { %v514_v33 = vmax.f32 %v468_v32, %v1148_v28 }
  0xad   :  { %v515_v44 = vmax.f32 %v372_v37, %v1145_v24 }
  0xae   :  { %v545_v35 = vpack.c.bf16 %v514_v33, %v513_v31 }
  0xaf   :  { %v420_v36 = vpop.f32.mrf.mxu2 }
  0xb0   :  { %561 = vst [vmem:[%s1264_s4] sm:$0xff] %v545_v35  ;;  %v421_v38 = vadd.f32 %v420_v36, %v1143_v22  ;;  %v469_v39 = vpop.f32.mrf.mxu3  ;;  %v325_v40 = vpop.f32.mrf.mxu0 }
  0xb1   :  { %v374_v41 = vpop.f32.mrf.mxu1  ;;  %v326_v43 = vadd.f32 %v325_v40, %v1137_v17 }
  0xb2   :  { %v470_v42 = vadd.f32 %v469_v39, %v421_v38 }
  0xb3   :  { %v375_v47 = vadd.f32 %v374_v41, %v326_v43 }
  0xb4   :  { %v516_v45 = vmax.f32 %v470_v42, %v1148_v28 }
  0xb5   :  { %v517_v53 = vmax.f32 %v375_v47, %v1145_v24 }
  0xb6   :  { %v546_v46 = vpack.c.bf16 %v516_v45, %v515_v44 }
  0xb7   :  { %v423_v48 = vpop.f32.mrf.mxu2 }
  0xb8   :  { %562 = vst [vmem:[%s1264_s4 + $0x8] sm:$0xff] %v546_v46  ;;  %v424_v49 = vadd.f32 %v423_v48, %v1143_v22  ;;  %v472_v50 = vpop.f32.mrf.mxu3  ;;  %v327_v51 = vpop.f32.mrf.mxu0 }
  0xb9   :  { %v376_v52 = vpop.f32.mrf.mxu1  ;;  %v328_v56 = vadd.f32 %v327_v51, %v1137_v17 }
  0xba   :  { %v473_v54 = vadd.f32 %v472_v50, %v424_v49 }
  0xbb   :  { %v377_v59 = vadd.f32 %v376_v52, %v328_v56 }
  0xbc   :  { %v518_v55 = vmax.f32 %v473_v54, %v1148_v28 }
  0xbd   :  { %v519_v2 = vmax.f32 %v377_v59, %v1145_v24 }
  0xbe   :  { %v547_v57 = vpack.c.bf16 %v518_v55, %v517_v53 }
  0xbf   :  { %v425_v58 = vpop.f32.mrf.mxu2 }
  0xc0   :  { %563 = vst [vmem:[%s1264_s4 + $0x10] sm:$0xff] %v547_v57  ;;  %v426_v60 = vadd.f32 %v425_v58, %v1143_v22  ;;  %v474_v61 = vpop.f32.mrf.mxu3  ;;  %v330_v62 = vpop.f32.mrf.mxu0 }
  0xc1   :  { %v379_v63 = vpop.f32.mrf.mxu1  ;;  %v331_v1 = vadd.f32 %v330_v62, %v1137_v17 }
  0xc2   :  { %v475_v0 = vadd.f32 %v474_v61, %v426_v60 }
  0xc3   :  { %v380_v5 = vadd.f32 %v379_v63, %v331_v1 }
  0xc4   :  { %v520_v3 = vmax.f32 %v475_v0, %v1148_v28 }
  0xc5   :  { %v521_v11 = vmax.f32 %v380_v5, %v1145_v24 }
  0xc6   :  { %v548_v4 = vpack.c.bf16 %v520_v3, %v519_v2 }
  0xc7   :  { %v428_v6 = vpop.f32.mrf.mxu2 }
  0xc8   :  { %564 = vst [vmem:[%s1264_s4 + $0x18] sm:$0xff] %v548_v4  ;;  %v429_v7 = vadd.f32 %v428_v6, %v1143_v22  ;;  %v477_v8 = vpop.f32.mrf.mxu3  ;;  %v332_v9 = vpop.f32.mrf.mxu0 }
  0xc9   :  { %v381_v10 = vpop.f32.mrf.mxu1  ;;  %v333_v14 = vadd.f32 %v332_v9, %v1137_v17 }
  0xca   :  { %v478_v12 = vadd.f32 %v477_v8, %v429_v7 }
  0xcb   :  { %v382_v18 = vadd.f32 %v381_v10, %v333_v14 }
  0xcc   :  { %v522_v13 = vmax.f32 %v478_v12, %v1148_v28 }
  0xcd   :  { %v523_v27 = vmax.f32 %v382_v18, %v1145_v24 }
  0xce   :  { %v549_v15 = vpack.c.bf16 %v522_v13, %v521_v11 }
  0xcf   :  { %v430_v16 = vpop.f32.mrf.mxu2 }
  0xd0   :  { %565 = vst [vmem:[%s1264_s4 + $0x20] sm:$0xff] %v549_v15  ;;  %v431_v19 = vadd.f32 %v430_v16, %v1143_v22  ;;  %v479_v20 = vpop.f32.mrf.mxu3  ;;  %v335_v21 = vpop.f32.mrf.mxu0 }
  0xd1   :  { %v384_v23 = vpop.f32.mrf.mxu1  ;;  %v336_v26 = vadd.f32 %v335_v21, %v1137_v17 }
  0xd2   :  { %v480_v25 = vadd.f32 %v479_v20, %v431_v19 }
  0xd3   :  { %v385_v31 = vadd.f32 %v384_v23, %v336_v26 }
  0xd4   :  { %v524_v29 = vmax.f32 %v480_v25, %v1148_v28 }
  0xd5   :  { %v525_v37 = vmax.f32 %v385_v31, %v1145_v24 }
  0xd6   :  { %v550_v30 = vpack.c.bf16 %v524_v29, %v523_v27 }
  0xd7   :  { %v433_v32 = vpop.f32.mrf.mxu2 }
  0xd8   :  { %566 = vst [vmem:[%s1264_s4 + $0x28] sm:$0xff] %v550_v30  ;;  %v434_v33 = vadd.f32 %v433_v32, %v1143_v22  ;;  %v482_v34 = vpop.f32.mrf.mxu3  ;;  %v337_v35 = vpop.f32.mrf.mxu0 }
  0xd9   :  { %v386_v36 = vpop.f32.mrf.mxu1  ;;  %v338_v40 = vadd.f32 %v337_v35, %v1137_v17 }
  0xda   :  { %v483_v38 = vadd.f32 %v482_v34, %v434_v33 }
  0xdb   :  { %v387_v43 = vadd.f32 %v386_v36, %v338_v40 }
  0xdc   :  { %v526_v39 = vmax.f32 %v483_v38, %v1148_v28 }
  0xdd   :  { %v527_v50 = vmax.f32 %v387_v43, %v1145_v24 }
  0xde   :  { %v551_v41 = vpack.c.bf16 %v526_v39, %v525_v37 }
  0xdf   :  { %v435_v42 = vpop.f32.mrf.mxu2 }
  0xe0   :  { %567 = vst [vmem:[%s1264_s4 + $0x30] sm:$0xff] %v551_v41  ;;  %v436_v44 = vadd.f32 %v435_v42, %v1143_v22  ;;  %v484_v45 = vpop.f32.mrf.mxu3  ;;  %v340_v46 = vpop.f32.mrf.mxu0 }
  0xe1   :  { %v389_v47 = vpop.f32.mrf.mxu1  ;;  %v341_v49 = vadd.f32 %v340_v46, %v1137_v17 }
  0xe2   :  { %v485_v48 = vadd.f32 %v484_v45, %v436_v44 }
  0xe3   :  { %v390_v53 = vadd.f32 %v389_v47, %v341_v49 }
  0xe4   :  { %v528_v51 = vmax.f32 %v485_v48, %v1148_v28 }
  0xe5   :  { %v529_v59 = vmax.f32 %v390_v53, %v1145_v24 }
  0xe6   :  { %v552_v52 = vpack.c.bf16 %v528_v51, %v527_v50 }
  0xe7   :  { %v438_v54 = vpop.f32.mrf.mxu2 }
  0xe8   :  { %568 = vst [vmem:[%s1264_s4 + $0x38] sm:$0xff] %v552_v52  ;;  %v439_v55 = vadd.f32 %v438_v54, %v1143_v22  ;;  %v487_v56 = vpop.f32.mrf.mxu3  ;;  %v342_v57 = vpop.f32.mrf.mxu0 }
  0xe9   :  { %v391_v58 = vpop.f32.mrf.mxu1  ;;  %v343_v62 = vadd.f32 %v342_v57, %v1137_v17 }
  0xea   :  { %v488_v60 = vadd.f32 %v487_v56, %v439_v55 }
  0xeb   :  { %v392_v1 = vadd.f32 %v391_v58, %v343_v62 }
  0xec   :  { %v530_v61 = vmax.f32 %v488_v60, %v1148_v28 }
  0xed   :  { %v531_v8 = vmax.f32 %v392_v1, %v1145_v24 }
  0xee   :  { %v553_v63 = vpack.c.bf16 %v530_v61, %v529_v59 }
  0xef   :  { %v440_v0 = vpop.f32.mrf.mxu2 }
  0xf0   :  { %569 = vst [vmem:[%s1264_s4 + $0x40] sm:$0xff] %v553_v63  ;;  %v441_v2 = vadd.f32 %v440_v0, %v1143_v22  ;;  %v489_v3 = vpop.f32.mrf.mxu3  ;;  %v345_v4 = vpop.f32.mrf.mxu0 }
  0xf1   :  { %v394_v5 = vpop.f32.mrf.mxu1  ;;  %v346_v7 = vadd.f32 %v345_v4, %v1137_v17 }
  0xf2   :  { %v490_v6 = vadd.f32 %v489_v3, %v441_v2 }
  0xf3   :  { %v395_v11 = vadd.f32 %v394_v5, %v346_v7 }
  0xf4   :  { %v532_v9 = vmax.f32 %v490_v6, %v1148_v28 }
  0xf5   :  { %v533_v18 = vmax.f32 %v395_v11, %v1145_v24 }
  0xf6   :  { %v554_v10 = vpack.c.bf16 %v532_v9, %v531_v8 }
  0xf7   :  { %v443_v12 = vpop.f32.mrf.mxu2 }
  0xf8   :  { %570 = vst [vmem:[%s1264_s4 + $0x48] sm:$0xff] %v554_v10  ;;  %v444_v13 = vadd.f32 %v443_v12, %v1143_v22  ;;  %v492_v14 = vpop.f32.mrf.mxu3  ;;  %v347_v15 = vpop.f32.mrf.mxu0 }
  0xf9   :  { %v396_v16 = vpop.f32.mrf.mxu1  ;;  %v348_v21 = vadd.f32 %v347_v15, %v1137_v17 }
  0xfa   :  { %v493_v19 = vadd.f32 %v492_v14, %v444_v13 }
  0xfb   :  { %v397_v26 = vadd.f32 %v396_v16, %v348_v21 }
  0xfc   :  { %v534_v20 = vmax.f32 %v493_v19, %v1148_v28 }
  0xfd   :  { %v535_v34 = vmax.f32 %v397_v26, %v1145_v24 }
  0xfe   :  { %v555_v23 = vpack.c.bf16 %v534_v20, %v533_v18 }
  0xff   :  { %v445_v25 = vpop.f32.mrf.mxu2 }
 0x100   :  { %571 = vst [vmem:[%s1264_s4 + $0x50] sm:$0xff] %v555_v23  ;;  %v446_v27 = vadd.f32 %v445_v25, %v1143_v22  ;;  %v494_v29 = vpop.f32.mrf.mxu3  ;;  %v350_v30 = vpop.f32.mrf.mxu0 }
 0x101   :  { %v399_v31 = vpop.f32.mrf.mxu1  ;;  %v351_v33 = vadd.f32 %v350_v30, %v1137_v17 }
 0x102   :  { %v495_v32 = vadd.f32 %v494_v29, %v446_v27 }
 0x103   :  { %v400_v37 = vadd.f32 %v399_v31, %v351_v33 }
 0x104   :  { %v536_v35 = vmax.f32 %v495_v32, %v1148_v28 }
 0x105   :  { %v537_v42 = vmax.f32 %v400_v37, %v1145_v24 }
 0x106   :  { %v556_v36 = vpack.c.bf16 %v536_v35, %v535_v34 }
 0x107   :  { %v448_v38 = vpop.f32.mrf.mxu2 }
 0x108   :  { %572 = vst [vmem:[%s1264_s4 + $0x58] sm:$0xff] %v556_v36  ;;  %v449_v39 = vadd.f32 %v448_v38, %v1143_v22  ;;  %v497_v40 = vpop.f32.mrf.mxu3  ;;  %v352_v41 = vpop.f32.mrf.mxu0 }
 0x109   :  { %v401_v44 = vpop.f32.mrf.mxu1  ;;  %v353_v46 = vadd.f32 %v352_v41, %v1137_v17 }
 0x10a   :  { %v498_v43 = vadd.f32 %v497_v40, %v449_v39 }
 0x10b   :  { %v402_v49 = vadd.f32 %v401_v44, %v353_v46 }
 0x10c   :  { %v538_v45 = vmax.f32 %v498_v43, %v1148_v28 }
 0x10d   :  { %v539_v55 = vmax.f32 %v402_v49, %v1145_v24 }
 0x10e   :  { %v557_v47 = vpack.c.bf16 %v538_v45, %v537_v42 }
 0x10f   :  { %v450_v48 = vpop.f32.mrf.mxu2 }
 0x110   :  { %573 = vst [vmem:[%s1264_s4 + $0x60] sm:$0xff] %v557_v47  ;;  %v451_v50 = vadd.f32 %v450_v48, %v1143_v22  ;;  %v499_v51 = vpop.f32.mrf.mxu3  ;;  %v355_v52 = vpop.f32.mrf.mxu0 }
 0x111   :  { %v356_v54 = vadd.f32 %v355_v52, %v1137_v17  ;;  %v404_v57 = vpop.f32.mrf.mxu1 }
 0x112   :  { %v500_v53 = vadd.f32 %v499_v51, %v451_v50 }
 0x113   :  { %v405_v59 = vadd.f32 %v404_v57, %v356_v54 }
 0x114   :  { %v540_v56 = vmax.f32 %v500_v53, %v1148_v28 }
 0x115   :  { %v541_v0 = vmax.f32 %v405_v59, %v1145_v24 }
 0x116   :  { %v558_v58 = vpack.c.bf16 %v540_v56, %v539_v55 }
 0x117   :  { %v453_v60 = vpop.f32.mrf.mxu2 }
 0x118   :  { %574 = vst [vmem:[%s1264_s4 + $0x68] sm:$0xff] %v558_v58  ;;  %v454_v61 = vadd.f32 %v453_v60, %v1143_v22  ;;  %v502_v62 = vpop.f32.mrf.mxu3  ;;  %v357_v63 = vpop.f32.mrf.mxu0 }
 0x119   :  { %v358_v3 = vadd.f32 %v357_v63, %v1137_v17  ;;  %v406_v5 = vpop.f32.mrf.mxu1 }
 0x11a   :  { %v503_v1 = vadd.f32 %v502_v62, %v454_v61 }
 0x11b   :  { %v407_v7 = vadd.f32 %v406_v5, %v358_v3 }
 0x11c   :  { %v542_v2 = vmax.f32 %v503_v1, %v1148_v28 }
 0x11d   :  { %v543_v11 = vmax.f32 %v407_v7, %v1145_v24 }
 0x11e   :  { %v559_v4 = vpack.c.bf16 %v542_v2, %v541_v0 }
 0x11f   :  { %v455_v6 = vpop.f32.mrf.mxu2 }
 0x120   :  { %575 = vst [vmem:[%s1264_s4 + $0x70] sm:$0xff] %v559_v4  ;;  %v456_v8 = vadd.f32 %v455_v6, %v1143_v22  ;;  %v504_v9 = vpop.f32.mrf.mxu3 }
 0x122   :  { %v505_v10 = vadd.f32 %v504_v9, %v456_v8 }
 0x124   :  { %v544_v12 = vmax.f32 %v505_v10, %v1148_v28 }
 0x126   :  { %v560_v13 = vpack.c.bf16 %v544_v12, %v543_v11 }
 0x128   :  { %576 = vst [vmem:[%s1264_s4 + $0x78] sm:$0xff] %v560_v13 }

// kernel: _lambda_.13
= control target key start
LH: loop header
LB: loop body
LE: loop exit
PB: predicated region body
PF: predicated region fallthrough
CT: control target
= control target key end

     0   :  { %s1373_s1 = inlined_call_operand.vmem [shape: bf16[384,128], index: 1, kind: input, shape index: {}]   ;;  %s1374_s2 = inlined_call_operand.vmem [shape: f32[1,128], index: 2, kind: input, shape index: {}]   ;;  %s1375_s0 = inlined_call_operand.vmem [shape: bf16[128,384], index: 0, kind: input, shape index: {}]   ;;  %s1376_s3 = inlined_call_operand.vmem [shape: f32[1,128], index: 3, kind: input, shape index: {}]   ;;  %s1377_s4 = inlined_call_operand.vmem [shape: bf16[128,128], index: 4, kind: input, shape index: {}]   ;;  %s1378_s5 = inlined_call_operand.vmem [shape: bf16[128,128], index: 5, kind: output, shape index: {}]  }
   0x1   :  { %v850_v0 = vld [vmem:[%s1373_s1 + $0x38] sm:$0xff]  ;;  %v849_v3 = vld [vmem:[%s1373_s1 + $0x30] sm:$0xff]  ;;  %v848_v6 = vld [vmem:[%s1373_s1 + $0x28] sm:$0xff] }
   0x2   :  { %v1015_v1 = vld [vmem:[%s1373_s1 + $0x78] sm:$0xff]  ;;  %376 = vmatpush.bf16.msra.mxu0 %v850_v0  ;;  %953 = vmatpush.bf16.msra.mxu3 %v850_v0  ;;  %v1030_v4 = vld [vmem:[%s1373_s1 + $0x70] sm:$0xff]  ;;  %v856_v7 = vld [vmem:[%s1373_s1 + $0x68] sm:$0xff] }
   0x3   :  { %v1020_v2 = vld [vmem:[%s1373_s1 + $0xb8] sm:$0xff]  ;;  %425 = vmatpush.bf16.msra.mxu1 %v1015_v1  ;;  %v1035_v5 = vld [vmem:[%s1373_s1 + $0xb0] sm:$0xff]  ;;  %v1048_v8 = vld [vmem:[%s1373_s1 + $0xa8] sm:$0xff] }
   0x4   :  { %474 = vmatpush.bf16.msra.mxu2 %v1020_v2  ;;  %v847_v9 = vld [vmem:[%s1373_s1 + $0x20] sm:$0xff]  ;;  %v846_v12 = vld [vmem:[%s1373_s1 + $0x18] sm:$0xff]  ;;  %v845_v15 = vld [vmem:[%s1373_s1 + $0x10] sm:$0xff] }
   0x5   :  { %v855_v10 = vld [vmem:[%s1373_s1 + $0x60] sm:$0xff]  ;;  %v854_v13 = vld [vmem:[%s1373_s1 + $0x58] sm:$0xff]  ;;  %v853_v16 = vld [vmem:[%s1373_s1 + $0x50] sm:$0xff] }
   0x6   :  { %377 = vmatpush.bf16.msra.mxu0 %v849_v3  ;;  %954 = vmatpush.bf16.msra.mxu3 %v849_v3  ;;  %v1060_v11 = vld [vmem:[%s1373_s1 + $0xa0] sm:$0xff]  ;;  %v1072_v14 = vld [vmem:[%s1373_s1 + $0x98] sm:$0xff]  ;;  %v1084_v17 = vld [vmem:[%s1373_s1 + $0x90] sm:$0xff] }
   0x7   :  { %426 = vmatpush.bf16.msra.mxu1 %v1030_v4  ;;  %v844_v18 = vld [vmem:[%s1373_s1 + $0x8] sm:$0xff]  ;;  %v843_v21 = vld [vmem:[%s1373_s1] sm:$0xff]  ;;  %v701_v26 = vld [vmem:[%s1375_s0 + $0x90] sm:$0xf] }
   0x8   :  { %475 = vmatpush.bf16.msra.mxu2 %v1035_v5  ;;  %v852_v19 = vld [vmem:[%s1373_s1 + $0x48] sm:$0xff]  ;;  %v851_v22 = vld [vmem:[%s1373_s1 + $0x40] sm:$0xff]  ;;  %v838_v27 = vld [vmem:[%s1375_s0 + $0x98] sm:$0xf0] }
   0x9   :  { %v1096_v20 = vld [vmem:[%s1373_s1 + $0x88] sm:$0xff]  ;;  %v1107_v23 = vld [vmem:[%s1373_s1 + $0x80] sm:$0xff]  ;;  %v631_v29 = vld [vmem:[%s1375_s0 + $0xc] sm:$0xf0]  ;;  %v702_v33 = vor.u32 %v838_v27, %v701_v26 }
   0xa   :  { %378 = vmatpush.bf16.msra.mxu0 %v848_v6  ;;  %955 = vmatpush.bf16.msra.mxu3 %v848_v6  ;;  %v629_v24 = vld [vmem:[%s1375_s0] sm:$0xf]  ;;  %v820_v25 = vld [vmem:[%s1375_s0 + $0x8] sm:$0xf0]  ;;  %v819_v28 = vld [vmem:[%s1375_s0 + $0x4] sm:$0xf] }
   0xb   :  { %427 = vmatpush.bf16.msra.mxu1 %v856_v7  ;;  %v637_v30 = vld [vmem:[%s1375_s0 + $0x8] sm:$0xf]  ;;  %v821_v31 = vld [vmem:[%s1375_s0 + $0x10] sm:$0xf0]  ;;  %v630_v32 = vor.u32 %v820_v25, %v629_v24  ;;  %v634_v34 = vor.u32 %v819_v28, %v631_v29  ;;  %v641_v36 = vld [vmem:[%s1375_s0 + $0x18] sm:$0xf] }
   0xc   :  { %476 = vmatpush.bf16.msra.mxu2 %v1048_v8  ;;  %v638_v35 = vor.u32 %v821_v31, %v637_v30  ;;  %v823_v37 = vld [vmem:[%s1375_s0 + $0x20] sm:$0xf0]  ;;  %v713_v38 = vld [vmem:[%s1375_s0 + $0xa8] sm:$0xf]  ;;  %v841_v39 = vld [vmem:[%s1375_s0 + $0xb0] sm:$0xf0] }
   0xd   :  { %v822_v40 = vld [vmem:[%s1375_s0 + $0x1c] sm:$0xf]  ;;  %v643_v41 = vld [vmem:[%s1375_s0 + $0x24] sm:$0xf0]  ;;  %v649_v42 = vld [vmem:[%s1375_s0 + $0x20] sm:$0xf]  ;;  %v642_v44 = vor.u32 %v823_v37, %v641_v36  ;;  %v714_v45 = vor.u32 %v841_v39, %v713_v38 }
   0xe   :  { %379 = vmatpush.bf16.msra.mxu0 %v847_v9  ;;  %956 = vmatpush.bf16.msra.mxu3 %v847_v9  ;;  %v824_v43 = vld [vmem:[%s1375_s0 + $0x28] sm:$0xf0]  ;;  %v646_v46 = vor.u32 %v822_v40, %v643_v41  ;;  %v653_v48 = vld [vmem:[%s1375_s0 + $0x30] sm:$0xf]  ;;  %v826_v49 = vld [vmem:[%s1375_s0 + $0x38] sm:$0xf0] }
   0xf   :  { %428 = vmatpush.bf16.msra.mxu1 %v855_v10  ;;  %v650_v47 = vor.u32 %v824_v43, %v649_v42  ;;  %v825_v50 = vld [vmem:[%s1375_s0 + $0x34] sm:$0xf]  ;;  %v703_v52 = vld [vmem:[%s1375_s0 + $0x9c] sm:$0xf0]  ;;  %v661_v54 = vld [vmem:[%s1375_s0 + $0x38] sm:$0xf]  ;;  %v654_v56 = vor.u32 %v826_v49, %v653_v48 }
  0x10   :  { %477 = vmatpush.bf16.msra.mxu2 %v1060_v11  ;;  %v837_v51 = vld [vmem:[%s1375_s0 + $0x94] sm:$0xf]  ;;  %v655_v53 = vld [vmem:[%s1375_s0 + $0x3c] sm:$0xf0]  ;;  %v827_v55 = vld [vmem:[%s1375_s0 + $0x40] sm:$0xf0] }
  0x11   :  { %v706_v57 = vor.u32 %v837_v51, %v703_v52  ;;  %v658_v58 = vor.u32 %v825_v50, %v655_v53  ;;  %v662_v59 = vor.u32 %v827_v55, %v661_v54  ;;  %v665_v60 = vld [vmem:[%s1375_s0 + $0x48] sm:$0xf]  ;;  %v829_v61 = vld [vmem:[%s1375_s0 + $0x50] sm:$0xf0]  ;;  %v828_v62 = vld [vmem:[%s1375_s0 + $0x4c] sm:$0xf] }
  0x12   :  { %380 = vmatpush.bf16.msra.mxu0 %v846_v12  ;;  %957 = vmatpush.bf16.msra.mxu3 %v846_v12  ;;  %v840_v63 = vld [vmem:[%s1375_s0 + $0xac] sm:$0xf]  ;;  %v715_v0 = vld [vmem:[%s1375_s0 + $0xb4] sm:$0xf0]  ;;  %v830_v3 = vld [vmem:[%s1375_s0 + $0x58] sm:$0xf0] }
  0x13   :  { %429 = vmatpush.bf16.msra.mxu1 %v854_v13  ;;  %v832_v9 = vld [vmem:[%s1375_s0 + $0x68] sm:$0xf0]  ;;  %v839_v12 = vld [vmem:[%s1375_s0 + $0xa0] sm:$0xf0]  ;;  %v842_v24 = vld [vmem:[%s1375_s0 + $0xb8] sm:$0xf0] }
  0x14   :  { %478 = vmatpush.bf16.msra.mxu2 %v1072_v14  ;;  %v691_v25 = vld [vmem:[%s1375_s0 + $0x84] sm:$0xf0]  ;;  %v697_v26 = vld [vmem:[%s1375_s0 + $0x80] sm:$0xf]  ;;  %v836_v27 = vld [vmem:[%s1375_s0 + $0x88] sm:$0xf0] }
  0x15   :  { %v698_v31 = vor.u32 %v836_v27, %v697_v26  ;;  %v868_v40 = vld [vmem:[%s1377_s4] sm:$0xff]  }
  0x16   :  { %381 = vmatpush.bf16.msra.mxu0 %v845_v15  ;;  %958 = vmatpush.bf16.msra.mxu3 %v845_v15  ;;  %v833_v15 = vld [vmem:[%s1375_s0 + $0x70] sm:$0xf0]  ;;  %v1282_v50 = vld [vmem:[%s1376_s3] ss:$0 sm:$0xff] }
  0x17   :  { %430 = vmatpush.bf16.msra.mxu1 %v853_v16 }
  0x18   :  { %479 = vmatpush.bf16.msra.mxu2 %v1084_v17 }
  0x1a   :  { %382 = vmatpush.bf16.msra.mxu0 %v844_v18  ;;  %959 = vmatpush.bf16.msra.mxu3 %v844_v18 }
  0x1b   :  { %431 = vmatpush.bf16.msra.mxu1 %v852_v19 }
  0x1c   :  { %480 = vmatpush.bf16.msra.mxu2 %v1096_v20 }
  0x1e   :  { %383 = vmatpush.bf16.msra.mxu0 %v843_v21  ;;  %960 = vmatpush.bf16.msra.mxu3 %v843_v21  ;;  %v835_v21 = vld [vmem:[%s1375_s0 + $0x80] sm:$0xf0] }
  0x1f   :  { %432 = vmatpush.bf16.msra.mxu1 %v851_v22 }
  0x20   :  { %481 = vmatpush.bf16.msra.mxu2 %v1107_v23 }
  0x21   :  { %384 = vmatmul.bf16.vlgmr.msra.gmra.mxu0 %v630_v32  ;;  %414 = vmatmul.bf16.vlgmr.msra.gmra.mxu3 %v702_v33  ;;  %v1268_v32 = vld [vmem:[%s1374_s2] ss:$0 sm:$0xff] }
  0x22   :  { %961 = vmatpush.bf16.msrb.mxu3 %v1015_v1  ;;  %433 = vmatmul.bf16.vlgmr.msra.gmra.mxu1 %v634_v34  ;;  %v667_v1 = vld [vmem:[%s1375_s0 + $0x54] sm:$0xf0] }
  0x23   :  { %482 = vmatmul.bf16.vlgmr.msra.gmra.mxu2 %v638_v35  ;;  %v670_v6 = vor.u32 %v828_v62, %v667_v1 }
  0x26   :  { %962 = vmatpush.bf16.msrb.mxu3 %v1030_v4  ;;  %v666_v4 = vor.u32 %v829_v61, %v665_v60 }
  0x2a   :  { %963 = vmatpush.bf16.msrb.mxu3 %v856_v7 }
  0x2e   :  { %964 = vmatpush.bf16.msrb.mxu3 %v855_v10  ;;  %v831_v10 = vld [vmem:[%s1375_s0 + $0x64] sm:$0xf] }
  0x31   :  { %389 = vmatmul.bf16.gmra.mxu0 %v642_v44  ;;  %419 = vmatmul.bf16.gmra.mxu3 %v714_v45  ;;  %v869_v44 = vunpack.c.l.bf16 %v868_v40 }
  0x32   :  { %965 = vmatpush.bf16.msrb.mxu3 %v854_v13  ;;  %438 = vmatmul.bf16.gmra.mxu1 %v646_v46  ;;  %v679_v13 = vld [vmem:[%s1375_s0 + $0x6c] sm:$0xf0] }
  0x33   :  { %487 = vmatmul.bf16.gmra.mxu2 %v650_v47  ;;  %v682_v18 = vor.u32 %v831_v10, %v679_v13  ;;  %v870_v47 = vunpack.c.h.bf16 %v868_v40 }
  0x36   :  { %966 = vmatpush.bf16.msrb.mxu3 %v853_v16 }
  0x3a   :  { %967 = vmatpush.bf16.msrb.mxu3 %v852_v19 }
  0x3e   :  { %968 = vmatpush.bf16.msrb.mxu3 %v851_v22  ;;  %v834_v22 = vld [vmem:[%s1375_s0 + $0x7c] sm:$0xf] }
  0x3f   :  { %v694_v30 = vor.u32 %v834_v22, %v691_v25 }
  0x41   :  { %394 = vmatmul.bf16.gmra.mxu0 %v654_v56  ;;  %463 = vmatmul.bf16.vlgmr.msrb.gmra.mxu3 %v706_v57 }
  0x42   :  { %969 = vmatpush.bf16.msra.mxu3 %v1020_v2  ;;  %443 = vmatmul.bf16.gmra.mxu1 %v658_v58  ;;  %v673_v2 = vld [vmem:[%s1375_s0 + $0x50] sm:$0xf] }
  0x43   :  { %492 = vmatmul.bf16.gmra.mxu2 %v662_v59  ;;  %v674_v7 = vor.u32 %v830_v3, %v673_v2 }
  0x46   :  { %970 = vmatpush.bf16.msra.mxu3 %v1035_v5  ;;  %v718_v5 = vor.u32 %v840_v63, %v715_v0  ;;  %v939_v63 = vld [vmem:[%s1377_s4 + $0x8] sm:$0xff]  }
  0x47   :  { %v873_v3 = vunpack.c.l.bf16 %v939_v63 }
  0x4a   :  { %971 = vmatpush.bf16.msra.mxu3 %v1048_v8  ;;  %v677_v8 = vld [vmem:[%s1375_s0 + $0x60] sm:$0xf] }
  0x4b   :  { %v678_v16 = vor.u32 %v832_v9, %v677_v8 }
  0x4e   :  { %972 = vmatpush.bf16.msra.mxu3 %v1060_v11  ;;  %v709_v11 = vld [vmem:[%s1375_s0 + $0x98] sm:$0xf] }
  0x51   :  { %399 = vmatmul.bf16.gmra.mxu0 %v666_v4  ;;  %468 = vmatmul.bf16.gmra.mxu3 %v718_v5 }
  0x52   :  { %973 = vmatpush.bf16.msra.mxu3 %v1072_v14  ;;  %448 = vmatmul.bf16.gmra.mxu1 %v670_v6  ;;  %v685_v14 = vld [vmem:[%s1375_s0 + $0x68] sm:$0xf]  ;;  %v874_v6 = vunpack.c.h.bf16 %v939_v63 }
  0x53   :  { %497 = vmatmul.bf16.gmra.mxu2 %v674_v7  ;;  %v686_v19 = vor.u32 %v833_v15, %v685_v14 }
  0x56   :  { %974 = vmatpush.bf16.msra.mxu3 %v1084_v17  ;;  %v710_v17 = vor.u32 %v839_v12, %v709_v11 }
  0x5a   :  { %975 = vmatpush.bf16.msra.mxu3 %v1096_v20  ;;  %v689_v20 = vld [vmem:[%s1375_s0 + $0x78] sm:$0xf] }
  0x5b   :  { %v690_v28 = vor.u32 %v835_v21, %v689_v20  ;;  %v940_v21 = vld [vmem:[%s1377_s4 + $0x10] sm:$0xff]  }
  0x5c   :  { %v877_v25 = vunpack.c.l.bf16 %v940_v21 }
  0x5e   :  { %976 = vmatpush.bf16.msra.mxu3 %v1107_v23  ;;  %v721_v23 = vld [vmem:[%s1375_s0 + $0xb0] sm:$0xf] }
  0x5f   :  { %v722_v29 = vor.u32 %v842_v24, %v721_v23 }
  0x61   :  { %404 = vmatmul.bf16.gmra.mxu0 %v678_v16  ;;  %512 = vmatmul.bf16.vlgmr.msra.gmra.mxu3 %v710_v17 }
  0x62   :  { %453 = vmatmul.bf16.gmra.mxu1 %v682_v18 }
  0x63   :  { %502 = vmatmul.bf16.gmra.mxu2 %v686_v19 }
  0x71   :  { %409 = vmatmul.bf16.gmra.mxu0 %v690_v28  ;;  %517 = vmatmul.bf16.gmra.mxu3 %v722_v29  ;;  %v878_v28 = vunpack.c.h.bf16 %v940_v21 }
  0x72   :  { %458 = vmatmul.bf16.gmra.mxu1 %v694_v30 }
  0x73   :  { %507 = vmatmul.bf16.gmra.mxu2 %v698_v31 }
  0x9e   :  { %v385_v33 = vpop.f32.mrf.mxu0 }
  0x9f   :  { %v434_v34 = vpop.f32.mrf.mxu1  ;;  %v386_v35 = vadd.f32 %v1268_v32, %v385_v33 }
  0xa1   :  { %v435_v38 = vadd.f32 %v434_v34, %v386_v35 }
  0xa4   :  { %v1271_v36 = vpop.f32.mrf.mxu3 }
  0xa6   :  { %v483_v37 = vpop.f32.mrf.mxu2  ;;  %v387_v39 = vpop.f32.mrf.mxu0 }
  0xa7   :  { %v436_v41 = vpop.f32.mrf.mxu1  ;;  %v388_v42 = vadd.f32 %v1268_v32, %v387_v39  ;;  %v484_v43 = vadd.f32 %v483_v37, %v435_v38 }
  0xa9   :  { %v437_v45 = vadd.f32 %v436_v41, %v388_v42  ;;  %v555_v49 = vadd.f32 %v869_v44, %v484_v43 }
  0xab   :  { %v575_v55 = vmax.f32 %v555_v49, %v1282_v50 }
  0xac   :  { %v1277_v46 = vpop.f32.mrf.mxu3 }
  0xae   :  { %v485_v48 = vpop.f32.mrf.mxu2  ;;  %v390_v52 = vpop.f32.mrf.mxu0 }
  0xaf   :  { %v486_v51 = vadd.f32 %v485_v48, %v437_v45  ;;  %v439_v53 = vpop.f32.mrf.mxu1  ;;  %v391_v57 = vadd.f32 %v1268_v32, %v390_v52  ;;  %v941_v45 = vld [vmem:[%s1377_s4 + $0x18] sm:$0xff]  }
  0xb1   :  { %v556_v54 = vadd.f32 %v870_v47, %v486_v51  ;;  %v440_v61 = vadd.f32 %v439_v53, %v391_v57  ;;  %v881_v51 = vunpack.c.l.bf16 %v941_v45 }
  0xb3   :  { %v576_v56 = vmax.f32 %v556_v54, %v1282_v50  ;;  %v882_v54 = vunpack.c.h.bf16 %v941_v45 }
  0xb4   :  { %v1287_v59 = vpop.f32.mrf.mxu3 }
  0xb5   :  { %v902_v58 = vpack.c.bf16 %v576_v56, %v575_v55 }
  0xb6   :  { %v488_v60 = vpop.f32.mrf.mxu2  ;;  %v392_v62 = vpop.f32.mrf.mxu0 }
  0xb7   :  { %903 = vst [vmem:[%s1378_s5] sm:$0xff] %v902_v58   ;;  %v441_v0 = vpop.f32.mrf.mxu1  ;;  %v393_v1 = vadd.f32 %v1268_v32, %v392_v62  ;;  %v489_v2 = vadd.f32 %v488_v60, %v440_v61 }
  0xb9   :  { %v442_v4 = vadd.f32 %v441_v0, %v393_v1  ;;  %v557_v8 = vadd.f32 %v873_v3, %v489_v2  ;;  %v416_v3 = vadd.f32 %v1268_v32, %v1271_v36  ;;  %v418_v36 = vadd.f32 %v1268_v32, %v1277_v46 }
  0xbb   :  { %v577_v13 = vmax.f32 %v557_v8, %v1282_v50 }
  0xbc   :  { %v1296_v5 = vpop.f32.mrf.mxu3 }
  0xbe   :  { %v490_v7 = vpop.f32.mrf.mxu2  ;;  %v395_v10 = vpop.f32.mrf.mxu0 }
  0xbf   :  { %v491_v9 = vadd.f32 %v490_v7, %v442_v4  ;;  %v444_v11 = vpop.f32.mrf.mxu1  ;;  %v396_v15 = vadd.f32 %v1268_v32, %v395_v10  ;;  %v944_v7 = vld [vmem:[%s1377_s4 + $0x30] sm:$0xff]   ;;  %v942_v10 = vld [vmem:[%s1377_s4 + $0x20] sm:$0xff]  }
  0xc0   :  { %v886_v21 = vunpack.c.h.bf16 %v942_v10 }
  0xc1   :  { %v558_v12 = vadd.f32 %v874_v6, %v491_v9  ;;  %v445_v19 = vadd.f32 %v444_v11, %v396_v15 }
  0xc3   :  { %v578_v14 = vmax.f32 %v558_v12, %v1282_v50 }
  0xc4   :  { %v464_v17 = vpop.f32.mrf.mxu3 }
  0xc5   :  { %v907_v16 = vpack.c.bf16 %v578_v14, %v577_v13  ;;  %v465_v9 = vadd.f32 %v464_v17, %v416_v3  ;;  %v893_v14 = vunpack.c.l.bf16 %v944_v7 }
  0xc6   :  { %v493_v18 = vpop.f32.mrf.mxu2  ;;  %v397_v20 = vpop.f32.mrf.mxu0 }
  0xc7   :  { %946 = vst [vmem:[%s1378_s5 + $0x8] sm:$0xff] %v907_v16   ;;  %v446_v22 = vpop.f32.mrf.mxu1  ;;  %v398_v23 = vadd.f32 %v1268_v32, %v397_v20  ;;  %v494_v24 = vadd.f32 %v493_v18, %v445_v19  ;;  %v885_v16 = vunpack.c.l.bf16 %v942_v10  ;;  %v894_v19 = vunpack.c.h.bf16 %v944_v7 }
  0xc9   :  { %v447_v26 = vadd.f32 %v446_v22, %v398_v23  ;;  %v559_v30 = vadd.f32 %v877_v25, %v494_v24 }
  0xcb   :  { %v579_v37 = vmax.f32 %v559_v30, %v1282_v50 }
  0xcc   :  { %v466_v27 = vpop.f32.mrf.mxu3 }
  0xcd   :  { %v467_v18 = vadd.f32 %v466_v27, %v418_v36 }
  0xce   :  { %v495_v29 = vpop.f32.mrf.mxu2  ;;  %v400_v33 = vpop.f32.mrf.mxu0 }
  0xcf   :  { %v496_v31 = vadd.f32 %v495_v29, %v447_v26  ;;  %v449_v34 = vpop.f32.mrf.mxu1  ;;  %v401_v39 = vadd.f32 %v1268_v32, %v400_v33 }
  0xd1   :  { %v560_v35 = vadd.f32 %v878_v28, %v496_v31  ;;  %v450_v43 = vadd.f32 %v449_v34, %v401_v39 }
  0xd3   :  { %v580_v38 = vmax.f32 %v560_v35, %v1282_v50 }
  0xd4   :  { %v1311_v41 = vpop.f32.mrf.mxu3 }
  0xd5   :  { %v912_v40 = vpack.c.bf16 %v580_v38, %v579_v37 }
  0xd6   :  { %v498_v42 = vpop.f32.mrf.mxu2  ;;  %v402_v44 = vpop.f32.mrf.mxu0 }
  0xd7   :  { %947 = vst [vmem:[%s1378_s5 + $0x10] sm:$0xff] %v912_v40   ;;  %v451_v47 = vpop.f32.mrf.mxu1  ;;  %v403_v48 = vadd.f32 %v1268_v32, %v402_v44  ;;  %v499_v49 = vadd.f32 %v498_v42, %v450_v43  ;;  %v421_v40 = vadd.f32 %v1268_v32, %v1287_v59  ;;  %v945_v44 = vld [vmem:[%s1377_s4 + $0x38] sm:$0xff]   ;;  %v943_v59 = vld [vmem:[%s1377_s4 + $0x28] sm:$0xff]  }
  0xd9   :  { %v452_v52 = vadd.f32 %v451_v47, %v403_v48  ;;  %v561_v56 = vadd.f32 %v881_v51, %v499_v49  ;;  %v470_v47 = vadd.f32 %v1311_v41, %v421_v40  ;;  %v423_v49 = vadd.f32 %v1268_v32, %v1296_v5 }
  0xdb   :  { %v581_v62 = vmax.f32 %v561_v56, %v1282_v50 }
  0xdc   :  { %v1320_v53 = vpop.f32.mrf.mxu3 }
  0xdd   :  { %v472_v56 = vadd.f32 %v1320_v53, %v423_v49 }
  0xde   :  { %v500_v55 = vpop.f32.mrf.mxu2  ;;  %v405_v58 = vpop.f32.mrf.mxu0 }
  0xdf   :  { %v501_v57 = vadd.f32 %v500_v55, %v452_v52  ;;  %v454_v60 = vpop.f32.mrf.mxu1  ;;  %v406_v0 = vadd.f32 %v1268_v32, %v405_v58  ;;  %v897_v52 = vunpack.c.l.bf16 %v945_v44  ;;  %v889_v55 = vunpack.c.l.bf16 %v943_v59 }
  0xe0   :  { %v898_v58 = vunpack.c.h.bf16 %v945_v44 }
  0xe1   :  { %v562_v61 = vadd.f32 %v882_v54, %v501_v57  ;;  %v455_v6 = vadd.f32 %v454_v60, %v406_v0 }
  0xe3   :  { %v582_v63 = vmax.f32 %v562_v61, %v1282_v50  ;;  %v890_v61 = vunpack.c.h.bf16 %v943_v59 }
  0xe4   :  { %v513_v2 = vpop.f32.mrf.mxu3 }
  0xe5   :  { %v917_v1 = vpack.c.bf16 %v582_v63, %v581_v62  ;;  %v514_v13 = vadd.f32 %v513_v2, %v465_v9 }
  0xe6   :  { %v503_v4 = vpop.f32.mrf.mxu2  ;;  %v407_v8 = vpop.f32.mrf.mxu0 }
  0xe7   :  { %948 = vst [vmem:[%s1378_s5 + $0x18] sm:$0xff] %v917_v1   ;;  %v456_v11 = vpop.f32.mrf.mxu1  ;;  %v408_v12 = vadd.f32 %v1268_v32, %v407_v8  ;;  %v504_v15 = vadd.f32 %v503_v4, %v455_v6  ;;  %v567_v17 = vadd.f32 %v893_v14, %v514_v13 }
  0xe9   :  { %v457_v20 = vadd.f32 %v456_v11, %v408_v12  ;;  %v563_v25 = vadd.f32 %v885_v16, %v504_v15  ;;  %v587_v31 = vmax.f32 %v567_v17, %v1282_v50 }
  0xeb   :  { %v583_v34 = vmax.f32 %v563_v25, %v1282_v50 }
  0xec   :  { %v515_v22 = vpop.f32.mrf.mxu3 }
  0xed   :  { %v516_v24 = vadd.f32 %v515_v22, %v467_v18 }
  0xee   :  { %v505_v23 = vpop.f32.mrf.mxu2  ;;  %v410_v28 = vpop.f32.mrf.mxu0 }
  0xef   :  { %v506_v26 = vadd.f32 %v505_v23, %v457_v20  ;;  %v568_v29 = vadd.f32 %v894_v19, %v516_v24  ;;  %v459_v33 = vpop.f32.mrf.mxu1  ;;  %v411_v35 = vadd.f32 %v1268_v32, %v410_v28 }
  0xf1   :  { %v564_v30 = vadd.f32 %v886_v21, %v506_v26  ;;  %v588_v46 = vmax.f32 %v568_v29, %v1282_v50  ;;  %v460_v43 = vadd.f32 %v459_v33, %v411_v35 }
  0xf3   :  { %v584_v27 = vmax.f32 %v564_v30, %v1282_v50  ;;  %v932_v37 = vpack.c.bf16 %v588_v46, %v587_v31 }
  0xf4   :  { %v518_v39 = vpop.f32.mrf.mxu3 }
  0xf5   :  { %v922_v38 = vpack.c.bf16 %v584_v27, %v583_v34  ;;  %951 = vst [vmem:[%s1378_s5 + $0x30] sm:$0xff] %v932_v37   ;;  %v519_v51 = vadd.f32 %v518_v39, %v470_v47 }
  0xf6   :  { %v508_v42 = vpop.f32.mrf.mxu2  ;;  %v412_v45 = vpop.f32.mrf.mxu0 }
  0xf7   :  { %949 = vst [vmem:[%s1378_s5 + $0x20] sm:$0xff] %v922_v38   ;;  %v413_v48 = vadd.f32 %v1268_v32, %v412_v45  ;;  %v509_v54 = vadd.f32 %v508_v42, %v460_v43  ;;  %v461_v57 = vpop.f32.mrf.mxu1  ;;  %v569_v62 = vadd.f32 %v897_v52, %v519_v51 }
  0xf9   :  { %v462_v60 = vadd.f32 %v461_v57, %v413_v48  ;;  %v565_v1 = vadd.f32 %v889_v55, %v509_v54  ;;  %v589_v32 = vmax.f32 %v569_v62, %v1282_v50 }
  0xfb   :  { %v585_v6 = vmax.f32 %v565_v1, %v1282_v50 }
  0xfc   :  { %v520_v41 = vpop.f32.mrf.mxu3 }
  0xfd   :  { %v521_v0 = vadd.f32 %v520_v41, %v472_v56 }
  0xfe   :  { %v510_v63 = vpop.f32.mrf.mxu2 }
  0xff   :  { %v511_v2 = vadd.f32 %v510_v63, %v462_v60  ;;  %v570_v3 = vadd.f32 %v898_v58, %v521_v0 }
 0x101   :  { %v566_v4 = vadd.f32 %v890_v61, %v511_v2  ;;  %v590_v5 = vmax.f32 %v570_v3, %v1282_v50 }
 0x103   :  { %v586_v53 = vmax.f32 %v566_v4, %v1282_v50  ;;  %v937_v7 = vpack.c.bf16 %v590_v5, %v589_v32 }
 0x105   :  { %v927_v8 = vpack.c.bf16 %v586_v53, %v585_v6  ;;  %952 = vst [vmem:[%s1378_s5 + $0x38] sm:$0xff] %v937_v7  }
 0x107   :  { %950 = vst [vmem:[%s1378_s5 + $0x28] sm:$0xff] %v927_v8  }

</bundles_post_ra>
